<compile_context>
chip_gen: v6e
topology: v6e:2x2x1
jax: 0.10.0
libtpu: 0.0.40
codegen_flags: <defaults>
</compile_context>

<pallas_src>
import functools

import jax
import jax.numpy as jnp
from jax.experimental import pallas as pl
from jax.experimental.pallas import tpu as pltpu


def _fkaconv_kernel(pos_ref, sup_ref, x_ref, mask_ref,
                    w1_ref, w2a_ref, w2b_ref, w3a_ref, w3b_ref, wcv_ref,
                    out_ref, *, inv_radius):
    # Per grid-cell shapes (TS support points, K neighbors each, k-major):
    #   pos_ref : (D,   K, TS)   gathered neighbor positions
    #   sup_ref : (D,   TS)      support points
    #   x_ref   : (Cin, K, TS)   gathered neighbor features
    #   mask_ref: (K,   TS)      valid-neighbor mask (float)
    #   w1_ref  : (KS, D)        fc1 weight
    #   w2a/w2b, w3a/w3b : (KS, KS)  halves of the fc2/fc3 (KS, 2KS) weights
    #   wcv_ref : (Cout, Cin*KS) flattened cv weight
    #   out_ref : (Cout, TS)
    D, K, TS = pos_ref.shape
    Cin = x_ref.shape[0]
    KS = w1_ref.shape[0]

    pos = pos_ref[...]                                   # (D, K, TS)
    sup = sup_ref[...]                                   # (D, TS)
    pts_raw = pos - sup[:, None, :]                      # (D, K, TS)
    # mask_pts computed BEFORE nan_to_num (matches torch ordering)
    mask_pts = jnp.logical_not(jnp.isinf(pts_raw[0]))    # (K, TS)
    # torch.nan_to_num(pts, 0., 0., 0.) then / radius
    pts = jnp.where(jnp.isfinite(pts_raw), pts_raw, 0.0) * inv_radius

    # distance_weight = F.normalize(mask.float(), dim=K) * mask_pts
    m = mask_ref[...]                                    # (K, TS)
    norm = jnp.sqrt(jnp.sum(m * m, axis=0, keepdims=True))
    dw = (m / jnp.maximum(norm, 1e-12)) * mask_pts.astype(jnp.float32)
    dw3 = dw[None, :, :]                                 # (1, K, TS)

    def fc(w, a_flat):
        # (KS, I) @ (I, K*TS) on the MXU, reshaped back to (KS, K, TS)
        return jnp.dot(w, a_flat,
                       preferred_element_type=jnp.float32).reshape(KS, K, TS)

    def max_over_k(a):
        # max over the neighbor axis (K is small -> static unroll)
        r = a[:, 0, :]
        for k in range(1, K):
            r = jnp.maximum(r, a[:, k, :])
        return r                                          # (KS, TS)

    # fc1 -> relu -> * dw
    m1 = jnp.maximum(fc(w1_ref[...], pts.reshape(D, K * TS)), 0.0) * dw3

    # fc2 on [m1 ; max_k m1]  (concat folded into the two weight halves)
    mp1 = max_over_k(m1)                                  # (KS, TS)
    b2 = jnp.dot(w2b_ref[...], mp1, preferred_element_type=jnp.float32)
    m2 = jnp.maximum(fc(w2a_ref[...], m1.reshape(KS, K * TS)) + b2[:, None, :],
                     0.0) * dw3

    # fc3 on [m2 ; max_k m2]
    mp2 = max_over_k(m2)
    b3 = jnp.dot(w3b_ref[...], mp2, preferred_element_type=jnp.float32)
    m3 = jnp.maximum(fc(w3a_ref[...], m2.reshape(KS, K * TS)) + b3[:, None, :],
                     0.0) * dw3                           # (KS, K, TS)

    # cv: H[cin, ks, s] = sum_k x[cin, k, s] * m3[ks, k, s]  (VPU, K small),
    # then one big MXU matmul (Cout, Cin*KS) x (Cin*KS, TS).
    x = x_ref[...]                                        # (Cin, K, TS)
    h = None
    for k in range(K):                                    # static unroll
        term = x[:, k, :][:, None, :] * m3[:, k, :][None, :, :]  # (Cin,KS,TS)
        h = term if h is None else h + term
    feats = jnp.dot(wcv_ref[...], h.reshape(Cin * KS, TS),
                    preferred_element_type=jnp.float32)   # (Cout, TS)

    # features[isinf(support[:, :1])] = +inf
    sup_inf = jnp.isinf(sup[0:1, :])                      # (1, TS)
    out_ref[...] = jnp.where(sup_inf, jnp.inf, feats)


def fkaconv_pallas(x, pos, support_points, neighbors_indices, radius,
                   w1, w2, w3, wcv, *, ts=256):
    """x:(B,Cin,N) pos:(B,D,N) support:(B,D,S) neighbors:(B,S,K) -> (B,Cout,S)

    radius must be a Python float (baked in as a compile-time constant).
    """
    x = x.astype(jnp.float32)
    pos = pos.astype(jnp.float32)
    support_points = support_points.astype(jnp.float32)
    w1 = w1.astype(jnp.float32)
    w2 = w2.astype(jnp.float32)
    w3 = w3.astype(jnp.float32)
    wcv = wcv.astype(jnp.float32)

    B, Cin, N = x.shape
    D = pos.shape[1]
    S, K = neighbors_indices.shape[1], neighbors_indices.shape[2]
    KS = w1.shape[0]
    Cout = wcv.shape[0]

    # Neighbor masking + data-dependent gather stays in JAX.  Gather with
    # k-major indices so the gathered arrays come out directly in (B, C, K, S)
    # layout (only the tiny index array is transposed, not the big tensors).
    mask = neighbors_indices > -1
    idx = jnp.where(mask, neighbors_indices, 0)           # functional in-place
    idx_km = jnp.swapaxes(idx, 1, 2).reshape(B, 1, K * S)  # (B,1,K*S)
    pos_g = jnp.take_along_axis(
        pos, jnp.broadcast_to(idx_km, (B, D, K * S)), axis=2
    ).reshape(B, D, K, S)
    x_g = jnp.take_along_axis(
        x, jnp.broadcast_to(idx_km, (B, Cin, K * S)), axis=2
    ).reshape(B, Cin, K, S)
    mask_km = jnp.swapaxes(mask, 1, 2).astype(jnp.float32)  # (B, K, S)

    # Fold the concats into split fc2/fc3 halves; flatten the cv weight.
    w2a, w2b = w2[:, :KS], w2[:, KS:]
    w3a, w3b = w3[:, :KS], w3[:, KS:]
    wcv_flat = wcv.reshape(Cout, Cin * KS)

    # Tile over support points (lane-dense); pad S to a multiple of the tile.
    if S < 128:
        TS = S
    else:
        TS = max(128, (min(int(ts), 512) // 128) * 128)
        TS = min(TS, ((S + 127) // 128) * 128)
    S_pad = -(-S // TS) * TS
    sup_p = support_points
    if S_pad != S:
        p = S_pad - S
        pos_g = jnp.pad(pos_g, ((0, 0), (0, 0), (0, 0), (0, p)))
        x_g = jnp.pad(x_g, ((0, 0), (0, 0), (0, 0), (0, p)))
        mask_km = jnp.pad(mask_km, ((0, 0), (0, 0), (0, p)))
        sup_p = jnp.pad(support_points, ((0, 0), (0, 0), (0, p)))

    grid = (B, S_pad // TS)
    kernel = functools.partial(_fkaconv_kernel, inv_radius=float(1.0 / radius))

    out = pl.pallas_call(
        kernel,
        out_shape=jax.ShapeDtypeStruct((B, Cout, S_pad), jnp.float32),
        grid=grid,
        in_specs=[
            pl.BlockSpec((None, D, K, TS), lambda b, j: (b, 0, 0, j)),    # pos
            pl.BlockSpec((None, D, TS), lambda b, j: (b, 0, j)),          # support
            pl.BlockSpec((None, Cin, K, TS), lambda b, j: (b, 0, 0, j)),  # x
            pl.BlockSpec((None, K, TS), lambda b, j: (b, 0, j)),          # mask
            pl.BlockSpec((KS, D), lambda b, j: (0, 0)),                   # fc1 w
            pl.BlockSpec((KS, KS), lambda b, j: (0, 0)),                  # fc2 w (a)
            pl.BlockSpec((KS, KS), lambda b, j: (0, 0)),                  # fc2 w (b)
            pl.BlockSpec((KS, KS), lambda b, j: (0, 0)),                  # fc3 w (a)
            pl.BlockSpec((KS, KS), lambda b, j: (0, 0)),                  # fc3 w (b)
            pl.BlockSpec((Cout, Cin * KS), lambda b, j: (0, 0)),          # cv w
        ],
        out_specs=pl.BlockSpec((None, Cout, TS), lambda b, j: (b, 0, j)),
        compiler_params=pltpu.CompilerParams(
            dimension_semantics=("parallel", "parallel")),
    )(pos_g, sup_p, x_g, mask_km, w1, w2a, w2b, w3a, w3b, wcv_flat)

    # TODO(synk): torch forward does `print(features)` as a side effect; omitted.
    return out[:, :, :S]                                  # (B, Cout, S)


def fkaconv_reference(x, pos, support_points, neighbors_indices, radius,
                      w1, w2, w3, wcv):
    """Pure-JAX reference mirroring the PyTorch forward exactly."""
    B, Cin, N = x.shape
    D = pos.shape[1]
    S, K = neighbors_indices.shape[1], neighbors_indices.shape[2]
    mask = neighbors_indices > -1
    idx = jnp.where(mask, neighbors_indices, 0)
    idx_flat = idx.reshape(B, 1, S * K)
    pos_g = jnp.take_along_axis(
        pos, jnp.broadcast_to(idx_flat, (B, D, S * K)), 2).reshape(B, D, S, K)
    x_g = jnp.take_along_axis(
        x, jnp.broadcast_to(idx_flat, (B, Cin, S * K)), 2).reshape(B, Cin, S, K)
    pts = pos_g - support_points[:, :, :, None]
    mask_pts = ~jnp.isinf(pts[:, :1])
    pts = jnp.where(jnp.isfinite(pts), pts, 0.0) / radius
    dw = mask.astype(jnp.float32)
    dw = dw / jnp.maximum(jnp.sqrt(jnp.sum(dw * dw, axis=2, keepdims=True)), 1e-12)
    dw = dw[:, None] * mask_pts.astype(jnp.float32)
    hi = jax.lax.Precision.HIGHEST
    mat = jax.nn.relu(jnp.einsum('cd,bdsk->bcsk', w1, pts, precision=hi)) * dw
    mp1 = jnp.max(mat, axis=3, keepdims=True)
    mat = jnp.concatenate([mat, jnp.broadcast_to(mp1, mat.shape)], axis=1)
    mat = jax.nn.relu(jnp.einsum('ce,besk->bcsk', w2, mat, precision=hi)) * dw
    mp2 = jnp.max(mat, axis=3, keepdims=True)
    mat = jnp.concatenate([mat, jnp.broadcast_to(mp2, mat.shape)], axis=1)
    mat = jax.nn.relu(jnp.einsum('ce,besk->bcsk', w3, mat, precision=hi)) * dw
    f = jnp.einsum('bisk,bcsk->bisc', x_g, mat, precision=hi)      # (B,Cin,S,KS)
    feat = jnp.einsum('oic,bisc->bos', wcv, f, precision=hi)       # (B,Cout,S)
    sup_inf = jnp.isinf(support_points[:, :1])                     # (B,1,S)
    return jnp.where(sup_inf, jnp.inf, feat)


if __name__ == "__main__":
    B, Cin, Cout, N, S, K, D, KS = 2, 4, 8, 64, 200, 8, 3, 16
    radius = 0.5

    root = jax.random.PRNGKey(0)
    k_x, k_pos, k_sup, k_idx, k_w1, k_w2, k_w3, k_cv = jax.random.split(root, 8)

    x = jax.random.normal(k_x, (B, Cin, N), jnp.float32)
    pos = jax.random.normal(k_pos, (B, D, N), jnp.float32)
    support = jax.random.normal(k_sup, (B, D, S), jnp.float32)
    support = support.at[:, :, S - 1].set(jnp.inf)       # one dummy (inf) support point
    neigh = jax.random.randint(k_idx, (B, S, K), 0, N, dtype=jnp.int32)
    neigh = neigh.at[:, ::3, K - 1].set(-1)              # some invalid neighbors

    # deterministic parameter init (module shapes: fc1 (KS,D), fc2/fc3 (KS,2KS),
    # cv Conv2d(Cin,Cout,(1,KS)) -> (Cout,Cin,KS); all bias=False)
    w1 = 0.30 * jax.random.normal(k_w1, (KS, D), jnp.float32)
    w2 = 0.15 * jax.random.normal(k_w2, (KS, 2 * KS), jnp.float32)
    w3 = 0.15 * jax.random.normal(k_w3, (KS, 2 * KS), jnp.float32)
    wcv = 0.10 * jax.random.normal(k_cv, (Cout, Cin, KS), jnp.float32)

    out = jax.block_until_ready(
        fkaconv_pallas(x, pos, support, neigh, radius, w1, w2, w3, wcv, ts=128))
    ref = jax.block_until_ready(
        fkaconv_reference(x, pos, support, neigh, radius, w1, w2, w3, wcv))

    assert out.shape == (B, Cout, S), out.shape
    assert bool(jnp.allclose(out, ref, rtol=1e-2, atol=1e-2)), "mismatch vs reference"
    print("KERNEL_OK")
</pallas_src>

<mosaic_0001>
module attributes {stable_mosaic.version = 11 : i64} {
  func.func @_fkaconv_kernel(%arg0: i32, %arg1: i32, %arg2: memref<1x3x8x128xf32, #tpu.memory_space<vmem>>, %arg3: memref<1x3x128xf32, #tpu.memory_space<vmem>>, %arg4: memref<1x4x8x128xf32, #tpu.memory_space<vmem>>, %arg5: memref<1x8x128xf32, #tpu.memory_space<vmem>>, %arg6: memref<16x3xf32, #tpu.memory_space<vmem>>, %arg7: memref<16x16xf32, #tpu.memory_space<vmem>>, %arg8: memref<16x16xf32, #tpu.memory_space<vmem>>, %arg9: memref<16x16xf32, #tpu.memory_space<vmem>>, %arg10: memref<16x16xf32, #tpu.memory_space<vmem>>, %arg11: memref<8x64xf32, #tpu.memory_space<vmem>>, %arg12: memref<1x8x128xf32, #tpu.memory_space<vmem>>) attributes {dimension_semantics = [#tpu.dimension_semantics<parallel>, #tpu.dimension_semantics<parallel>], iteration_bounds = array<i64: 2, 2>, scalar_prefetch = 0 : i64, scratch_operands = 0 : i64, tpu.core_type = #tpu.core_type<tc>, window_params = [{transform_indices = @transform_0, window_bounds = array<i64: 1, 3, 8, 128>}, {transform_indices = @transform_1, window_bounds = array<i64: 1, 3, 128>}, {transform_indices = @transform_2, window_bounds = array<i64: 1, 4, 8, 128>}, {transform_indices = @transform_3, window_bounds = array<i64: 1, 8, 128>}, {pipeline_mode = #tpu.pipeline_mode<synchronous>, transform_indices = @transform_4, window_bounds = array<i64: 16, 3>}, {pipeline_mode = #tpu.pipeline_mode<synchronous>, transform_indices = @transform_5, window_bounds = array<i64: 16, 16>}, {pipeline_mode = #tpu.pipeline_mode<synchronous>, transform_indices = @transform_6, window_bounds = array<i64: 16, 16>}, {pipeline_mode = #tpu.pipeline_mode<synchronous>, transform_indices = @transform_7, window_bounds = array<i64: 16, 16>}, {pipeline_mode = #tpu.pipeline_mode<synchronous>, transform_indices = @transform_8, window_bounds = array<i64: 16, 16>}, {pipeline_mode = #tpu.pipeline_mode<synchronous>, transform_indices = @transform_9, window_bounds = array<i64: 8, 64>}, {transform_indices = @transform_10, window_bounds = array<i64: 1, 8, 128>}]} {
    %c0 = arith.constant 0 : index
    %c0_0 = arith.constant 0 : index
    %c0_1 = arith.constant 0 : index
    %c0_2 = arith.constant 0 : index
    %0 = vector.load %arg2[%c0, %c0_0, %c0_1, %c0_2] : memref<1x3x8x128xf32, #tpu.memory_space<vmem>>, vector<1x3x8x128xf32>
    %1 = vector.shape_cast %0 : vector<1x3x8x128xf32> to vector<3x8x128xf32>
    %c0_3 = arith.constant 0 : index
    %c0_4 = arith.constant 0 : index
    %c0_5 = arith.constant 0 : index
    %2 = vector.load %arg3[%c0_3, %c0_4, %c0_5] : memref<1x3x128xf32, #tpu.memory_space<vmem>>, vector<1x3x128xf32>
    %3 = vector.shape_cast %2 : vector<1x3x128xf32> to vector<3x128xf32>
    %4 = vector.shape_cast %3 : vector<3x128xf32> to vector<3x1x128xf32>
    %5 = vector.broadcast %4 : vector<3x1x128xf32> to vector<3x8x128xf32>
    %6 = arith.subf %1, %5 : vector<3x8x128xf32>
    %7 = vector.extract_strided_slice %6 {offsets = [0, 0, 0], sizes = [1, 8, 128], strides = [1, 1, 1]} : vector<3x8x128xf32> to vector<1x8x128xf32>
    %8 = vector.shape_cast %7 : vector<1x8x128xf32> to vector<8x128xf32>
    %9 = math.absf %8 : vector<8x128xf32>
    %cst = arith.constant 0x7F800000 : f32
    %10 = vector.broadcast %cst : f32 to vector<8x128xf32>
    %11 = arith.cmpf oeq, %9, %10 : vector<8x128xf32>
    %cst_6 = arith.constant dense<true> : vector<8x128xi1>
    %12 = arith.xori %11, %cst_6 : vector<8x128xi1>
    %13 = tpu.weird %6 : vector<3x8x128xf32> -> vector<3x8x128xi1>
    %cst_7 = arith.constant dense<true> : vector<3x8x128xi1>
    %14 = arith.xori %13, %cst_7 : vector<3x8x128xi1>
    %cst_8 = arith.constant 0.000000e+00 : f32
    %15 = vector.broadcast %cst_8 : f32 to vector<3x8x128xf32>
    %16 = arith.select %14, %6, %15 : vector<3x8x128xi1>, vector<3x8x128xf32>
    %cst_9 = arith.constant 2.000000e+00 : f32
    %17 = vector.broadcast %cst_9 : f32 to vector<3x8x128xf32>
    %18 = arith.mulf %16, %17 : vector<3x8x128xf32>
    %c0_10 = arith.constant 0 : index
    %c0_11 = arith.constant 0 : index
    %c0_12 = arith.constant 0 : index
    %19 = vector.load %arg5[%c0_10, %c0_11, %c0_12] : memref<1x8x128xf32, #tpu.memory_space<vmem>>, vector<1x8x128xf32>
    %20 = vector.shape_cast %19 : vector<1x8x128xf32> to vector<8x128xf32>
    %21 = arith.mulf %20, %20 : vector<8x128xf32>
    %cst_13 = arith.constant dense<0.000000e+00> : vector<128xf32>
    %22 = vector.multi_reduction <add>, %21, %cst_13 [0] : vector<8x128xf32> to vector<128xf32>
    %23 = vector.shape_cast %22 : vector<128xf32> to vector<1x128xf32>
    %24 = math.sqrt %23 : vector<1x128xf32>
    %cst_14 = arith.constant 9.99999996E-13 : f32
    %25 = vector.broadcast %cst_14 : f32 to vector<1x128xf32>
    %26 = arith.maximumf %24, %25 : vector<1x128xf32>
    %27 = vector.broadcast %26 : vector<1x128xf32> to vector<8x128xf32>
    %28 = arith.divf %20, %27 : vector<8x128xf32>
    %29 = arith.extui %12 : vector<8x128xi1> to vector<8x128xi32>
    %30 = arith.sitofp %29 : vector<8x128xi32> to vector<8x128xf32>
    %31 = arith.mulf %28, %30 : vector<8x128xf32>
    %32 = vector.shape_cast %31 : vector<8x128xf32> to vector<1x8x128xf32>
    %c0_15 = arith.constant 0 : index
    %c0_16 = arith.constant 0 : index
    %33 = vector.load %arg6[%c0_15, %c0_16] : memref<16x3xf32, #tpu.memory_space<vmem>>, vector<16x3xf32>
    %34 = vector.shape_cast %18 : vector<3x8x128xf32> to vector<3x1024xf32>
    %cst_17 = arith.constant dense<0.000000e+00> : vector<16x1024xf32>
    %35 = tpu.matmul %33, %34, %cst_17 {dimension_numbers = #tpu.dot_dimension_numbers<[1], [0], [0], [1], [0, 0, 1, 1], [], []>} : vector<16x3xf32>, vector<3x1024xf32>, vector<16x1024xf32> -> vector<16x1024xf32>
    %36 = vector.shape_cast %35 : vector<16x1024xf32> to vector<16x8x128xf32>
    %cst_18 = arith.constant 0.000000e+00 : f32
    %37 = vector.broadcast %cst_18 : f32 to vector<16x8x128xf32>
    %38 = arith.maximumf %36, %37 : vector<16x8x128xf32>
    %39 = vector.broadcast %32 : vector<1x8x128xf32> to vector<16x8x128xf32>
    %40 = arith.mulf %38, %39 : vector<16x8x128xf32>
    %41 = vector.extract_strided_slice %40 {offsets = [0, 0, 0], sizes = [16, 1, 128], strides = [1, 1, 1]} : vector<16x8x128xf32> to vector<16x1x128xf32>
    %42 = vector.shape_cast %41 : vector<16x1x128xf32> to vector<16x128xf32>
    %43 = vector.extract_strided_slice %40 {offsets = [0, 1, 0], sizes = [16, 1, 128], strides = [1, 1, 1]} : vector<16x8x128xf32> to vector<16x1x128xf32>
    %44 = vector.shape_cast %43 : vector<16x1x128xf32> to vector<16x128xf32>
    %45 = arith.maximumf %42, %44 : vector<16x128xf32>
    %46 = vector.extract_strided_slice %40 {offsets = [0, 2, 0], sizes = [16, 1, 128], strides = [1, 1, 1]} : vector<16x8x128xf32> to vector<16x1x128xf32>
    %47 = vector.shape_cast %46 : vector<16x1x128xf32> to vector<16x128xf32>
    %48 = arith.maximumf %45, %47 : vector<16x128xf32>
    %49 = vector.extract_strided_slice %40 {offsets = [0, 3, 0], sizes = [16, 1, 128], strides = [1, 1, 1]} : vector<16x8x128xf32> to vector<16x1x128xf32>
    %50 = vector.shape_cast %49 : vector<16x1x128xf32> to vector<16x128xf32>
    %51 = arith.maximumf %48, %50 : vector<16x128xf32>
    %52 = vector.extract_strided_slice %40 {offsets = [0, 4, 0], sizes = [16, 1, 128], strides = [1, 1, 1]} : vector<16x8x128xf32> to vector<16x1x128xf32>
    %53 = vector.shape_cast %52 : vector<16x1x128xf32> to vector<16x128xf32>
    %54 = arith.maximumf %51, %53 : vector<16x128xf32>
    %55 = vector.extract_strided_slice %40 {offsets = [0, 5, 0], sizes = [16, 1, 128], strides = [1, 1, 1]} : vector<16x8x128xf32> to vector<16x1x128xf32>
    %56 = vector.shape_cast %55 : vector<16x1x128xf32> to vector<16x128xf32>
    %57 = arith.maximumf %54, %56 : vector<16x128xf32>
    %58 = vector.extract_strided_slice %40 {offsets = [0, 6, 0], sizes = [16, 1, 128], strides = [1, 1, 1]} : vector<16x8x128xf32> to vector<16x1x128xf32>
    %59 = vector.shape_cast %58 : vector<16x1x128xf32> to vector<16x128xf32>
    %60 = arith.maximumf %57, %59 : vector<16x128xf32>
    %61 = vector.extract_strided_slice %40 {offsets = [0, 7, 0], sizes = [16, 1, 128], strides = [1, 1, 1]} : vector<16x8x128xf32> to vector<16x1x128xf32>
    %62 = vector.shape_cast %61 : vector<16x1x128xf32> to vector<16x128xf32>
    %63 = arith.maximumf %60, %62 : vector<16x128xf32>
    %c0_19 = arith.constant 0 : index
    %c0_20 = arith.constant 0 : index
    %64 = vector.load %arg8[%c0_19, %c0_20] : memref<16x16xf32, #tpu.memory_space<vmem>>, vector<16x16xf32>
    %cst_21 = arith.constant dense<0.000000e+00> : vector<16x128xf32>
    %65 = tpu.matmul %64, %63, %cst_21 {dimension_numbers = #tpu.dot_dimension_numbers<[1], [0], [0], [1], [0, 0, 1, 1], [], []>} : vector<16x16xf32>, vector<16x128xf32>, vector<16x128xf32> -> vector<16x128xf32>
    %c0_22 = arith.constant 0 : index
    %c0_23 = arith.constant 0 : index
    %66 = vector.load %arg7[%c0_22, %c0_23] : memref<16x16xf32, #tpu.memory_space<vmem>>, vector<16x16xf32>
    %67 = vector.shape_cast %40 : vector<16x8x128xf32> to vector<16x1024xf32>
    %cst_24 = arith.constant dense<0.000000e+00> : vector<16x1024xf32>
    %68 = tpu.matmul %66, %67, %cst_24 {dimension_numbers = #tpu.dot_dimension_numbers<[1], [0], [0], [1], [0, 0, 1, 1], [], []>} : vector<16x16xf32>, vector<16x1024xf32>, vector<16x1024xf32> -> vector<16x1024xf32>
    %69 = vector.shape_cast %68 : vector<16x1024xf32> to vector<16x8x128xf32>
    %70 = vector.shape_cast %65 : vector<16x128xf32> to vector<16x1x128xf32>
    %71 = vector.broadcast %70 : vector<16x1x128xf32> to vector<16x8x128xf32>
    %72 = arith.addf %69, %71 : vector<16x8x128xf32>
    %cst_25 = arith.constant 0.000000e+00 : f32
    %73 = vector.broadcast %cst_25 : f32 to vector<16x8x128xf32>
    %74 = arith.maximumf %72, %73 : vector<16x8x128xf32>
    %75 = vector.broadcast %32 : vector<1x8x128xf32> to vector<16x8x128xf32>
    %76 = arith.mulf %74, %75 : vector<16x8x128xf32>
    %77 = vector.extract_strided_slice %76 {offsets = [0, 0, 0], sizes = [16, 1, 128], strides = [1, 1, 1]} : vector<16x8x128xf32> to vector<16x1x128xf32>
    %78 = vector.shape_cast %77 : vector<16x1x128xf32> to vector<16x128xf32>
    %79 = vector.extract_strided_slice %76 {offsets = [0, 1, 0], sizes = [16, 1, 128], strides = [1, 1, 1]} : vector<16x8x128xf32> to vector<16x1x128xf32>
    %80 = vector.shape_cast %79 : vector<16x1x128xf32> to vector<16x128xf32>
    %81 = arith.maximumf %78, %80 : vector<16x128xf32>
    %82 = vector.extract_strided_slice %76 {offsets = [0, 2, 0], sizes = [16, 1, 128], strides = [1, 1, 1]} : vector<16x8x128xf32> to vector<16x1x128xf32>
    %83 = vector.shape_cast %82 : vector<16x1x128xf32> to vector<16x128xf32>
    %84 = arith.maximumf %81, %83 : vector<16x128xf32>
    %85 = vector.extract_strided_slice %76 {offsets = [0, 3, 0], sizes = [16, 1, 128], strides = [1, 1, 1]} : vector<16x8x128xf32> to vector<16x1x128xf32>
    %86 = vector.shape_cast %85 : vector<16x1x128xf32> to vector<16x128xf32>
    %87 = arith.maximumf %84, %86 : vector<16x128xf32>
    %88 = vector.extract_strided_slice %76 {offsets = [0, 4, 0], sizes = [16, 1, 128], strides = [1, 1, 1]} : vector<16x8x128xf32> to vector<16x1x128xf32>
    %89 = vector.shape_cast %88 : vector<16x1x128xf32> to vector<16x128xf32>
    %90 = arith.maximumf %87, %89 : vector<16x128xf32>
    %91 = vector.extract_strided_slice %76 {offsets = [0, 5, 0], sizes = [16, 1, 128], strides = [1, 1, 1]} : vector<16x8x128xf32> to vector<16x1x128xf32>
    %92 = vector.shape_cast %91 : vector<16x1x128xf32> to vector<16x128xf32>
    %93 = arith.maximumf %90, %92 : vector<16x128xf32>
    %94 = vector.extract_strided_slice %76 {offsets = [0, 6, 0], sizes = [16, 1, 128], strides = [1, 1, 1]} : vector<16x8x128xf32> to vector<16x1x128xf32>
    %95 = vector.shape_cast %94 : vector<16x1x128xf32> to vector<16x128xf32>
    %96 = arith.maximumf %93, %95 : vector<16x128xf32>
    %97 = vector.extract_strided_slice %76 {offsets = [0, 7, 0], sizes = [16, 1, 128], strides = [1, 1, 1]} : vector<16x8x128xf32> to vector<16x1x128xf32>
    %98 = vector.shape_cast %97 : vector<16x1x128xf32> to vector<16x128xf32>
    %99 = arith.maximumf %96, %98 : vector<16x128xf32>
    %c0_26 = arith.constant 0 : index
    %c0_27 = arith.constant 0 : index
    %100 = vector.load %arg10[%c0_26, %c0_27] : memref<16x16xf32, #tpu.memory_space<vmem>>, vector<16x16xf32>
    %cst_28 = arith.constant dense<0.000000e+00> : vector<16x128xf32>
    %101 = tpu.matmul %100, %99, %cst_28 {dimension_numbers = #tpu.dot_dimension_numbers<[1], [0], [0], [1], [0, 0, 1, 1], [], []>} : vector<16x16xf32>, vector<16x128xf32>, vector<16x128xf32> -> vector<16x128xf32>
    %c0_29 = arith.constant 0 : index
    %c0_30 = arith.constant 0 : index
    %102 = vector.load %arg9[%c0_29, %c0_30] : memref<16x16xf32, #tpu.memory_space<vmem>>, vector<16x16xf32>
    %103 = vector.shape_cast %76 : vector<16x8x128xf32> to vector<16x1024xf32>
    %cst_31 = arith.constant dense<0.000000e+00> : vector<16x1024xf32>
    %104 = tpu.matmul %102, %103, %cst_31 {dimension_numbers = #tpu.dot_dimension_numbers<[1], [0], [0], [1], [0, 0, 1, 1], [], []>} : vector<16x16xf32>, vector<16x1024xf32>, vector<16x1024xf32> -> vector<16x1024xf32>
    %105 = vector.shape_cast %104 : vector<16x1024xf32> to vector<16x8x128xf32>
    %106 = vector.shape_cast %101 : vector<16x128xf32> to vector<16x1x128xf32>
    %107 = vector.broadcast %106 : vector<16x1x128xf32> to vector<16x8x128xf32>
    %108 = arith.addf %105, %107 : vector<16x8x128xf32>
    %cst_32 = arith.constant 0.000000e+00 : f32
    %109 = vector.broadcast %cst_32 : f32 to vector<16x8x128xf32>
    %110 = arith.maximumf %108, %109 : vector<16x8x128xf32>
    %111 = vector.broadcast %32 : vector<1x8x128xf32> to vector<16x8x128xf32>
    %112 = arith.mulf %110, %111 : vector<16x8x128xf32>
    %c0_33 = arith.constant 0 : index
    %c0_34 = arith.constant 0 : index
    %c0_35 = arith.constant 0 : index
    %c0_36 = arith.constant 0 : index
    %113 = vector.load %arg4[%c0_33, %c0_34, %c0_35, %c0_36] : memref<1x4x8x128xf32, #tpu.memory_space<vmem>>, vector<1x4x8x128xf32>
    %114 = vector.shape_cast %113 : vector<1x4x8x128xf32> to vector<4x8x128xf32>
    %115 = vector.extract_strided_slice %114 {offsets = [0, 0, 0], sizes = [4, 1, 128], strides = [1, 1, 1]} : vector<4x8x128xf32> to vector<4x1x128xf32>
    %116 = vector.shape_cast %115 : vector<4x1x128xf32> to vector<4x128xf32>
    %117 = vector.shape_cast %116 : vector<4x128xf32> to vector<4x1x128xf32>
    %118 = vector.extract_strided_slice %112 {offsets = [0, 0, 0], sizes = [16, 1, 128], strides = [1, 1, 1]} : vector<16x8x128xf32> to vector<16x1x128xf32>
    %119 = vector.shape_cast %118 : vector<16x1x128xf32> to vector<16x128xf32>
    %120 = vector.shape_cast %119 : vector<16x128xf32> to vector<1x16x128xf32>
    %121 = vector.broadcast %117 : vector<4x1x128xf32> to vector<4x16x128xf32>
    %122 = vector.broadcast %120 : vector<1x16x128xf32> to vector<4x16x128xf32>
    %123 = arith.mulf %121, %122 : vector<4x16x128xf32>
    %124 = vector.extract_strided_slice %114 {offsets = [0, 1, 0], sizes = [4, 1, 128], strides = [1, 1, 1]} : vector<4x8x128xf32> to vector<4x1x128xf32>
    %125 = vector.shape_cast %124 : vector<4x1x128xf32> to vector<4x128xf32>
    %126 = vector.shape_cast %125 : vector<4x128xf32> to vector<4x1x128xf32>
    %127 = vector.extract_strided_slice %112 {offsets = [0, 1, 0], sizes = [16, 1, 128], strides = [1, 1, 1]} : vector<16x8x128xf32> to vector<16x1x128xf32>
    %128 = vector.shape_cast %127 : vector<16x1x128xf32> to vector<16x128xf32>
    %129 = vector.shape_cast %128 : vector<16x128xf32> to vector<1x16x128xf32>
    %130 = vector.broadcast %126 : vector<4x1x128xf32> to vector<4x16x128xf32>
    %131 = vector.broadcast %129 : vector<1x16x128xf32> to vector<4x16x128xf32>
    %132 = arith.mulf %130, %131 : vector<4x16x128xf32>
    %133 = arith.addf %123, %132 : vector<4x16x128xf32>
    %134 = vector.extract_strided_slice %114 {offsets = [0, 2, 0], sizes = [4, 1, 128], strides = [1, 1, 1]} : vector<4x8x128xf32> to vector<4x1x128xf32>
    %135 = vector.shape_cast %134 : vector<4x1x128xf32> to vector<4x128xf32>
    %136 = vector.shape_cast %135 : vector<4x128xf32> to vector<4x1x128xf32>
    %137 = vector.extract_strided_slice %112 {offsets = [0, 2, 0], sizes = [16, 1, 128], strides = [1, 1, 1]} : vector<16x8x128xf32> to vector<16x1x128xf32>
    %138 = vector.shape_cast %137 : vector<16x1x128xf32> to vector<16x128xf32>
    %139 = vector.shape_cast %138 : vector<16x128xf32> to vector<1x16x128xf32>
    %140 = vector.broadcast %136 : vector<4x1x128xf32> to vector<4x16x128xf32>
    %141 = vector.broadcast %139 : vector<1x16x128xf32> to vector<4x16x128xf32>
    %142 = arith.mulf %140, %141 : vector<4x16x128xf32>
    %143 = arith.addf %133, %142 : vector<4x16x128xf32>
    %144 = vector.extract_strided_slice %114 {offsets = [0, 3, 0], sizes = [4, 1, 128], strides = [1, 1, 1]} : vector<4x8x128xf32> to vector<4x1x128xf32>
    %145 = vector.shape_cast %144 : vector<4x1x128xf32> to vector<4x128xf32>
    %146 = vector.shape_cast %145 : vector<4x128xf32> to vector<4x1x128xf32>
    %147 = vector.extract_strided_slice %112 {offsets = [0, 3, 0], sizes = [16, 1, 128], strides = [1, 1, 1]} : vector<16x8x128xf32> to vector<16x1x128xf32>
    %148 = vector.shape_cast %147 : vector<16x1x128xf32> to vector<16x128xf32>
    %149 = vector.shape_cast %148 : vector<16x128xf32> to vector<1x16x128xf32>
    %150 = vector.broadcast %146 : vector<4x1x128xf32> to vector<4x16x128xf32>
    %151 = vector.broadcast %149 : vector<1x16x128xf32> to vector<4x16x128xf32>
    %152 = arith.mulf %150, %151 : vector<4x16x128xf32>
    %153 = arith.addf %143, %152 : vector<4x16x128xf32>
    %154 = vector.extract_strided_slice %114 {offsets = [0, 4, 0], sizes = [4, 1, 128], strides = [1, 1, 1]} : vector<4x8x128xf32> to vector<4x1x128xf32>
    %155 = vector.shape_cast %154 : vector<4x1x128xf32> to vector<4x128xf32>
    %156 = vector.shape_cast %155 : vector<4x128xf32> to vector<4x1x128xf32>
    %157 = vector.extract_strided_slice %112 {offsets = [0, 4, 0], sizes = [16, 1, 128], strides = [1, 1, 1]} : vector<16x8x128xf32> to vector<16x1x128xf32>
    %158 = vector.shape_cast %157 : vector<16x1x128xf32> to vector<16x128xf32>
    %159 = vector.shape_cast %158 : vector<16x128xf32> to vector<1x16x128xf32>
    %160 = vector.broadcast %156 : vector<4x1x128xf32> to vector<4x16x128xf32>
    %161 = vector.broadcast %159 : vector<1x16x128xf32> to vector<4x16x128xf32>
    %162 = arith.mulf %160, %161 : vector<4x16x128xf32>
    %163 = arith.addf %153, %162 : vector<4x16x128xf32>
    %164 = vector.extract_strided_slice %114 {offsets = [0, 5, 0], sizes = [4, 1, 128], strides = [1, 1, 1]} : vector<4x8x128xf32> to vector<4x1x128xf32>
    %165 = vector.shape_cast %164 : vector<4x1x128xf32> to vector<4x128xf32>
    %166 = vector.shape_cast %165 : vector<4x128xf32> to vector<4x1x128xf32>
    %167 = vector.extract_strided_slice %112 {offsets = [0, 5, 0], sizes = [16, 1, 128], strides = [1, 1, 1]} : vector<16x8x128xf32> to vector<16x1x128xf32>
    %168 = vector.shape_cast %167 : vector<16x1x128xf32> to vector<16x128xf32>
    %169 = vector.shape_cast %168 : vector<16x128xf32> to vector<1x16x128xf32>
    %170 = vector.broadcast %166 : vector<4x1x128xf32> to vector<4x16x128xf32>
    %171 = vector.broadcast %169 : vector<1x16x128xf32> to vector<4x16x128xf32>
    %172 = arith.mulf %170, %171 : vector<4x16x128xf32>
    %173 = arith.addf %163, %172 : vector<4x16x128xf32>
    %174 = vector.extract_strided_slice %114 {offsets = [0, 6, 0], sizes = [4, 1, 128], strides = [1, 1, 1]} : vector<4x8x128xf32> to vector<4x1x128xf32>
    %175 = vector.shape_cast %174 : vector<4x1x128xf32> to vector<4x128xf32>
    %176 = vector.shape_cast %175 : vector<4x128xf32> to vector<4x1x128xf32>
    %177 = vector.extract_strided_slice %112 {offsets = [0, 6, 0], sizes = [16, 1, 128], strides = [1, 1, 1]} : vector<16x8x128xf32> to vector<16x1x128xf32>
    %178 = vector.shape_cast %177 : vector<16x1x128xf32> to vector<16x128xf32>
    %179 = vector.shape_cast %178 : vector<16x128xf32> to vector<1x16x128xf32>
    %180 = vector.broadcast %176 : vector<4x1x128xf32> to vector<4x16x128xf32>
    %181 = vector.broadcast %179 : vector<1x16x128xf32> to vector<4x16x128xf32>
    %182 = arith.mulf %180, %181 : vector<4x16x128xf32>
    %183 = arith.addf %173, %182 : vector<4x16x128xf32>
    %184 = vector.extract_strided_slice %114 {offsets = [0, 7, 0], sizes = [4, 1, 128], strides = [1, 1, 1]} : vector<4x8x128xf32> to vector<4x1x128xf32>
    %185 = vector.shape_cast %184 : vector<4x1x128xf32> to vector<4x128xf32>
    %186 = vector.shape_cast %185 : vector<4x128xf32> to vector<4x1x128xf32>
    %187 = vector.extract_strided_slice %112 {offsets = [0, 7, 0], sizes = [16, 1, 128], strides = [1, 1, 1]} : vector<16x8x128xf32> to vector<16x1x128xf32>
    %188 = vector.shape_cast %187 : vector<16x1x128xf32> to vector<16x128xf32>
    %189 = vector.shape_cast %188 : vector<16x128xf32> to vector<1x16x128xf32>
    %190 = vector.broadcast %186 : vector<4x1x128xf32> to vector<4x16x128xf32>
    %191 = vector.broadcast %189 : vector<1x16x128xf32> to vector<4x16x128xf32>
    %192 = arith.mulf %190, %191 : vector<4x16x128xf32>
    %193 = arith.addf %183, %192 : vector<4x16x128xf32>
    %c0_37 = arith.constant 0 : index
    %c0_38 = arith.constant 0 : index
    %194 = vector.load %arg11[%c0_37, %c0_38] : memref<8x64xf32, #tpu.memory_space<vmem>>, vector<8x64xf32>
    %195 = vector.shape_cast %193 : vector<4x16x128xf32> to vector<64x128xf32>
    %cst_39 = arith.constant dense<0.000000e+00> : vector<8x128xf32>
    %196 = tpu.matmul %194, %195, %cst_39 {dimension_numbers = #tpu.dot_dimension_numbers<[1], [0], [0], [1], [0, 0, 1, 1], [], []>} : vector<8x64xf32>, vector<64x128xf32>, vector<8x128xf32> -> vector<8x128xf32>
    %197 = vector.extract_strided_slice %3 {offsets = [0, 0], sizes = [1, 128], strides = [1, 1]} : vector<3x128xf32> to vector<1x128xf32>
    %198 = math.absf %197 : vector<1x128xf32>
    %cst_40 = arith.constant 0x7F800000 : f32
    %199 = vector.broadcast %cst_40 : f32 to vector<1x128xf32>
    %200 = arith.cmpf oeq, %198, %199 : vector<1x128xf32>
    %cst_41 = arith.constant 0x7F800000 : f32
    %201 = vector.shape_cast %200 : vector<1x128xi1> to vector<1x128xi1>
    %202 = vector.broadcast %201 : vector<1x128xi1> to vector<8x128xi1>
    %203 = vector.broadcast %cst_41 : f32 to vector<8x128xf32>
    %204 = arith.select %202, %203, %196 : vector<8x128xi1>, vector<8x128xf32>
    %c0_42 = arith.constant 0 : index
    %c0_43 = arith.constant 0 : index
    %c0_44 = arith.constant 0 : index
    %205 = vector.load %arg12[%c0_42, %c0_43, %c0_44] : memref<1x8x128xf32, #tpu.memory_space<vmem>>, vector<1x8x128xf32>
    %206 = vector.shape_cast %205 : vector<1x8x128xf32> to vector<8x128xf32>
    %207 = vector.shape_cast %204 : vector<8x128xf32> to vector<1x8x128xf32>
    tpu.vector_store %arg12[%c0_42, %c0_43, %c0_44], %207 {strides = array<i32>} : memref<1x8x128xf32, #tpu.memory_space<vmem>>, vector<1x8x128xf32>,
    return
  }
  func.func @transform_0(%arg0: i32, %arg1: i32) -> (i32, i32, i32, i32) {
    %c0_i32 = arith.constant 0 : i32
    %c0_i32_0 = arith.constant 0 : i32
    %c0_i32_1 = arith.constant 0 : i32
    return %arg0, %c0_i32, %c0_i32_0, %arg1 : i32, i32, i32, i32
  }
  func.func @transform_1(%arg0: i32, %arg1: i32) -> (i32, i32, i32) {
    %c0_i32 = arith.constant 0 : i32
    %c0_i32_0 = arith.constant 0 : i32
    return %arg0, %c0_i32, %arg1 : i32, i32, i32
  }
  func.func @transform_2(%arg0: i32, %arg1: i32) -> (i32, i32, i32, i32) {
    %c0_i32 = arith.constant 0 : i32
    %c0_i32_0 = arith.constant 0 : i32
    %c0_i32_1 = arith.constant 0 : i32
    return %arg0, %c0_i32, %c0_i32_0, %arg1 : i32, i32, i32, i32
  }
  func.func @transform_3(%arg0: i32, %arg1: i32) -> (i32, i32, i32) {
    %c0_i32 = arith.constant 0 : i32
    %c0_i32_0 = arith.constant 0 : i32
    return %arg0, %c0_i32, %arg1 : i32, i32, i32
  }
  func.func @transform_4(%arg0: i32, %arg1: i32) -> (i32, i32) {
    %c0_i32 = arith.constant 0 : i32
    %c0_i32_0 = arith.constant 0 : i32
    %c0_i32_1 = arith.constant 0 : i32
    return %c0_i32, %c0_i32_0 : i32, i32
  }
  func.func @transform_5(%arg0: i32, %arg1: i32) -> (i32, i32) {
    %c0_i32 = arith.constant 0 : i32
    %c0_i32_0 = arith.constant 0 : i32
    %c0_i32_1 = arith.constant 0 : i32
    return %c0_i32, %c0_i32_0 : i32, i32
  }
  func.func @transform_6(%arg0: i32, %arg1: i32) -> (i32, i32) {
    %c0_i32 = arith.constant 0 : i32
    %c0_i32_0 = arith.constant 0 : i32
    %c0_i32_1 = arith.constant 0 : i32
    return %c0_i32, %c0_i32_0 : i32, i32
  }
  func.func @transform_7(%arg0: i32, %arg1: i32) -> (i32, i32) {
    %c0_i32 = arith.constant 0 : i32
    %c0_i32_0 = arith.constant 0 : i32
    %c0_i32_1 = arith.constant 0 : i32
    return %c0_i32, %c0_i32_0 : i32, i32
  }
  func.func @transform_8(%arg0: i32, %arg1: i32) -> (i32, i32) {
    %c0_i32 = arith.constant 0 : i32
    %c0_i32_0 = arith.constant 0 : i32
    %c0_i32_1 = arith.constant 0 : i32
    return %c0_i32, %c0_i32_0 : i32, i32
  }
  func.func @transform_9(%arg0: i32, %arg1: i32) -> (i32, i32) {
    %c0_i32 = arith.constant 0 : i32
    %c0_i32_0 = arith.constant 0 : i32
    %c0_i32_1 = arith.constant 0 : i32
    return %c0_i32, %c0_i32_0 : i32, i32
  }
  func.func @transform_10(%arg0: i32, %arg1: i32) -> (i32, i32, i32) {
    %c0_i32 = arith.constant 0 : i32
    %c0_i32_0 = arith.constant 0 : i32
    return %arg0, %c0_i32, %arg1 : i32, i32, i32
  }
}

</mosaic_0001>

<bundles_post_ra>
// kernel: tpu_custom_call.1
= control target key start
LH: loop header
LB: loop body
LE: loop exit
PB: predicated region body
PF: predicated region fallthrough
CT: control target
= control target key end

     0   :  { %s7878_s0 = inlined_call_operand.hbm [shape: f32[2,3,8,256], index: 0, kind: input, shape index: {}]   ;;  %s7879_s1 = inlined_call_operand.vmem [shape: f32[2,3,256], index: 1, kind: input, shape index: {}]   ;;  %s7880_s2 = inlined_call_operand.hbm [shape: f32[2,4,8,256], index: 2, kind: input, shape index: {}]   ;;  %s7881_s3 = inlined_call_operand.vmem [shape: f32[2,8,256], index: 3, kind: input, shape index: {}]   ;;  %s7882_s4 = inlined_call_operand.vmem [shape: f32[16,3], index: 4, kind: input, shape index: {}]   ;;  %s7883_s5 = inlined_call_operand.vmem [shape: f32[16,16], index: 5, kind: input, shape index: {}]   ;;  %s7884_s6 = inlined_call_operand.hbm [shape: f32[16,16], index: 6, kind: input, shape index: {}]   ;;  %s7885_s7 = inlined_call_operand.hbm [shape: f32[16,16], index: 7, kind: input, shape index: {}]   ;;  %s7886_s8 = inlined_call_operand.hbm [shape: f32[16,16], index: 8, kind: input, shape index: {}]   ;;  %s7887_s9 = inlined_call_operand.vmem [shape: f32[8,64], index: 9, kind: input, shape index: {}]   ;;  %s7888_s10 = inlined_call_operand.hbm [shape: f32[2,8,256], index: 10, kind: output, shape index: {}]  }
   0x1   :  { %7947 = sst [smem:[#allocation43_spill]] %s7878_s0 }
   0x2   :  { %7948 = sst [smem:[#allocation44_spill]] %s7879_s1 }
   0x3   :  { %7949 = sst [smem:[#allocation45_spill]] %s7881_s3 }
   0x4   :  { %7950 = sst [smem:[#allocation46_spill]] %s7882_s4 }
   0x5   :  { %7951 = sst [smem:[#allocation47_spill]] %s7883_s5 }
   0x6   :  { %7952 = sst [smem:[#allocation48_spill]] %s7884_s6 }
   0x7   :  { %7953 = sst [smem:[#allocation49_spill]] %s7885_s7 }
   0x8   :  { %7954 = sst [smem:[#allocation50_spill]] %s7886_s8 }
   0x9   :  { %7955 = sst [smem:[#allocation51_spill]] %s7887_s9 }
   0xa   :  { %7956 = sst [smem:[#allocation52_spill]] %s7888_s10 }
   0xb   :  { %15 = vsyncpa [#allocation3], 0 }
   0xc   :  { %17 = vsyncpa [#allocation3 + $0x1], 0 }
   0xd   :  { %18 = vsyncpa [#allocation6], 0 }
   0xe   :  { %20 = vsyncpa [#allocation6 + $0x1], 0 }
   0xf   :  { %21 = vsyncpa [#allocation9], 0 }
  0x10   :  { %22 = vsyncpa [#allocation4], 0 }
  0x11   :  { %24 = vsyncpa [#allocation4 + $0x1], 0  ;;  %s5829_s13 = smov 0   ;;  %s5831_s14 = smov 0  }
  0x12   :  { %s5833_s15 = smov 0   ;;  %s5835_s16 = smov 0  }
  0x13   :  { %s5837_s17 = smov 0   ;;  %s5839_s18 = smov 0  }
  0x14   :  { %s5841_s19 = smov 0   ;;  %s5843_s20 = smov 0  }
  0x15 LB: > { %7957 = sst [smem:[#allocation17_spill]] %s5728_s13  ;;  %s5870_s21 = sadd.s32 4294967295, %s5756_s20   ;;  %s5756_s20 = sphi %s5843_s20, %s30_s20   ;;  %s5752_s19 = sphi %s5841_s19, %s8071_s19   ;;  %s5748_s18 = sphi %s5839_s18, %s8070_s18   ;;  %s5744_s17 = sphi %s5837_s17, %s8069_s17   ;;  %s5740_s16 = sphi %s5835_s16, %s8068_s16   ;;  %s5736_s15 = sphi %s5833_s15, %s8067_s15   ;;  %s5732_s14 = sphi %s5831_s14, %s8066_s14   ;;  %s5728_s13 = sphi %s5829_s13, %s8065_s13  }
  0x16   : > { %7958 = sst [smem:[#allocation18_spill]] %s5740_s16  ;;  %s5268_s22 = sadd.s32 4294967294, %s5756_s20  }
  0x17   : > { %7959 = sst [smem:[#allocation19_spill]] %s5744_s17  ;;  %p58_p0 = scmp.ne.s32.totalorder %s5736_s15, %s5732_s14 }
  0x18   : > { %7960 = sst [smem:[#allocation20_spill]] %s5870_s21  ;;  %p59_p1 = scmp.eq.s32.totalorder %s5756_s20, 0 }
  0x19   : > { %p64_p2 = scmp.ne.s32.totalorder %s5732_s14, %s5728_s13  ;;  %p7889_p3 = scmp.eq.s32.totalorder %s5870_s21, 0 }
  0x1a   : > { %p300_p4 = scmp.eq.s32.totalorder %s5870_s21, 3  ;;  %p5881_p5 = por %p59_p1, %p58_p0 }
  0x1b   : > { %p306_p6 = scmp.eq.s32.totalorder %s5268_s22, 3  ;;  %p5887_p7 = por %p7889_p3, %p64_p2 }
  0x1c   : > { %p5891_p8 = por %p300_p4, %p58_p0  ;;  %p5269_p10 = scmp.ge.s32.totalorder %s5756_s20, 1 }
  0x1d   : > { %p5895_p9 = por %p306_p6, %p64_p2  ;;  %p313_p11 = scmp.lt.s32.totalorder %s5756_s20, 5 }
  0x1e   : > { %s7963_s26 = scalar_select %p5891_p8, 1, 0 }
  0x1f   : > { %s7965_s27 = scalar_select %p5895_p9, 1, 0 }
  0x20   : > { %7964 = sst [smem:[#allocation21_spill]] %s7963_s26  ;;  %p5901_p12 = pnand %p5269_p10, %p313_p11 }
  0x21   : > { %7966 = sst [smem:[#allocation22_spill]] %s7965_s27  ;;  %s5758_s29 = smov [#allocation7]  }
  0x22   : > { %s331_s30 = sshll.u32 %s5758_s29, 4  ;;  %p5402_p13 = pneg %p5901_p12  ;;  %s332_s30 = int_to_ptr.vmem [resolvable:$true] %s331_s30 }
  0x23   : > { %p5426_p0 = scmp.lt.s32.totalorder %s5756_s20, 4  ;;  %s5759_s12 = smov [#allocation8]  }
  0x24   : > { %p5910_p1 = pnand %p5402_p13, %p7889_p3  ;;  %s344_s22 = sshll.u32 %s5759_s12, 4  ;;  %s345_s22 = int_to_ptr.vmem [resolvable:$true] %s344_s22 }
  0x25   : > { %p5916_p2 = pnand %p5426_p0, %p5881_p5  ;;  %s5525_s29 = scalar_lea.vmem %s332_s30, 256 }
  0x26   : > { %p5516_p4 = pneg %p5910_p1  ;;  %p5526_p6 = scmp.ne.s32.totalorder %s332_s30, %s5525_s29 }
  0x27   : > { %p5533_p13 = scmp.lt.s32.totalorder %s332_s30, %s332_s30  ;;  %p5534_p3 = scmp.lt.s32.totalorder %s5525_s29, %s5525_s29 }
  0x28   : > { %p5528_p10 = pnand %p5526_p6, %p5516_p4 }
  0x29   : > { %p5535_p9 = por %p5534_p3, %p5533_p13 }
  0x2a   : > { %p5529_p11 = pneg %p5528_p10 }
  0x2c   : > { %p5536_p8 = pnand %p5535_p9, %p5529_p11 }
  0x2e   : > { %5539 = shalt.err (!%p5536_p8)
}
  0x2f   : > { %s7896_s12 = smov 128   ;;  %s7898_s24 = smov 8  }
  0x30   : > { %s7970_s6 = sld [smem:[#allocation48_spill]]  ;;  %s5762_s10 = smov [#allocation10]  }
  0x31   : > { %s357_s26 = sshll.u32 %s5762_s10, 4  ;;  %s5551_s9 = scalar_lea.vmem %s345_s22, 256  ;;  %s358_s26 = int_to_ptr.vmem [resolvable:$true] %s357_s26 }
  0x32   : > { %p5552_p5 = scmp.ne.s32.totalorder %s345_s22, %s5551_s9  ;;  %p5559_p9 = scmp.lt.s32.totalorder %s345_s22, %s345_s22 }
  0x33   : > { %p5560_p0 = scmp.lt.s32.totalorder %s5551_s9, %s5551_s9 }
  0x34   : > { %p5554_p3 = pnand %p5552_p5, %p5516_p4 }
  0x35   : > { %p5561_p6 = por %p5560_p0, %p5559_p9 }
  0x36   : > { %5405 = dma.hbm_to_vmem [thread:$0]  (!%p5910_p1), %s7970_s6, 256, %s332_s30, [#allocation6], %s7896_s12, %s7896_s12, %s7898_s24  }
  0x37   : > { %p5555_p8 = pneg %p5554_p3 }
  0x39   : > { %p5562_p10 = pnand %p5561_p6, %p5555_p8 }
  0x3b   : > { %5565 = shalt.err (!%p5562_p10)
}
  0x3c   : > { %s7971_s7 = sld [smem:[#allocation49_spill]]  ;;  %s5577_s10 = scalar_lea.vmem %s358_s26, 256 }
  0x3d   : > { %p5578_p11 = scmp.ne.s32.totalorder %s358_s26, %s5577_s10  ;;  %p5585_p3 = scmp.lt.s32.totalorder %s358_s26, %s358_s26 }
  0x3e   : > { %p5586_p8 = scmp.lt.s32.totalorder %s5577_s10, %s5577_s10 }
  0x3f   : > { %p5580_p13 = pnand %p5578_p11, %p5516_p4 }
  0x40   : > { %p5587_p9 = por %p5586_p8, %p5585_p3 }
  0x41   : > { %p5581_p5 = pneg %p5580_p13 }
  0x42   : > { %5408 = dma.hbm_to_vmem [thread:$0]  (!%p5910_p1), %s7971_s7, 256, %s345_s22, [#allocation9], %s7896_s12, %s7896_s12, %s7898_s24  }
  0x43   : > { %p5588_p0 = pnand %p5587_p9, %p5581_p5 }
  0x45   : > { %5591 = shalt.err (!%p5588_p0)
}
  0x46   : > { %s7972_s8 = sld [smem:[#allocation50_spill]]  ;;  %s39_s22 = sadd.s32 1, %s5748_s18 }
  0x47   : > { %p40_p4 = scmp.ge.s32.totalorder %s39_s22, 2  ;;  %s42_s29 = sadd.s32 1, %s5752_s19 }
  0x48   : > { %s5958_s13 = sand.u32 1, %s5736_s15   ;;  %s5382_s11 = smul.u32 6, %s5752_s19 }
  0x49   : > { %s8073_s22 = smov (%p40_p4, %s39_s22), 0  ;;  %s8075_s29 = smov (!%p40_p4, %s42_s29), %s5752_s19 }
  0x4a   : > { %7973 = sst [smem:[#allocation23_spill]] %s8073_s22  ;;  %s47_s27 = ssub.s32 %s5748_s18, %s8073_s22 }
  0x4b   : > { %p44_p6 = scmp.ge.s32.totalorder %s8075_s29, 2  ;;  %s5381_s10 = smul.u32 24, %s5958_s13 }
  0x4c   : > { %5411 = dma.hbm_to_vmem [thread:$0]  (!%p5910_p1), %s7972_s8, 256, %s358_s26, [#allocation9], %s7896_s12, %s7896_s12, %s7898_s24  }
  0x4d   : > { %s383_s9 = sadd.s32 %s5748_s18, %s5382_s11  ;;  %s8077_s29 = smov (%p44_p6, %s8075_s29), 0 }
  0x4e   : > { %7974 = sst [smem:[#allocation24_spill]] %s8077_s29  ;;  %s5274_s26 = sshll.u32 %s383_s9, 7 }
  0x4f   : > { %s46_s30 = ssub.s32 %s5752_s19, %s8077_s29  ;;  %s7975_s0 = sld [smem:[#allocation43_spill]] }
  0x50   : > { %s48_s7 = sor.u32 %s47_s27, %s46_s30  ;;  %s378_s8 = scalar_lea.vmem [#allocation2], %s5381_s10 }
  0x51   : > { %s386_s5 = sshll.u32 %s378_s8, 4  ;;  %p49_p1 = scmp.eq.s32.totalorder %s48_s7, 0  ;;  %s387_s5 = int_to_ptr.vmem [resolvable:$true] %s386_s5 }
  0x52   : > { %s375_s4 = scalar_lea.sflag [#allocation3], %s5958_s13  ;;  %p5594_p10 = pneg %p5916_p2 }
  0x53   : > { %s5605_s22 = scalar_lea.vmem %s387_s5, 384  ;;  %s5763_s11 = smov [#allocation2]  }
  0x54   : > { %p5606_p11 = scmp.ne.s32.totalorder %s387_s5, %s5605_s22  ;;  %s5610_s9 = sshll.u32 %s5763_s11, 4  ;;  %s5611_s9 = int_to_ptr.vmem [resolvable:$false] %s5610_s9 }
  0x55   : > { %s385_s6 = scalar_lea.hbm %s7975_s0, %s5274_s26  ;;  %s5612_s29 = scalar_lea.vmem %s5611_s9, 768 }
  0x56   : > { %p5608_p13 = pnand %p5606_p11, %p5594_p10  ;;  %p5613_p3 = scmp.lt.s32.totalorder %s387_s5, %s5611_s9 }
  0x57   : > { %p5614_p8 = scmp.lt.s32.totalorder %s5612_s29, %s5605_s22 }
  0x58   : > { %p5609_p5 = pneg %p5608_p13 }
  0x59   : > { %p5615_p9 = por %p5614_p8, %p5613_p3 }
  0x5b   : > { %p5616_p0 = pnand %p5615_p9, %p5609_p5 }
  0x5d   : > { %5619 = shalt.err (!%p5616_p0)
}
  0x5e   : > { %s5764_s8 = smov 256   ;;  %s7976_s12 = smov 8  }
  0x5f   : > { %s7977_s24 = smov 128   ;;  %s7978_s27 = sadd.s32 1, %s5736_s15 }
  0x60   : > { %5415 = dma.hbm_to_vmem [thread:$0]  (!%p5916_p2), %s385_s6, 384, %s387_s5, %s375_s4, %s5764_s8, %s7977_s24, %s7976_s12  }
  0x61   : > { %s5990_s22 = scalar_select %p49_p1, %s5736_s15, %s7978_s27  }
  0x62   : > { %s407_s29 = sand.u32 1, %s5756_s20   ;;  %s5275_s10 = sshll.u32 %s5958_s13, 5 }
  0x63   : > { %s5276_s26 = sshll.u32 %s5752_s19, 3  ;;  %s411_s30 = scalar_lea.vmem [#allocation5], %s5275_s10 }
  0x64   : > { %s419_s11 = sshll.u32 %s411_s30, 4  ;;  %s416_s9 = sadd.s32 %s5748_s18, %s5276_s26  ;;  %s420_s11 = int_to_ptr.vmem [resolvable:$true] %s419_s11 }
  0x65   : > { %s5277_s0 = sshll.u32 %s416_s9, 7  ;;  %s408_s17 = scalar_lea.sflag [#allocation6], %s407_s29 }
  0x66   : > { %s418_s16 = scalar_lea.hbm %s7880_s2, %s5277_s0  ;;  %s5633_s21 = scalar_lea.vmem %s420_s11, 512 }
  0x67   : > { %p5634_p4 = scmp.ne.s32.totalorder %s420_s11, %s5633_s21  ;;  %s5765_s4 = smov [#allocation5]  }
  0x68   : > { %s5638_s5 = sshll.u32 %s5765_s4, 4  ;;  %s5639_s5 = int_to_ptr.vmem [resolvable:$false] %s5638_s5 }
  0x69   : > { %p5636_p6 = pnand %p5634_p4, %p5594_p10  ;;  %s5640_s6 = scalar_lea.vmem %s5639_s5, 1024 }
  0x6a   : > { %p5641_p11 = scmp.lt.s32.totalorder %s420_s11, %s5639_s5  ;;  %p5642_p13 = scmp.lt.s32.totalorder %s5640_s6, %s5633_s21 }
  0x6b   : > { %p5637_p1 = pneg %p5636_p6 }
  0x6c   : > { %p5643_p5 = por %p5642_p13, %p5641_p11 }
  0x6e   : > { %p5644_p3 = pnand %p5643_p5, %p5637_p1 }
  0x70   : > { %5647 = shalt.err (!%p5644_p3)
}
  0x71   : > { %5418 = dma.hbm_to_vmem [thread:$0]  (!%p5916_p2), %s418_s16, 512, %s420_s11, %s408_s17, %s5764_s8, %s7977_s24, %s7976_s12  }
  0x72   : > { %442 = sbr.rel (%p5901_p12) target bundleno = 1362 (0x552), region = 60 }
  0x77   : > { %s6010_s0 = sand.u32 1, %s5732_s14  }
  0x78   : > { %s5383_s1 = smul.u32 24, %s6010_s0  ;;  %s445_s3 = scalar_lea.sflag [#allocation3], %s6010_s0 }
  0x7a   : > { %s6014_s7 = scalar_lea.vmem [#allocation2], %s5383_s1 }
  0x7b   : > { %5707 = dma.done.wait (%p5887_p7), %s445_s3, 384  }
  0x7c   : > { %5709 = vsyncadd (%p5887_p7), %s445_s3, 4294966912  ;;  %s7979_s21 = sld [smem:[#allocation20_spill]]  ;;  %s5279_s17 = sshll.u32 %s6010_s0, 5 }
  0x7d   : > { %s6022_s28 = scalar_lea.vmem [#allocation5], %s5279_s17 }
  0x82   : > { %s453_s16 = sand.u32 1, %s7979_s21  }
  0x83   : > { %s454_s23 = scalar_lea.sflag [#allocation6], %s453_s16 }
  0x84   : > { %5711 = dma.done.wait (%p5887_p7), %s454_s23, 512  }
  0x85   : > { %5713 = vsyncadd (%p5887_p7), %s454_s23, 4294966784  ;;  %p7980_p12 = scmp.eq.s32.totalorder %s7979_s21, 0 }
  0x87   : > { %5715 = dma.done.wait (%p7980_p12), [#allocation6], 256   ;;  %p7981_p2 = pmov %p7980_p12 }
  0x89   : > { %5717 = vsyncadd (%p7981_p2), [#allocation6], 4294967040  ;;  %p7982_p10 = pmov %p7981_p2 }
  0x8a   : > { %p7983_p8 = pmov %p7981_p2 }
  0x8b   : > { %5719 = dma.done.wait (%p7982_p10), [#allocation9], 512  }
  0x8c   : > { %5721 = vsyncadd (%p7983_p8), [#allocation9], 4294966784  ;;  %s7984_s13 = sld [smem:[#allocation19_spill]]  ;;  %v551_v0 = vlaneseq  ;;  %v5766_v1 = vmov 1966171168   ;;  %v7908_v4 = vmov 0.0  }
  0x8d   : > { %s7985_s8 = sld [smem:[#allocation18_spill]]  ;;  %v549_v2 = vunpack.c.l.s4 %v5766_v1  ;;  %790 = vmatprep.mubr.f32.mxu1 %v7908_v4  ;;  %944 = vmatprep.mubr.f32.mxu0 %v7908_v4  ;;  %v543_v14 = vld [vmem:[%s6014_s7] sm:$0xff]  ;;  %v544_v19 = vld [vmem:[%s6014_s7 + $0x8] sm:$0xff]  ;;  %v545_v20 = vld [vmem:[%s6014_s7 + $0x10] sm:$0xff]  ;;  %v5768_v21 = vmov 1983009808  }
  0x8e   : > { %v6039_v3 = vshrl.u32 %v551_v0, 7  ;;  %s7988_s11 = sld [smem:[#allocation44_spill]]  ;;  %v630_v22 = vunpack.c.l.s4 %v5768_v21  ;;  %vm5769_vm1 = vmmov 1   ;;  %v5770_v35 = vmov 1934713408   ;;  %s5283_s26 = sshll.u32 %s6010_s0, 3 }
  0x8f   : > { %v550_v5 = vunpack.c.0.s8 %v549_v2  ;;  %s7989_s6 = sld [smem:[#allocation45_spill]]  ;;  %v661_v36 = vunpack.c.l.s4 %v5770_v35  ;;  %vm701_vm9 = vcmask 1042432   ;;  %vm694_vm10 = vcmask 23552   ;;  %s5773_s17 = smov [#allocation11]  }
  0x90   : > { %7986 = vst [vmem:[#allocation25_spill] sm:$0xff] %v6039_v3  ;;  %v6059_v9 = vsub.s32 0, %v6039_v3  ;;  %v631_v31 = vunpack.c.0.s8 %v630_v22  ;;  %s7994_s21 = sld [smem:[#allocation46_spill]]  ;;  %vm1745_vm13 = vcmask 130048   ;;  %vm1709_vm14 = vcmask 1041409  }
  0x91   : > { %v6045_v6 = vsub.s32 %v550_v5, %v6039_v3  ;;  %v662_v44 = vunpack.c.0.s8 %v661_v36  ;;  %vm1712_vm15 = vcmask 1042434   ;;  %s8057_s16 = sld [smem:[#allocation52_spill]] }
  0x92   : > { %p527_p9 = scmp.lt.s32.totalorder %s7984_s13, 1  ;;  %7990 = vst [vmem:[#allocation27_spill] sm:$0xff] %v6059_v9  ;;  %v6076_v40 = vsub.s32 %v631_v31, %v6039_v3  ;;  %s5327_s30 = sshll.u32 %s7984_s13, 1 }
  0x93   : > { %p529_p0 = scmp.lt.s32.totalorder %s7985_s8, 1  ;;  %7987 = vst [vmem:[#allocation26_spill] sm:$0xff] %v6045_v6  ;;  %v6083_v51 = vsub.s32 %v662_v44, %v6039_v3  ;;  %s5089_s4 = sadd.s32 %s7985_s8, %s5327_s30 }
  0x94   : > { %s528_s25 = scalar_select %p527_p9, %s7984_s13, 1  ;;  %7993 = vst [vmem:[#allocation28_spill] sm:$0xff] %v6076_v40 }
  0x95   : > { %s530_s12 = scalar_select %p529_p0, %s7985_s8, 1 }
  0x96   : > { %s5284_s24 = sshll.u32 %s528_s25, 1  ;;  %v625_v0 = vld [vmem:[%s7994_s21] sm:$0xff]  ;;  %s5328_s5 = sshll.u32 %s5089_s4, 7 }
  0x97   : > { %s532_s27 = sadd.s32 %s5284_s24, %s530_s12  ;;  %s7996_s12 = sld [smem:[#allocation47_spill]] }
  0x98   : > { %s5285_s29 = sshll.u32 %s532_s27, 2  ;;  %s5287_s10 = sshll.u32 %s532_s27, 3 }
  0x99   : > { %s6050_s9 = scalar_lea.vmem %s7988_s11, %s5285_s29  ;;  %s542_s1 = scalar_lea.vmem %s7989_s6, %s5287_s10 }
  0x9a   : > { %v5513_v7 = vld.sshfl [vmem:[%s6050_s9] sm:$0x13 pattern:$0x75316420]  ;;  %s8055_s10 = sld [smem:[#allocation51_spill]]  ;;  %s526_s6 = scalar_lea.vmem [#allocation11], %s5283_s26 }
  0x9b   : > { %v6056_v8 = vld [vmem:[%s542_s1] sm:$0xff]  ;;  %v555_v11 = vcombine.high %v5513_v7, %v5513_v7  ;;  %v562_v12 = vrot.slane %v5513_v7, %v6045_v6  ;;  %s8056_s11 = sld [smem:[#allocation21_spill]]  ;;  %s5093_s1 = sshll.u32 %s526_s6, 4  ;;  %s7827_s1 = int_to_ptr.vmem [resolvable:$true] %s5093_s1 }
  0x9c   : > { %v605_v10 = vmul.f32 %v6056_v8, %v6056_v8  ;;  %s8058_s23 = smov %s8057_s16  ;;  %s5078_s13 = scalar_lea.sflag [#allocation4], %s6010_s0 }
  0x9d   : > { %v569_v15 = vrot.slane %v555_v11, %v6045_v6  ;;  %v570_v16 = vcombine.high %v562_v12, %v562_v12  ;;  %v574_v17 = vrot.slane %v562_v12, %v6059_v9  ;;  %s5648_s8 = scalar_lea.vmem %s7827_s1, 128  ;;  %s5652_s25 = sshll.u32 %s5773_s17, 4  ;;  %s5653_s25 = int_to_ptr.vmem [resolvable:$false] %s5652_s25 }
  0x9e   : > { %v606_v13 = vrot.slane %v605_v10, 4  ;;  %p5649_p7 = scmp.ne.s32.totalorder %s7827_s1, %s5648_s8  ;;  %s5654_s24 = scalar_lea.vmem %s5653_s25, 256 }
  0x9f   : > { %v578_v23 = vrot.slane %v569_v15, %v6059_v9  ;;  %v582_v24 = vrot.slane %v570_v16, %v6059_v9  ;;  %v586_v25 = vsub.f32 %v543_v14, %v574_v17  ;;  %p5655_p11 = scmp.lt.s32.totalorder %s7827_s1, %s5653_s25  ;;  %p5656_p13 = scmp.lt.s32.totalorder %s5654_s24, %s5648_s8 }
  0xa0   : > { %v607_v18 = vadd.f32 %v606_v13, %v605_v10  ;;  %v626_v10 = vld [vmem:[%s7994_s21 + $0x8] sm:$0xff] }
  0xa1   : > { %v587_v27 = vsub.f32 %v544_v19, %v578_v23  ;;  %v588_v28 = vsub.f32 %v545_v20, %v582_v24  ;;  %v589_v29 = vand.u32 2147483647, %v586_v25  ;;  %vm592_vm0 = vweird.f32 %v586_v25  ;;  %p8059_p4 = scmp.ne.s32.totalorder %s8056_s11, 0  ;;  %p5657_p5 = por %p5656_p13, %p5655_p11 }
  0xa2   : > { %v608_v26 = vrot.slane %v607_v18, 2  ;;  %vm595_vm2 = vmxor %vm592_vm0, %vm5769_vm1  ;;  %vm1715_vm0 = vcmask 1043459  }
  0xa3   : > { %vm590_vm3 = vcmp.eq.f32.partialorder %v589_v29, inf  ;;  %vm593_vm4 = vweird.f32 %v587_v27  ;;  %vm594_vm5 = vweird.f32 %v588_v28  ;;  %v598_v32 = vsel %vm595_vm2, %v586_v25, 0.0  ;;  %p5650_p6 = pnand %p5649_p7, %p8059_p4 }
  0xa4   : > { %v609_v30 = vadd.f32 %v608_v26, %v607_v18  ;;  %vm6071_vm6 = vmxor %vm590_vm3, %vm5769_vm1  ;;  %v601_v38 = vmul.f32 2.0, %v598_v32  ;;  %v1690_v18 = vld [vmem:[#allocation7] sm:$0xff]  ;;  %vm1721_vm2 = vcmask 1045509   ;;  %vm1724_vm3 = vcmask 1046534  }
  0xa5   : > { %vm596_vm7 = vmxor %vm593_vm4, %vm5769_vm1  ;;  %v5288_v15 = vsel %vm6071_vm6, 1.0, %v7908_v4  ;;  %vm1727_vm4 = vcmask 1047559   ;;  %vm4993_vm6 = vcmask 523264   ;;  %p5651_p1 = pneg %p5650_p6 }
  0xa6   : > { %v610_v34 = vrot.slane %v609_v30, 1  ;;  %vm597_vm8 = vmxor %vm594_vm5, %vm5769_vm1  ;;  %v599_v37 = vsel %vm596_vm7, %v587_v27, 0.0  ;;  %vm1718_vm1 = vcmask 1044484   ;;  %vm5771_vm5 = vmmov 0  }
  0xa7   : > { %v600_v41 = vsel %vm597_vm8, %v588_v28, 0.0  ;;  %v602_v42 = vmul.f32 2.0, %v599_v37  ;;  %p5658_p3 = pnand %p5657_p5, %p5651_p1 }
  0xa8   : > { %v611_v39 = vadd.f32 %v610_v34, %v609_v30  ;;  %v603_v43 = vmul.f32 2.0, %v600_v41 }
  0xa9   : > { %v643_v45 = vcombine.high %v602_v42, %v7908_v4  ;;  %v650_v47 = vrot.slane %v602_v42, %v6076_v40 }
  0xaa   : > { %5508 = vrsqrt.f32 %v611_v39  ;;  %v627_v46 = vcombine.low %v601_v38, %v603_v43  ;;  %v628_v48 = vcombine.high %v601_v38, %v603_v43  ;;  %vm614_vm11 = vcmp.eq.f32.partialorder %v611_v39, inf }
  0xab   : > { %v657_v49 = vrot.slane %v643_v45, %v6076_v40  ;;  %v617_v5 = vand.u32 2147483648, %v611_v39  ;;  %vm616_vm12 = vcmp.eq.f32.partialorder %v611_v39, 0.0 }
  0xac   : > { %v635_v50 = vrot.slane %v627_v46, %v6076_v40  ;;  %v642_v52 = vrot.slane %v628_v48, %v6076_v40 }
  0xae   : > { %v658_v53 = vcombine.low %v635_v50, %v650_v47  ;;  %v659_v54 = vcombine.high %v635_v50, %v650_v47  ;;  %v674_v55 = vcombine.low %v642_v52, %v657_v49  ;;  %v675_v56 = vcombine.high %v642_v52, %v657_v49 }
  0xb0   : > { %v666_v57 = vrot.slane %v658_v53, %v6083_v51  ;;  %v673_v58 = vrot.slane %v659_v54, %v6083_v51  ;;  %v682_v59 = vrot.slane %v674_v55, %v6083_v51  ;;  %v689_v60 = vrot.slane %v675_v56, %v6083_v51 }
  0xb2   : > { %v690_v61 = vcombine.high %v666_v57, %v7908_v4  ;;  %v691_v62 = vcombine.high %v673_v58, %v7908_v4  ;;  %v692_v63 = vcombine.high %v682_v59, %v7908_v4  ;;  %v693_v1 = vcombine.high %v689_v60, %v7908_v4 }
  0xb4   : > { %5289 = vmatprep.subr.msk.mxu1 %vm701_vm9, %v690_v61  ;;  %5297 = vmatprep.subr.msk.mxu0 %vm701_vm9, %v692_v63 }
  0xb5   : > { %5290 = vmatpush1.msk.msra.mxu1 %vm701_vm9, %v666_v57  ;;  %5298 = vmatpush1.msk.msra.mxu0 %vm701_vm9, %v682_v59 }
  0xb6   : > { %5291 = vmatmul.mubr.msk.f32.vlgmr.msra.gmra.mxu1 %vm694_vm10, %v625_v0  ;;  %5293 = vmatprep.subr.msk.mxu1 %vm701_vm9, %v691_v62 }
  0xb7   : > { %v5509_v2 = vpop.eup %5508  ;;  %796 = vmatprep.mubr.f32.mxu1 %v7908_v4  ;;  %5294 = vmatpush1.msk.msra.mxu1 %vm701_vm9, %v673_v58 }
  0xb8   : > { %v613_v7 = vmul.f32 %v5509_v2, %v611_v39  ;;  %5301 = vmatprep.subr.msk.mxu1 %vm701_vm9, %v693_v1  ;;  %5299 = vmatmul.mubr.msk.f32.vlgmr.msra.gmra.mxu0 %vm694_vm10, %v625_v0 }
  0xb9   : > { %950 = vmatprep.mubr.f32.mxu0 %v7908_v4 }
  0xba   : > { %v615_v11 = vsel %vm614_vm11, %v611_v39, %v613_v7  ;;  %5292 = vmatmul.mubr.msk.f32.gmra.mxu1 %vm694_vm10, %v626_v10 }
  0xbb   : > { %v618_v12 = vsel %vm616_vm12, %v617_v5, %v615_v11  ;;  %867 = vmatprep.mubr.f32.mxu1 %v7908_v4 }
  0xbc   : > { %v619_v13 = vmax.f32 %v618_v12, 1e-12  ;;  %5300 = vmatmul.mubr.msk.f32.gmra.mxu0 %vm694_vm10, %v626_v10 }
  0xbd   : > { %5352 = vmatprep.mubr.msk.f32.mxu0 %vm1745_vm13, %v1690_v18 }
  0xbe   : > { %5510 = vrcp.f32 %v619_v13  ;;  %5295 = vmatmul.mubr.msk.f32.vlgmr.msra.gmra.mxu1 %vm694_vm10, %v625_v0 }
  0xbf   : > { %873 = vmatprep.mubr.f32.mxu1 %v7908_v4  ;;  %5302 = vmatpush1.msk.msra.mxu1 %vm701_vm9, %v689_v60 }
  0xc2   : > { %5296 = vmatmul.mubr.msk.f32.gmra.mxu1 %vm694_vm10, %v626_v10 }
  0xc3   : > { %1021 = vmatprep.mubr.f32.mxu1 %v7908_v4 }
  0xc6   : > { %5303 = vmatmul.mubr.msk.f32.vlgmr.msra.gmra.mxu1 %vm694_vm10, %v625_v0 }
  0xc7   : > { %1027 = vmatprep.mubr.f32.mxu1 %v7908_v4 }
  0xca   : > { %5304 = vmatmul.mubr.msk.f32.gmra.mxu1 %vm694_vm10, %v626_v10 }
  0xcb   : > { %v5511_v14 = vpop.eup %5510  ;;  %2171 = vmatprep.mubr.f32.mxu1 %v7908_v4 }
  0xcc   : > { %v621_v16 = vmul.f32 %v5511_v14, %v6056_v8 }
  0xce   : > { %v6127_v17 = vmul.f32 %v5288_v15, %v621_v16 }
  0xd0   : > { %7995 = vst [vmem:[#allocation29_spill] sm:$0xff] %v6127_v17 }
 0x176   : > { %v792_v19 = vpop.f32.mrf.mxu1 }
 0x178   : > { %v794_v20 = vpop.f32.mrf.mxu1  ;;  %v946_v28 = vpop.f32.mrf.mxu0 }
 0x17a   : > { %v798_v21 = vpop.f32.mrf.mxu1  ;;  %v948_v42 = vpop.f32.mrf.mxu0 }
 0x17c   : > { %v800_v22 = vpop.f32.mrf.mxu1  ;;  %v952_v58 = vpop.f32.mrf.mxu0 }
 0x17e   : > { %v869_v23 = vpop.f32.mrf.mxu1 }
 0x17f   : > { %v1034_v24 = vcombine.low %v792_v19, %v869_v23  ;;  %v1035_v25 = vcombine.high %v792_v19, %v869_v23 }
 0x180   : > { %v871_v26 = vpop.f32.mrf.mxu1 }
 0x181   : > { %v1050_v27 = vcombine.low %v794_v20, %v871_v26  ;;  %v1051_v8 = vcombine.high %v794_v20, %v871_v26  ;;  %v1042_v29 = vrot.slane %v1034_v24, %v6076_v40  ;;  %v1049_v30 = vrot.slane %v1035_v25, %v6076_v40 }
 0x182   : > { %v875_v31 = vpop.f32.mrf.mxu1 }
 0x183   : > { %v1058_v32 = vrot.slane %v1050_v27, %v6076_v40  ;;  %v1065_v33 = vrot.slane %v1051_v8, %v6076_v40  ;;  %v1170_v34 = vcombine.low %v798_v21, %v875_v31  ;;  %v1171_v35 = vcombine.high %v798_v21, %v875_v31  ;;  %v954_v21 = vpop.f32.mrf.mxu0 }
 0x184   : > { %v877_v36 = vpop.f32.mrf.mxu1 }
 0x185   : > { %v1098_v37 = vcombine.low %v1042_v29, %v1058_v32  ;;  %v1099_v38 = vcombine.high %v1042_v29, %v1058_v32  ;;  %v1114_v39 = vcombine.low %v1049_v30, %v1065_v33  ;;  %v1115_v41 = vcombine.high %v1049_v30, %v1065_v33 }
 0x186   : > { %v1186_v43 = vcombine.low %v800_v22, %v877_v36  ;;  %v1187_v44 = vcombine.high %v800_v22, %v877_v36  ;;  %v1023_v45 = vpop.f32.mrf.mxu1  ;;  %v1178_v48 = vrot.slane %v1170_v34, %v6076_v40  ;;  %v1185_v49 = vrot.slane %v1171_v35, %v6076_v40 }
 0x187   : > { %v1106_v46 = vrot.slane %v1098_v37, %v6083_v51  ;;  %v1113_v47 = vrot.slane %v1099_v38, %v6083_v51  ;;  %v1066_v53 = vcombine.low %v946_v28, %v1023_v45  ;;  %v1067_v54 = vcombine.high %v946_v28, %v1023_v45 }
 0x188   : > { %v1194_v50 = vrot.slane %v1186_v43, %v6076_v40  ;;  %v1201_v52 = vrot.slane %v1187_v44, %v6076_v40  ;;  %v1025_v55 = vpop.f32.mrf.mxu1  ;;  %v1122_v56 = vrot.slane %v1114_v39, %v6083_v51  ;;  %v1129_v57 = vrot.slane %v1115_v41, %v6083_v51 }
 0x189   : > { %v1082_v59 = vcombine.low %v948_v42, %v1025_v55  ;;  %v1083_v60 = vcombine.high %v948_v42, %v1025_v55  ;;  %v1074_v2 = vrot.slane %v1066_v53, %v6076_v40  ;;  %v1081_v5 = vrot.slane %v1067_v54, %v6076_v40 }
 0x18a   : > { %v1234_v61 = vcombine.low %v1178_v48, %v1194_v50  ;;  %v1235_v62 = vcombine.high %v1178_v48, %v1194_v50  ;;  %v1250_v63 = vcombine.low %v1185_v49, %v1201_v52  ;;  %v1251_v0 = vcombine.high %v1185_v49, %v1201_v52  ;;  %v1029_v1 = vpop.f32.mrf.mxu1 }
 0x18b   : > { %v1090_v7 = vrot.slane %v1082_v59, %v6076_v40  ;;  %v1097_v10 = vrot.slane %v1083_v60, %v6076_v40  ;;  %v1202_v22 = vcombine.low %v952_v58, %v1029_v1  ;;  %v1203_v23 = vcombine.high %v952_v58, %v1029_v1 }
 0x18c   : > { %v6147_v11 = vrot.slane %v1234_v61, %v6083_v51  ;;  %v6150_v12 = vrot.slane %v1235_v62, %v6083_v51  ;;  %v6153_v13 = vrot.slane %v1250_v63, %v6083_v51  ;;  %v6156_v14 = vrot.slane %v1251_v0, %v6083_v51  ;;  %v1031_v15 = vpop.f32.mrf.mxu1 }
 0x18d   : > { %v1130_v16 = vcombine.low %v1074_v2, %v1090_v7  ;;  %v1131_v18 = vcombine.high %v1074_v2, %v1090_v7  ;;  %v1146_v19 = vcombine.low %v1081_v5, %v1097_v10  ;;  %v1147_v20 = vcombine.high %v1081_v5, %v1097_v10 }
 0x18e   : > { %v1218_v24 = vcombine.low %v954_v21, %v1031_v15  ;;  %v1219_v25 = vcombine.high %v954_v21, %v1031_v15  ;;  %v1210_v29 = vrot.slane %v1202_v22, %v6076_v40  ;;  %v1217_v30 = vrot.slane %v1203_v23, %v6076_v40 }
 0x18f   : > { %v1138_v26 = vrot.slane %v1130_v16, %v6083_v51  ;;  %v1145_v27 = vrot.slane %v1131_v18, %v6083_v51  ;;  %v1154_v8 = vrot.slane %v1146_v19, %v6083_v51  ;;  %v1161_v28 = vrot.slane %v1147_v20, %v6083_v51 }
 0x190   : > { %v1226_v31 = vrot.slane %v1218_v24, %v6076_v40  ;;  %v1233_v32 = vrot.slane %v1219_v25, %v6076_v40 }
 0x191   : > { %v1162_v33 = vcombine.low %v1106_v46, %v1138_v26  ;;  %v1163_v34 = vcombine.high %v1106_v46, %v1138_v26  ;;  %v1164_v35 = vcombine.low %v1113_v47, %v1145_v27  ;;  %v1165_v36 = vcombine.high %v1113_v47, %v1145_v27 }
 0x192   : > { %v1166_v37 = vcombine.low %v1122_v56, %v1154_v8  ;;  %v1167_v38 = vcombine.high %v1122_v56, %v1154_v8  ;;  %v1168_v39 = vcombine.low %v1129_v57, %v1161_v28  ;;  %v1169_v41 = vcombine.high %v1129_v57, %v1161_v28 }
 0x193   : > { %v1306_v42 = vmax.f32 %v1162_v33, 0.0  ;;  %v1307_v43 = vmax.f32 %v1163_v34, 0.0  ;;  %v1308_v44 = vmax.f32 %v1164_v35, 0.0  ;;  %v1309_v45 = vmax.f32 %v1165_v36, 0.0 }
 0x194   : > { %v1310_v48 = vmax.f32 %v1166_v37, 0.0  ;;  %v1311_v49 = vmax.f32 %v1167_v38, 0.0  ;;  %v1312_v50 = vmax.f32 %v1168_v39, 0.0  ;;  %v1313_v52 = vmax.f32 %v1169_v41, 0.0 }
 0x195   : > { %v6167_v53 = vmul.f32 %v1306_v42, %v6127_v17  ;;  %v6170_v54 = vmul.f32 %v1307_v43, %v6127_v17  ;;  %v6173_v46 = vmul.f32 %v1308_v44, %v6127_v17  ;;  %v6176_v47 = vmul.f32 %v1309_v45, %v6127_v17 }
 0x196   : > { %v6179_v55 = vmul.f32 %v1310_v48, %v6127_v17  ;;  %v6182_v56 = vmul.f32 %v1311_v49, %v6127_v17  ;;  %v6185_v57 = vmul.f32 %v1312_v50, %v6127_v17  ;;  %v6188_v58 = vmul.f32 %v1313_v52, %v6127_v17 }
 0x197   : > { %v1266_v59 = vcombine.low %v1210_v29, %v1226_v31  ;;  %v1267_v60 = vcombine.high %v1210_v29, %v1226_v31  ;;  %v1282_v61 = vcombine.low %v1217_v30, %v1233_v32  ;;  %v1283_v62 = vcombine.high %v1217_v30, %v1233_v32 }
 0x198   : > { %v1829_v63 = vcombine.low %v6167_v53, %v6173_v46  ;;  %v1845_v0 = vcombine.low %v6170_v54, %v6176_v47  ;;  %v1861_v1 = vcombine.low %v6179_v55, %v6185_v57  ;;  %v1877_v2 = vcombine.low %v6182_v56, %v6188_v58 }
 0x199   : > { %v1274_v5 = vrot.slane %v1266_v59, %v6083_v51  ;;  %v1281_v7 = vrot.slane %v1267_v60, %v6083_v51  ;;  %v1290_v10 = vrot.slane %v1282_v61, %v6083_v51  ;;  %v1297_v15 = vrot.slane %v1283_v62, %v6083_v51 }
 0x19a   : > { %v6203_v16 = vrot.slane %v1829_v63, %v6076_v40  ;;  %v6206_v18 = vrot.slane %v1845_v0, %v6076_v40  ;;  %v6209_v19 = vrot.slane %v1861_v1, %v6076_v40  ;;  %v6212_v20 = vrot.slane %v1877_v2, %v6076_v40 }
 0x19b   : > { %v1298_v21 = vcombine.low %v6147_v11, %v1274_v5  ;;  %v1299_v22 = vcombine.high %v6147_v11, %v1274_v5  ;;  %v1300_v23 = vcombine.low %v6150_v12, %v1281_v7  ;;  %v1301_v24 = vcombine.high %v6150_v12, %v1281_v7 }
 0x19c   : > { %v1302_v25 = vcombine.low %v6153_v13, %v1290_v10  ;;  %v1303_v26 = vcombine.high %v6153_v13, %v1290_v10  ;;  %v1304_v27 = vcombine.low %v6156_v14, %v1297_v15  ;;  %v1305_v8 = vcombine.high %v6156_v14, %v1297_v15 }
 0x19d   : > { %v1314_v28 = vmax.f32 %v1298_v21, 0.0  ;;  %v1315_v29 = vmax.f32 %v1299_v22, 0.0  ;;  %v1316_v30 = vmax.f32 %v1300_v23, 0.0  ;;  %v1317_v31 = vmax.f32 %v1301_v24, 0.0 }
 0x19e   : > { %v1318_v32 = vmax.f32 %v1302_v25, 0.0  ;;  %v1319_v33 = vmax.f32 %v1303_v26, 0.0  ;;  %v1320_v34 = vmax.f32 %v1304_v27, 0.0  ;;  %v1321_v11 = vmax.f32 %v1305_v8, 0.0 }
 0x19f   : > { %v6223_v35 = vmul.f32 %v1314_v28, %v6127_v17  ;;  %v6226_v12 = vmul.f32 %v1315_v29, %v6127_v17  ;;  %v6229_v13 = vmul.f32 %v1316_v30, %v6127_v17  ;;  %v6232_v36 = vmul.f32 %v1317_v31, %v6127_v17 }
 0x1a0   : > { %v6235_v14 = vmul.f32 %v1318_v32, %v6127_v17  ;;  %v6238_v37 = vmul.f32 %v1319_v33, %v6127_v17  ;;  %v6241_v38 = vmul.f32 %v1320_v34, %v6127_v17  ;;  %v6244_v39 = vmul.f32 %v1321_v11, %v6127_v17 }
 0x1a1   : > { %v1965_v41 = vcombine.low %v6223_v35, %v6229_v13  ;;  %v1981_v42 = vcombine.low %v6226_v12, %v6232_v36  ;;  %v1893_v43 = vcombine.low %v6203_v16, %v6206_v18  ;;  %v1925_v44 = vcombine.low %v6209_v19, %v6212_v20 }
 0x1a2   : > { %v1997_v45 = vcombine.low %v6235_v14, %v6241_v38  ;;  %v2013_v48 = vcombine.low %v6238_v37, %v6244_v39  ;;  %v1966_v49 = vcombine.high %v6223_v35, %v6229_v13  ;;  %v1982_v50 = vcombine.high %v6226_v12, %v6232_v36 }
 0x1a3   : > { %v6263_v52 = vrot.slane %v1965_v41, %v6076_v40  ;;  %v6266_v59 = vrot.slane %v1981_v42, %v6076_v40  ;;  %v1901_v60 = vrot.slane %v1893_v43, %v6083_v51  ;;  %v1933_v61 = vrot.slane %v1925_v44, %v6083_v51 }
 0x1a4   : > { %v6271_v62 = vrot.slane %v1997_v45, %v6076_v40  ;;  %v6274_v63 = vrot.slane %v2013_v48, %v6076_v40  ;;  %v6277_v0 = vrot.slane %v1966_v49, %v6076_v40  ;;  %v6280_v1 = vrot.slane %v1982_v50, %v6076_v40 }
 0x1a5   : > { %v2029_v2 = vcombine.low %v6263_v52, %v6266_v59  ;;  %v1958_v5 = vcombine.high %v1901_v60, %v1933_v61  ;;  %v1998_v7 = vcombine.high %v6235_v14, %v6241_v38  ;;  %v2014_v15 = vcombine.high %v6238_v37, %v6244_v39 }
 0x1a6   : > { %v2061_v10 = vcombine.low %v6271_v62, %v6274_v63  ;;  %v2045_v21 = vcombine.low %v6277_v0, %v6280_v1  ;;  %v1830_v22 = vcombine.high %v6167_v53, %v6173_v46  ;;  %v1846_v25 = vcombine.high %v6170_v54, %v6176_v47 }
 0x1a7   : > { %v2037_v23 = vrot.slane %v2029_v2, %v6083_v51  ;;  %v6296_v24 = vrot.slane %v1998_v7, %v6076_v40  ;;  %v1862_v26 = vcombine.high %v6179_v55, %v6185_v57  ;;  %v6304_v8 = vrot.slane %v2014_v15, %v6076_v40  ;;  %v6336_v15 = vld [vmem:[%s7996_s12] sm:$0xff] }
 0x1a8   : > { %v2069_v27 = vrot.slane %v2061_v10, %v6083_v51  ;;  %v2053_v28 = vrot.slane %v2045_v21, %v6083_v51  ;;  %v6308_v29 = vrot.slane %v1830_v22, %v6076_v40  ;;  %v6311_v30 = vrot.slane %v1846_v25, %v6076_v40  ;;  %7997 = vst [vmem:[#allocation30_spill] sm:$0xff] %v6336_v15 }
 0x1a9   : > { %v6314_v31 = vrot.slane %v1862_v26, %v6076_v40  ;;  %v1878_v32 = vcombine.high %v6182_v56, %v6188_v58  ;;  %v1362_v33 = vrot.slane %v6223_v35, 1  ;;  %v2077_v41 = vcombine.low %v6296_v24, %v6304_v8 }
 0x1aa   : > { %v2094_v34 = vcombine.high %v2037_v23, %v2069_v27  ;;  %v2093_v11 = vcombine.low %v2037_v23, %v2069_v27  ;;  %v1363_v42 = vrot.slane %v6226_v12, 1  ;;  %v1909_v44 = vcombine.low %v6308_v29, %v6311_v30 }
 0x1ab   : > { %v6323_v43 = vrot.slane %v1878_v32, %v6076_v40  ;;  %v1364_v45 = vrot.slane %v6229_v13, 1  ;;  %v1365_v48 = vrot.slane %v6232_v36, 1  ;;  %v2085_v49 = vrot.slane %v2077_v41, %v6083_v51 }
 0x1ac   : > { %2135 = vmatprep.subr.mxu1 %v2094_v34  ;;  %v1366_v50 = vrot.slane %v6235_v14, 1  ;;  %v1367_v2 = vrot.slane %v6238_v37, 1  ;;  %v1368_v7 = vrot.slane %v6241_v38, 1  ;;  %v1957_v10 = vcombine.low %v1901_v60, %v1933_v61 }
 0x1ad   : > { %2136 = vmatpush1.msra.mxu1 %v2093_v11  ;;  %v1917_v21 = vrot.slane %v1909_v44, %v6083_v51  ;;  %v1941_v22 = vcombine.low %v6314_v31, %v6323_v43  ;;  %v1369_v23 = vrot.slane %v6244_v39, 1  ;;  %v2098_v25 = vcombine.high %v2053_v28, %v2085_v49 }
 0x1ae   : > { %2137 = vmatprep.subr.mxu1 %v1958_v5  ;;  %v2097_v26 = vcombine.low %v2053_v28, %v2085_v49  ;;  %v1394_v27 = vmax.f32 %v6223_v35, %v1362_v33  ;;  %v1395_v32 = vmax.f32 %v6226_v12, %v1363_v42  ;;  %v1396_v61 = vmax.f32 %v6229_v13, %v1364_v45 }
 0x1af   : > { %2138 = vmatpush1.msra.mxu1 %v1957_v10  ;;  %v1949_v60 = vrot.slane %v1941_v22, %v6083_v51  ;;  %v1397_v34 = vmax.f32 %v6232_v36, %v1365_v48  ;;  %v1398_v11 = vmax.f32 %v6235_v14, %v1366_v50  ;;  %v1399_v5 = vmax.f32 %v6238_v37, %v1367_v2  ;;  %v6364_v10 = vld [vmem:[%s7996_s12 + $0x8] sm:$0xff] }
 0x1b0   : > { %2289 = vmatprep.subr.mxu1 %v2098_v25  ;;  %5307 = vmatmul.mubr.msk.f32.vlgmr.msra.gmra.mxu1 %vm1745_vm13, %v6336_v15  ;;  %v1400_v28 = vmax.f32 %v6241_v38, %v1368_v7  ;;  %v1401_v33 = vmax.f32 %v6244_v39, %v1369_v23  ;;  %v1410_v41 = vrot.slane %v6223_v35, 2  ;;  %v1411_v44 = vrot.slane %v6226_v12, 2  ;;  %7998 = vst [vmem:[#allocation31_spill] sm:$0xff] %v6364_v10 }
 0x1b1   : > { %2290 = vmatpush1.msra.mxu1 %v2097_v26  ;;  %v1962_v42 = vcombine.high %v1917_v21, %v1949_v60  ;;  %v1412_v45 = vrot.slane %v6229_v13, 2  ;;  %v1413_v48 = vrot.slane %v6232_v36, 2  ;;  %2177 = vmatprep.mubr.f32.mxu1 %v7908_v4  ;;  %v1961_v49 = vcombine.low %v1917_v21, %v1949_v60 }
 0x1b2   : > { %v1414_v50 = vrot.slane %v6235_v14, 2  ;;  %v1415_v2 = vrot.slane %v6238_v37, 2  ;;  %v1416_v7 = vrot.slane %v6241_v38, 2  ;;  %v1417_v22 = vrot.slane %v6244_v39, 2 }
 0x1b3   : > { %2291 = vmatprep.subr.mxu1 %v1962_v42  ;;  %v1443_v23 = vmax.f32 %v1395_v32, %v1411_v44  ;;  %v1444_v25 = vmax.f32 %v1396_v61, %v1412_v45  ;;  %v1445_v26 = vmax.f32 %v1397_v34, %v1413_v48  ;;  %v1442_v4 = vmax.f32 %v1394_v27, %v1410_v41 }
 0x1b4   : > { %2292 = vmatpush1.msra.mxu1 %v1961_v49  ;;  %v1446_v21 = vmax.f32 %v1398_v11, %v1414_v50  ;;  %v1447_v60 = vmax.f32 %v1399_v5, %v1415_v2  ;;  %v1448_v3 = vmax.f32 %v1400_v28, %v1416_v7  ;;  %v1449_v17 = vmax.f32 %v1401_v33, %v1417_v22 }
 0x1b5   : > { %v1459_v40 = vrot.slane %v6226_v12, 3  ;;  %v1460_v9 = vrot.slane %v6229_v13, 3  ;;  %v1461_v6 = vrot.slane %v6232_v36, 3  ;;  %5308 = vmatmul.mubr.msk.f32.gmra.mxu1 %vm1745_vm13, %v6364_v10  ;;  %v1458_v42 = vrot.slane %v6223_v35, 3 }
 0x1b6   : > { %v1462_v32 = vrot.slane %v6235_v14, 3  ;;  %v1463_v61 = vrot.slane %v6238_v37, 3  ;;  %v1464_v27 = vrot.slane %v6241_v38, 3  ;;  %v7999_v34 = vmov 0.0  }
 0x1b7   : > { %2325 = vmatprep.mubr.f32.mxu1 %v7999_v34  ;;  %v1465_v11 = vrot.slane %v6244_v39, 3  ;;  %v1491_v5 = vmax.f32 %v1443_v23, %v1459_v40  ;;  %v1492_v28 = vmax.f32 %v1444_v25, %v1460_v9  ;;  %v1493_v33 = vmax.f32 %v1445_v26, %v1461_v6 }
 0x1b8   : > { %v1490_v41 = vmax.f32 %v1442_v4, %v1458_v42  ;;  %v1494_v44 = vmax.f32 %v1446_v21, %v1462_v32  ;;  %v1495_v45 = vmax.f32 %v1447_v60, %v1463_v61  ;;  %v1496_v48 = vmax.f32 %v1448_v3, %v1464_v27 }
 0x1b9   : > { %v1497_v49 = vmax.f32 %v1449_v17, %v1465_v11  ;;  %v1507_v50 = vrot.slane %v6226_v12, 4  ;;  %v1508_v2 = vrot.slane %v6229_v13, 4  ;;  %v1509_v7 = vrot.slane %v6232_v36, 4  ;;  %5311 = vmatmul.mubr.msk.f32.vlgmr.msra.gmra.mxu1 %vm1745_vm13, %v6336_v15 }
 0x1ba   : > { %v1506_v22 = vrot.slane %v6223_v35, 4  ;;  %v1510_v40 = vrot.slane %v6235_v14, 4  ;;  %v1511_v6 = vrot.slane %v6238_v37, 4  ;;  %v1512_v4 = vrot.slane %v6241_v38, 4  ;;  %2331 = vmatprep.mubr.f32.mxu1 %v7999_v34 }
 0x1bb   : > { %v1513_v3 = vrot.slane %v6244_v39, 4  ;;  %v1539_v9 = vmax.f32 %v1491_v5, %v1507_v50  ;;  %v1540_v17 = vmax.f32 %v1492_v28, %v1508_v2  ;;  %v1541_v23 = vmax.f32 %v1493_v33, %v1509_v7 }
 0x1bc   : > { %v1538_v25 = vmax.f32 %v1490_v41, %v1506_v22  ;;  %v1542_v26 = vmax.f32 %v1494_v44, %v1510_v40  ;;  %v1543_v21 = vmax.f32 %v1495_v45, %v1511_v6  ;;  %v1544_v60 = vmax.f32 %v1496_v48, %v1512_v4 }
 0x1bd   : > { %v1545_v42 = vmax.f32 %v1497_v49, %v1513_v3  ;;  %v1555_v32 = vrot.slane %v6226_v12, 5  ;;  %v1556_v61 = vrot.slane %v6229_v13, 5  ;;  %v1557_v27 = vrot.slane %v6232_v36, 5  ;;  %5312 = vmatmul.mubr.msk.f32.gmra.mxu1 %vm1745_vm13, %v6364_v10 }
 0x1be   : > { %v1554_v11 = vrot.slane %v6223_v35, 5  ;;  %v1558_v5 = vrot.slane %v6235_v14, 5  ;;  %v1559_v28 = vrot.slane %v6238_v37, 5  ;;  %v1560_v33 = vrot.slane %v6241_v38, 5 }
 0x1bf   : > { %v1561_v41 = vrot.slane %v6244_v39, 5  ;;  %v1587_v44 = vmax.f32 %v1539_v9, %v1555_v32  ;;  %v1588_v45 = vmax.f32 %v1540_v17, %v1556_v61  ;;  %v1589_v48 = vmax.f32 %v1541_v23, %v1557_v27 }
 0x1c0   : > { %v1586_v49 = vmax.f32 %v1538_v25, %v1554_v11  ;;  %v1590_v50 = vmax.f32 %v1542_v26, %v1558_v5  ;;  %v1591_v2 = vmax.f32 %v1543_v21, %v1559_v28  ;;  %v1592_v7 = vmax.f32 %v1544_v60, %v1560_v33 }
 0x1c1   : > { %v1593_v22 = vmax.f32 %v1545_v42, %v1561_v41  ;;  %v1603_v40 = vrot.slane %v6226_v12, 6  ;;  %v1604_v6 = vrot.slane %v6229_v13, 6  ;;  %v1605_v4 = vrot.slane %v6232_v36, 6 }
 0x1c2   : > { %v1602_v3 = vrot.slane %v6223_v35, 6  ;;  %v1606_v10 = vrot.slane %v6235_v14, 6  ;;  %v1607_v15 = vrot.slane %v6238_v37, 6  ;;  %v1608_v9 = vrot.slane %v6241_v38, 6 }
 0x1c3   : > { %v1609_v17 = vrot.slane %v6244_v39, 6  ;;  %v1635_v23 = vmax.f32 %v1587_v44, %v1603_v40  ;;  %v1636_v25 = vmax.f32 %v1588_v45, %v1604_v6  ;;  %v1637_v26 = vmax.f32 %v1589_v48, %v1605_v4 }
 0x1c4   : > { %v1634_v21 = vmax.f32 %v1586_v49, %v1602_v3  ;;  %v1638_v60 = vmax.f32 %v1590_v50, %v1606_v10  ;;  %v1639_v42 = vmax.f32 %v1591_v2, %v1607_v15  ;;  %v1640_v32 = vmax.f32 %v1592_v7, %v1608_v9 }
 0x1c5   : > { %v1641_v61 = vmax.f32 %v1593_v22, %v1609_v17  ;;  %v1651_v27 = vrot.slane %v6226_v12, 7  ;;  %v1652_v11 = vrot.slane %v6229_v13, 7  ;;  %v1653_v5 = vrot.slane %v6232_v36, 7 }
 0x1c6   : > { %v1650_v28 = vrot.slane %v6223_v35, 7  ;;  %v1654_v33 = vrot.slane %v6235_v14, 7  ;;  %v1655_v41 = vrot.slane %v6238_v37, 7  ;;  %v1656_v44 = vrot.slane %v6241_v38, 7 }
 0x1c7   : > { %v1657_v15 = vrot.slane %v6244_v39, 7  ;;  %v1683_v10 = vmax.f32 %v1635_v23, %v1651_v27  ;;  %v1684_v45 = vmax.f32 %v1636_v25, %v1652_v11  ;;  %v1685_v48 = vmax.f32 %v1637_v26, %v1653_v5 }
 0x1c8   : > { %v1682_v12 = vmax.f32 %v1634_v21, %v1650_v28  ;;  %v1686_v13 = vmax.f32 %v1638_v60, %v1654_v33  ;;  %v1687_v49 = vmax.f32 %v1639_v42, %v1655_v41  ;;  %v1688_v36 = vmax.f32 %v1640_v32, %v1656_v44 }
 0x1c9   : > { %v1689_v50 = vmax.f32 %v1641_v61, %v1657_v15  ;;  %v1729_v35 = vrot.slane %v1683_v10, 7  ;;  %v1731_v2 = vrot.slane %v1684_v45, 6  ;;  %v1354_v14 = vrot.slane %v6167_v53, 1 }
 0x1ca   : > { %v1733_v37 = vrot.slane %v1685_v48, 5  ;;  %v1735_v7 = vrot.slane %v1686_v13, 4  ;;  %v1737_v38 = vrot.slane %v1687_v49, 3  ;;  %v1739_v22 = vrot.slane %v1688_v36, 2 }
 0x1cb   : > { %v1730_v39 = vsel %vm1709_vm14, %v1729_v35, %v1682_v12  ;;  %v1355_v40 = vrot.slane %v6170_v54, 1  ;;  %v1356_v6 = vrot.slane %v6173_v46, 1  ;;  %v1357_v4 = vrot.slane %v6176_v47, 1 }
 0x1cc   : > { %v1732_v3 = vsel %vm1712_vm15, %v1731_v2, %v1730_v39  ;;  %v1358_v9 = vrot.slane %v6179_v55, 1  ;;  %v1359_v17 = vrot.slane %v6182_v56, 1  ;;  %v1360_v23 = vrot.slane %v6185_v57, 1 }
 0x1cd   : > { %v1734_v25 = vsel %vm1715_vm0, %v1733_v37, %v1732_v3  ;;  %v1741_v26 = vrot.slane %v1689_v50, 1  ;;  %v1361_v21 = vrot.slane %v6188_v58, 1  ;;  %v1386_v60 = vmax.f32 %v6167_v53, %v1354_v14 }
 0x1ce   : > { %v1736_v42 = vsel %vm1718_vm1, %v1735_v7, %v1734_v25  ;;  %v1387_v32 = vmax.f32 %v6170_v54, %v1355_v40  ;;  %v1388_v61 = vmax.f32 %v6173_v46, %v1356_v6  ;;  %v1389_v27 = vmax.f32 %v6176_v47, %v1357_v4 }
 0x1cf   : > { %v1738_v11 = vsel %vm1721_vm2, %v1737_v38, %v1736_v42  ;;  %v1390_v5 = vmax.f32 %v6179_v55, %v1358_v9  ;;  %v1391_v28 = vmax.f32 %v6182_v56, %v1359_v17  ;;  %v1392_v33 = vmax.f32 %v6185_v57, %v1360_v23 }
 0x1d0   : > { %v1740_v41 = vsel %vm1724_vm3, %v1739_v22, %v1738_v11  ;;  %v1393_v44 = vmax.f32 %v6188_v58, %v1361_v21  ;;  %v1402_v15 = vrot.slane %v6167_v53, 2  ;;  %v1403_v10 = vrot.slane %v6170_v54, 2 }
 0x1d1   : > { %v1742_v45 = vsel %vm1727_vm4, %v1741_v26, %v1740_v41  ;;  %v1404_v48 = vrot.slane %v6173_v46, 2  ;;  %v1405_v12 = vrot.slane %v6176_v47, 2  ;;  %v1406_v13 = vrot.slane %v6179_v55, 2 }
 0x1d2   : > { %5348 = vmatprep.subr.mxu0 %v1742_v45  ;;  %v1407_v49 = vrot.slane %v6182_v56, 2  ;;  %v1408_v36 = vrot.slane %v6185_v57, 2  ;;  %v1409_v50 = vrot.slane %v6188_v58, 2  ;;  %v1435_v35 = vmax.f32 %v1387_v32, %v1403_v10 }
 0x1d3   : > { %5349 = vmatpush3.msra.mxu0 %v1742_v45  ;;  %v1434_v2 = vmax.f32 %v1386_v60, %v1402_v15  ;;  %v1436_v14 = vmax.f32 %v1388_v61, %v1404_v48  ;;  %v1437_v37 = vmax.f32 %v1389_v27, %v1405_v12  ;;  %v1438_v7 = vmax.f32 %v1390_v5, %v1406_v13 }
 0x1d4   : > { %v1439_v38 = vmax.f32 %v1391_v28, %v1407_v49  ;;  %v1440_v22 = vmax.f32 %v1392_v33, %v1408_v36  ;;  %v1441_v39 = vmax.f32 %v1393_v44, %v1409_v50  ;;  %v1451_v40 = vrot.slane %v6170_v54, 3 }
 0x1d5   : > { %v1450_v6 = vrot.slane %v6167_v53, 3  ;;  %v1452_v4 = vrot.slane %v6173_v46, 3  ;;  %v1453_v3 = vrot.slane %v6176_v47, 3  ;;  %v1454_v9 = vrot.slane %v6179_v55, 3 }
 0x1d6   : > { %v1455_v17 = vrot.slane %v6182_v56, 3  ;;  %v1456_v23 = vrot.slane %v6185_v57, 3  ;;  %v1457_v25 = vrot.slane %v6188_v58, 3  ;;  %v1483_v26 = vmax.f32 %v1435_v35, %v1451_v40 }
 0x1d7   : > { %v1482_v21 = vmax.f32 %v1434_v2, %v1450_v6  ;;  %v1484_v60 = vmax.f32 %v1436_v14, %v1452_v4  ;;  %v1485_v42 = vmax.f32 %v1437_v37, %v1453_v3  ;;  %v1486_v32 = vmax.f32 %v1438_v7, %v1454_v9 }
 0x1d8   : > { %v1487_v61 = vmax.f32 %v1439_v38, %v1455_v17  ;;  %v1488_v27 = vmax.f32 %v1440_v22, %v1456_v23  ;;  %v1489_v11 = vmax.f32 %v1441_v39, %v1457_v25  ;;  %v1499_v5 = vrot.slane %v6170_v54, 4 }
 0x1d9   : > { %v1498_v28 = vrot.slane %v6167_v53, 4  ;;  %v1500_v33 = vrot.slane %v6173_v46, 4  ;;  %v1501_v41 = vrot.slane %v6176_v47, 4  ;;  %v1502_v44 = vrot.slane %v6179_v55, 4 }
 0x1da   : > { %v1503_v15 = vrot.slane %v6182_v56, 4  ;;  %v1504_v10 = vrot.slane %v6185_v57, 4  ;;  %v1505_v45 = vrot.slane %v6188_v58, 4  ;;  %v1531_v48 = vmax.f32 %v1483_v26, %v1499_v5 }
 0x1db   : > { %v1530_v12 = vmax.f32 %v1482_v21, %v1498_v28  ;;  %v1532_v13 = vmax.f32 %v1484_v60, %v1500_v33  ;;  %v1533_v49 = vmax.f32 %v1485_v42, %v1501_v41  ;;  %v1534_v36 = vmax.f32 %v1486_v32, %v1502_v44 }
 0x1dc   : > { %v1535_v50 = vmax.f32 %v1487_v61, %v1503_v15  ;;  %v1536_v35 = vmax.f32 %v1488_v27, %v1504_v10  ;;  %v1537_v2 = vmax.f32 %v1489_v11, %v1505_v45  ;;  %v1547_v14 = vrot.slane %v6170_v54, 5 }
 0x1dd   : > { %v1546_v37 = vrot.slane %v6167_v53, 5  ;;  %v1548_v7 = vrot.slane %v6173_v46, 5  ;;  %v1549_v38 = vrot.slane %v6176_v47, 5  ;;  %v1550_v22 = vrot.slane %v6179_v55, 5 }
 0x1de   : > { %v1551_v39 = vrot.slane %v6182_v56, 5  ;;  %v1552_v40 = vrot.slane %v6185_v57, 5  ;;  %v1553_v6 = vrot.slane %v6188_v58, 5  ;;  %v1579_v4 = vmax.f32 %v1531_v48, %v1547_v14 }
 0x1df   : > { %v1578_v3 = vmax.f32 %v1530_v12, %v1546_v37  ;;  %v1580_v9 = vmax.f32 %v1532_v13, %v1548_v7  ;;  %v1581_v17 = vmax.f32 %v1533_v49, %v1549_v38  ;;  %v1582_v23 = vmax.f32 %v1534_v36, %v1550_v22 }
 0x1e0   : > { %v1583_v25 = vmax.f32 %v1535_v50, %v1551_v39  ;;  %v1584_v26 = vmax.f32 %v1536_v35, %v1552_v40  ;;  %v1585_v21 = vmax.f32 %v1537_v2, %v1553_v6  ;;  %v1595_v60 = vrot.slane %v6170_v54, 6 }
 0x1e1   : > { %v1594_v42 = vrot.slane %v6167_v53, 6  ;;  %v1596_v32 = vrot.slane %v6173_v46, 6  ;;  %v1597_v61 = vrot.slane %v6176_v47, 6  ;;  %v1598_v27 = vrot.slane %v6179_v55, 6 }
 0x1e2   : > { %v1599_v11 = vrot.slane %v6182_v56, 6  ;;  %v1600_v5 = vrot.slane %v6185_v57, 6  ;;  %v1601_v28 = vrot.slane %v6188_v58, 6  ;;  %v1627_v33 = vmax.f32 %v1579_v4, %v1595_v60 }
 0x1e3   : > { %v1626_v41 = vmax.f32 %v1578_v3, %v1594_v42  ;;  %v1628_v44 = vmax.f32 %v1580_v9, %v1596_v32  ;;  %v1629_v15 = vmax.f32 %v1581_v17, %v1597_v61  ;;  %v1630_v10 = vmax.f32 %v1582_v23, %v1598_v27  ;;  %v1691_v61 = vld [vmem:[#allocation7 + $0x8] sm:$0xff] }
 0x1e4   : > { %v1631_v45 = vmax.f32 %v1583_v25, %v1599_v11  ;;  %v1632_v48 = vmax.f32 %v1584_v26, %v1600_v5  ;;  %v1633_v12 = vmax.f32 %v1585_v21, %v1601_v28  ;;  %v1643_v13 = vrot.slane %v6170_v54, 7 }
 0x1e5   : > { %v1642_v49 = vrot.slane %v6167_v53, 7  ;;  %v1644_v36 = vrot.slane %v6173_v46, 7  ;;  %v1645_v50 = vrot.slane %v6176_v47, 7  ;;  %v1646_v35 = vrot.slane %v6179_v55, 7 }
 0x1e6   : > { %v1647_v2 = vrot.slane %v6182_v56, 7  ;;  %v1648_v14 = vrot.slane %v6185_v57, 7  ;;  %v1649_v37 = vrot.slane %v6188_v58, 7  ;;  %v1675_v7 = vmax.f32 %v1627_v33, %v1643_v13 }
 0x1e7   : > { %v1674_v38 = vmax.f32 %v1626_v41, %v1642_v49  ;;  %v1676_v22 = vmax.f32 %v1628_v44, %v1644_v36  ;;  %v1677_v39 = vmax.f32 %v1629_v15, %v1645_v50  ;;  %v1678_v40 = vmax.f32 %v1630_v10, %v1646_v35  ;;  %v8000_v41 = vld [vmem:[#allocation30_spill] sm:$0xff]  ;;  %v8001_v44 = vld [vmem:[#allocation31_spill] sm:$0xff]  ;;  %v3267_v50 = vld [vmem:[#allocation10] sm:$0xff] }
 0x1e8   : > { %v1679_v54 = vmax.f32 %v1631_v45, %v1647_v2  ;;  %v1680_v6 = vmax.f32 %v1632_v48, %v1648_v14  ;;  %v1708_v53 = vrot.slane %v1675_v7, 7  ;;  %v2030_v46 = vcombine.high %v6263_v52, %v6266_v59  ;;  %5359 = vmatprep.mubr.msk.f32.mxu1 %vm1745_vm13, %v3267_v50 }
 0x1e9   : > { %v1711_v47 = vrot.slane %v1676_v22, 6  ;;  %v1681_v4 = vmax.f32 %v1633_v12, %v1649_v37  ;;  %v1714_v56 = vrot.slane %v1677_v39, 5  ;;  %v1717_v3 = vrot.slane %v1678_v40, 4  ;;  %v8002_v12 = vld [vmem:[#allocation26_spill] sm:$0xff] }
 0x1ea   : > { %v1710_v55 = vsel %vm1709_vm14, %v1708_v53, %v1674_v38  ;;  %v2062_v58 = vcombine.high %v6271_v62, %v6274_v63  ;;  %v1894_v9 = vcombine.high %v6203_v16, %v6206_v18  ;;  %v1926_v17 = vcombine.high %v6209_v19, %v6212_v20 }
 0x1eb   : > { %v1713_v57 = vsel %vm1712_vm15, %v1711_v47, %v1710_v55  ;;  %v1720_v52 = vrot.slane %v1679_v54, 3  ;;  %v1723_v59 = vrot.slane %v1680_v6, 2  ;;  %v2044_v25 = vrot.slane %v2030_v46, %v6083_v51 }
 0x1ec   : > { %v1716_v23 = vsel %vm1715_vm0, %v1714_v56, %v1713_v57  ;;  %v2076_v21 = vrot.slane %v2062_v58, %v6083_v51  ;;  %v2046_v60 = vcombine.high %v6277_v0, %v6280_v1  ;;  %v2078_v62 = vcombine.high %v6296_v24, %v6304_v8  ;;  %v8003_v57 = vld [vmem:[#allocation27_spill] sm:$0xff] }
 0x1ed   : > { %v1719_v26 = vsel %vm1718_vm1, %v1717_v3, %v1716_v23  ;;  %v1726_v18 = vrot.slane %v1681_v4, 1  ;;  %v1908_v20 = vrot.slane %v1894_v9, %v6083_v51  ;;  %v1940_v63 = vrot.slane %v1926_v17, %v6083_v51 }
 0x1ee   : > { %v1722_v16 = vsel %vm1721_vm2, %v1720_v52, %v1719_v26  ;;  %v1910_v42 = vcombine.high %v6308_v29, %v6311_v30  ;;  %v2096_v0 = vcombine.high %v2044_v25, %v2076_v21  ;;  %v2060_v1 = vrot.slane %v2046_v60, %v6083_v51 }
 0x1ef   : > { %v1725_v19 = vsel %vm1724_vm3, %v1723_v59, %v1722_v16  ;;  %v2092_v24 = vrot.slane %v2078_v62, %v6083_v51  ;;  %v1942_v8 = vcombine.high %v6314_v31, %v6323_v43  ;;  %v2095_v27 = vcombine.low %v2044_v25, %v2076_v21 }
 0x1f0   : > { %v1728_v32 = vsel %vm1727_vm4, %v1726_v18, %v1725_v19  ;;  %v1960_v11 = vcombine.high %v1908_v20, %v1940_v63  ;;  %v1924_v29 = vrot.slane %v1910_v42, %v6083_v51  ;;  %v1959_v5 = vcombine.low %v1908_v20, %v1940_v63 }
 0x1f1   : > { %5350 = vmatprep.subr.mxu0 %v1728_v32  ;;  %v1956_v30 = vrot.slane %v1942_v8, %v6083_v51  ;;  %v2100_v28 = vcombine.high %v2060_v1, %v2092_v24  ;;  %v2099_v33 = vcombine.low %v2060_v1, %v2092_v24 }
 0x1f2   : > { %5351 = vmatpush3.msra.mxu0 %v1728_v32 }
 0x1f3   : > { %5353 = vmatmul.mubr.msk.f32.vlgmr.msra.gmra.mxu0 %vm1745_vm13, %v1691_v61  ;;  %2212 = vmatprep.subr.mxu0 %v2096_v0  ;;  %v1964_v31 = vcombine.high %v1924_v29, %v1956_v30  ;;  %v1963_v43 = vcombine.low %v1924_v29, %v1956_v30 }
 0x1f4   : > { %2213 = vmatpush1.msra.mxu0 %v2095_v27  ;;  %2248 = vmatprep.mubr.f32.mxu0 %v7999_v34 }
 0x1f5   : > { %2214 = vmatprep.subr.mxu0 %v1960_v11 }
 0x1f6   : > { %2215 = vmatpush1.msra.mxu0 %v1959_v5 }
 0x1f7   : > { %5309 = vmatmul.mubr.msk.f32.vlgmr.msra.gmra.mxu0 %vm1745_vm13, %v8000_v41  ;;  %2366 = vmatprep.subr.mxu0 %v2100_v28  ;;  %v8004_v28 = vld [vmem:[#allocation28_spill] sm:$0xff] }
 0x1f8   : > { %2367 = vmatpush1.msra.mxu0 %v2099_v33  ;;  %2254 = vmatprep.mubr.f32.mxu0 %v7999_v34 }
 0x1f9   : > { %2368 = vmatprep.subr.mxu0 %v1964_v31 }
 0x1fa   : > { %2369 = vmatpush1.msra.mxu0 %v1963_v43 }
 0x1fb   : > { %5310 = vmatmul.mubr.msk.f32.gmra.mxu0 %vm1745_vm13, %v8001_v44 }
 0x1fc   : > { %2402 = vmatprep.mubr.f32.mxu0 %v7999_v34 }
 0x1ff   : > { %5313 = vmatmul.mubr.msk.f32.vlgmr.msra.gmra.mxu0 %vm1745_vm13, %v8000_v41 }
 0x200   : > { %2408 = vmatprep.mubr.f32.mxu0 %v7999_v34 }
 0x203   : > { %5314 = vmatmul.mubr.msk.f32.gmra.mxu0 %vm1745_vm13, %v8001_v44 }
 0x204   : > { %3740 = vmatprep.mubr.f32.mxu0 %v7999_v34 }
 0x270   : > { %v2173_v15 = vpop.f32.mrf.mxu1 }
 0x272   : > { %v6531_v10 = vpop.f32.mrf.mxu1 }
 0x275   : > { %v6534_v36 = vpop.f32.mrf.mxu1 }
 0x277   : > { %v2181_v4 = vpop.f32.mrf.mxu1 }
 0x279   : > { %v2327_v19 = vpop.f32.mrf.mxu1 }
 0x27b   : > { %v2329_v43 = vpop.f32.mrf.mxu1 }
 0x2b3   : > { %v5354_v45 = vpop.f32.mrf.mxu0 }
 0x2b4   : > { %v2738_v48 = vcombine.high %v5354_v45, %v5354_v45  ;;  %v2745_v13 = vrot.slane %v5354_v45, %v8002_v12 }
 0x2b5   : > { %v1818_v49 = vpop.f32.mrf.mxu0 }
 0x2b6   : > { %v2752_v35 = vrot.slane %v2738_v48, %v8002_v12  ;;  %v2753_v2 = vcombine.high %v2745_v13, %v2745_v13  ;;  %v6538_v14 = vrot.slane %v2745_v13, %v8002_v12  ;;  %v2689_v37 = vcombine.high %v1818_v49, %v1818_v49 }
 0x2b7   : > { %v2696_v7 = vrot.slane %v1818_v49, %v8002_v12  ;;  %v2250_v38 = vpop.f32.mrf.mxu0 }
 0x2b8   : > { %v2754_v22 = vcombine.high %v2752_v35, %v2752_v35  ;;  %v6543_v39 = vrot.slane %v2752_v35, %v8002_v12  ;;  %v6546_v40 = vrot.slane %v2753_v2, %v8002_v12  ;;  %v2783_v54 = vcombine.high %v6538_v14, %v6538_v14 }
 0x2b9   : > { %v2703_v6 = vrot.slane %v2689_v37, %v8002_v12  ;;  %v2704_v53 = vcombine.high %v2696_v7, %v2696_v7  ;;  %v6552_v46 = vrot.slane %v2696_v7, %v8002_v12  ;;  %v2252_v47 = vpop.f32.mrf.mxu0  ;;  %v2822_v58 = vrot.slane %v6538_v14, %v8003_v57 }
 0x2ba   : > { %v6555_v55 = vrot.slane %v2754_v22, %v8002_v12  ;;  %v2784_v56 = vcombine.high %v6543_v39, %v6543_v39  ;;  %v2785_v3 = vcombine.high %v6546_v40, %v6546_v40  ;;  %v2826_v59 = vrot.slane %v6546_v40, %v8003_v57 }
 0x2bb   : > { %v2705_v9 = vcombine.high %v2703_v6, %v2703_v6  ;;  %v6564_v17 = vrot.slane %v2703_v6, %v8002_v12  ;;  %v2256_v23 = vpop.f32.mrf.mxu0  ;;  %v6571_v25 = vrot.slane %v2783_v54, %v8003_v57  ;;  %v2838_v26 = vrot.slane %v6543_v39, %v8003_v57 }
 0x2bc   : > { %v2786_v52 = vcombine.high %v6555_v55, %v6555_v55  ;;  %v6576_v21 = vrot.slane %v2785_v3, %v8003_v57  ;;  %v6579_v60 = vrot.slane %v2704_v53, %v8002_v12  ;;  %v2734_v16 = vcombine.high %v6552_v46, %v6552_v46 }
 0x2bd   : > { %v6582_v62 = vrot.slane %v2705_v9, %v8002_v12  ;;  %v2258_v18 = vpop.f32.mrf.mxu0  ;;  %v2842_v20 = vrot.slane %v6555_v55, %v8003_v57  ;;  %v6589_v63 = vrot.slane %v2784_v56, %v8003_v57  ;;  %v2735_v42 = vcombine.high %v6564_v17, %v6564_v17 }
 0x2be   : > { %v2415_v32 = vcombine.low %v2173_v15, %v2250_v38  ;;  %v6594_v61 = vrot.slane %v2786_v52, %v8003_v57  ;;  %v2736_v0 = vcombine.high %v6579_v60, %v6579_v60  ;;  %v2790_v1 = vrot.slane %v6552_v46, %v8003_v57 }
 0x2bf   : > { %v2806_v24 = vrot.slane %v6564_v17, %v8003_v57  ;;  %v2404_v8 = vpop.f32.mrf.mxu0  ;;  %v2737_v27 = vcombine.high %v6582_v62, %v6582_v62  ;;  %v2794_v11 = vrot.slane %v6579_v60, %v8003_v57  ;;  %v6607_v29 = vrot.slane %v2734_v16, %v8003_v57 }
 0x2c0   : > { %v2416_v30 = vcombine.high %v2173_v15, %v2250_v38  ;;  %v2810_v5 = vrot.slane %v6582_v62, %v8003_v57  ;;  %v2423_v33 = vrot.slane %v2415_v32, %v8004_v28  ;;  %v2431_v41 = vcombine.low %v6531_v10, %v2252_v47 }
 0x2c1   : > { %v2432_v31 = vcombine.high %v6531_v10, %v2252_v47  ;;  %v2406_v44 = vpop.f32.mrf.mxu0  ;;  %v2551_v48 = vcombine.low %v6534_v36, %v2256_v23  ;;  %v2552_v13 = vcombine.high %v6534_v36, %v2256_v23  ;;  %v2567_v49 = vcombine.low %v2181_v4, %v2258_v18  ;;  %v2333_v47 = vpop.f32.mrf.mxu1 }
 0x2c2   : > { %v2430_v45 = vrot.slane %v2416_v30, %v8004_v28  ;;  %v2439_v15 = vrot.slane %v2431_v41, %v8004_v28  ;;  %v2568_v35 = vcombine.high %v2181_v4, %v2258_v18  ;;  %v2447_v2 = vcombine.low %v2327_v19, %v2404_v8 }
 0x2c3   : > { %v2446_v50 = vrot.slane %v2432_v31, %v8004_v28  ;;  %v2410_v37 = vpop.f32.mrf.mxu0  ;;  %v6620_v7 = vrot.slane %v2736_v0, %v8003_v57  ;;  %v6623_v10 = vrot.slane %v2735_v42, %v8003_v57  ;;  %v2559_v38 = vrot.slane %v2551_v48, %v8004_v28  ;;  %v2335_v48 = vpop.f32.mrf.mxu1 }
 0x2c4   : > { %v2575_v22 = vrot.slane %v2567_v49, %v8004_v28  ;;  %v2479_v54 = vcombine.low %v2423_v33, %v2439_v15  ;;  %v2480_v36 = vcombine.high %v2423_v33, %v2439_v15  ;;  %v2566_v56 = vrot.slane %v2552_v13, %v8004_v28 }
 0x2c5   : > { %v2495_v6 = vcombine.low %v2430_v45, %v2446_v50  ;;  %v2496_v53 = vcombine.high %v2430_v45, %v2446_v50  ;;  %v2582_v4 = vrot.slane %v2568_v35, %v8004_v28  ;;  %v2818_v23 = vrot.slane %v2737_v27, %v8003_v57  ;;  %v2412_v42 = vpop.f32.mrf.mxu0 }
 0x2c6   : > { %v2615_v3 = vcombine.low %v2559_v38, %v2575_v22  ;;  %v2616_v9 = vcombine.high %v2559_v38, %v2575_v22  ;;  %v2487_v52 = vrot.slane %v2479_v54, %v6083_v51  ;;  %v2448_v16 = vcombine.high %v2327_v19, %v2404_v8 }
 0x2c7   : > { %v2455_v18 = vrot.slane %v2447_v2, %v8004_v28  ;;  %v2494_v32 = vrot.slane %v2480_v36, %v6083_v51  ;;  %v2503_v0 = vrot.slane %v2495_v6, %v6083_v51  ;;  %v2631_v30 = vcombine.low %v2566_v56, %v2582_v4 }
 0x2c8   : > { %v2632_v33 = vcombine.high %v2566_v56, %v2582_v4  ;;  %v2510_v41 = vrot.slane %v2496_v53, %v6083_v51  ;;  %v2463_v31 = vcombine.low %v2329_v43, %v2406_v44  ;;  %v2464_v45 = vcombine.high %v2329_v43, %v2406_v44 }
 0x2c9   : > { %v2583_v13 = vcombine.low %v2333_v47, %v2410_v37  ;;  %v6636_v27 = vrot.slane %v2615_v3, %v6083_v51  ;;  %v6639_v19 = vrot.slane %v2616_v9, %v6083_v51  ;;  %v2584_v8 = vcombine.high %v2333_v47, %v2410_v37 }
 0x2ca   : > { %v2599_v49 = vcombine.low %v2335_v48, %v2412_v42  ;;  %v2462_v15 = vrot.slane %v2448_v16, %v8004_v28  ;;  %v2471_v50 = vrot.slane %v2463_v31, %v8004_v28  ;;  %v2478_v35 = vrot.slane %v2464_v45, %v8004_v28 }
 0x2cb   : > { %v2600_v2 = vcombine.high %v2335_v48, %v2412_v42  ;;  %v6645_v38 = vrot.slane %v2631_v30, %v6083_v51  ;;  %v6648_v43 = vrot.slane %v2632_v33, %v6083_v51  ;;  %v2591_v44 = vrot.slane %v2583_v13, %v8004_v28 }
 0x2cc   : > { %v2607_v22 = vrot.slane %v2599_v49, %v8004_v28  ;;  %v2511_v54 = vcombine.low %v2455_v18, %v2471_v50  ;;  %v2512_v37 = vcombine.high %v2455_v18, %v2471_v50  ;;  %v2527_v36 = vcombine.low %v2462_v15, %v2478_v35 }
 0x2cd   : > { %v2528_v6 = vcombine.high %v2462_v15, %v2478_v35  ;;  %v2598_v53 = vrot.slane %v2584_v8, %v8004_v28  ;;  %v2614_v47 = vrot.slane %v2600_v2, %v8004_v28 }
 0x2ce   : > { %v2647_v56 = vcombine.low %v2591_v44, %v2607_v22  ;;  %v2648_v4 = vcombine.high %v2591_v44, %v2607_v22  ;;  %v2519_v3 = vrot.slane %v2511_v54, %v6083_v51  ;;  %v2526_v9 = vrot.slane %v2512_v37, %v6083_v51 }
 0x2cf   : > { %v2535_v16 = vrot.slane %v2527_v36, %v6083_v51  ;;  %v2542_v42 = vrot.slane %v2528_v6, %v6083_v51  ;;  %v2663_v33 = vcombine.low %v2598_v53, %v2614_v47  ;;  %v2664_v31 = vcombine.high %v2598_v53, %v2614_v47 }
 0x2d0   : > { %v2655_v30 = vrot.slane %v2647_v56, %v6083_v51  ;;  %v2662_v18 = vrot.slane %v2648_v4, %v6083_v51  ;;  %v2543_v45 = vcombine.low %v2487_v52, %v2519_v3  ;;  %v2544_v48 = vcombine.high %v2487_v52, %v2519_v3 }
 0x2d1   : > { %v2545_v13 = vcombine.low %v2494_v32, %v2526_v9  ;;  %v2546_v8 = vcombine.high %v2494_v32, %v2526_v9  ;;  %v2547_v49 = vcombine.low %v2503_v0, %v2535_v16  ;;  %v2548_v15 = vcombine.high %v2503_v0, %v2535_v16 }
 0x2d2   : > { %v2549_v50 = vcombine.low %v2510_v41, %v2542_v42  ;;  %v2550_v35 = vcombine.high %v2510_v41, %v2542_v42  ;;  %v2867_v2 = vadd.f32 %v2790_v1, %v2543_v45  ;;  %v2868_v44 = vadd.f32 %v2794_v11, %v2544_v48 }
 0x2d3   : > { %v2869_v22 = vadd.f32 %v6607_v29, %v2545_v13  ;;  %v2870_v54 = vadd.f32 %v6620_v7, %v2546_v8  ;;  %v2871_v52 = vadd.f32 %v2806_v24, %v2547_v49  ;;  %v2872_v32 = vadd.f32 %v2810_v5, %v2548_v15  ;;  %v8005_v7 = vld [vmem:[#allocation29_spill] sm:$0xff] }
 0x2d4   : > { %v2873_v0 = vadd.f32 %v6623_v10, %v2549_v50  ;;  %v2874_v46 = vadd.f32 %v2818_v23, %v2550_v35  ;;  %v2883_v1 = vmax.f32 %v2867_v2, 0.0  ;;  %v2884_v41 = vmax.f32 %v2868_v44, 0.0 }
 0x2d5   : > { %v2885_v37 = vmax.f32 %v2869_v22, 0.0  ;;  %v2886_v60 = vmax.f32 %v2870_v54, 0.0  ;;  %v2887_v11 = vmax.f32 %v2871_v52, 0.0  ;;  %v2888_v36 = vmax.f32 %v2872_v32, 0.0 }
 0x2d6   : > { %v2889_v29 = vmax.f32 %v2873_v0, 0.0  ;;  %v2890_v6 = vmax.f32 %v2874_v46, 0.0  ;;  %v6676_v53 = vmul.f32 %v2883_v1, %v8005_v7  ;;  %v6679_v17 = vmul.f32 %v2884_v41, %v8005_v7 }
 0x2d7   : > { %v6682_v62 = vmul.f32 %v2885_v37, %v8005_v7  ;;  %v6685_v24 = vmul.f32 %v2886_v60, %v8005_v7  ;;  %v6688_v5 = vmul.f32 %v2887_v11, %v8005_v7  ;;  %v6691_v10 = vmul.f32 %v2888_v36, %v8005_v7 }
 0x2d8   : > { %v6694_v23 = vmul.f32 %v2889_v29, %v8005_v7  ;;  %v6697_v47 = vmul.f32 %v2890_v6, %v8005_v7  ;;  %v2671_v56 = vrot.slane %v2663_v33, %v6083_v51  ;;  %v2678_v4 = vrot.slane %v2664_v31, %v6083_v51 }
 0x2d9   : > { %v2679_v3 = vcombine.low %v6636_v27, %v2655_v30  ;;  %v2680_v9 = vcombine.high %v6636_v27, %v2655_v30  ;;  %v2681_v16 = vcombine.low %v6639_v19, %v2662_v18  ;;  %v2682_v42 = vcombine.high %v6639_v19, %v2662_v18 }
 0x2da   : > { %v3398_v45 = vcombine.low %v6676_v53, %v6682_v62  ;;  %v3414_v48 = vcombine.low %v6679_v17, %v6685_v24  ;;  %v2683_v13 = vcombine.low %v6645_v38, %v2671_v56  ;;  %v2684_v33 = vcombine.high %v6645_v38, %v2671_v56 }
 0x2db   : > { %v2685_v31 = vcombine.low %v6648_v43, %v2678_v4  ;;  %v2686_v8 = vcombine.high %v6648_v43, %v2678_v4  ;;  %v2875_v27 = vadd.f32 %v2822_v58, %v2679_v3  ;;  %v2876_v19 = vadd.f32 %v2826_v59, %v2680_v9 }
 0x2dc   : > { %v2877_v30 = vadd.f32 %v6571_v25, %v2681_v16  ;;  %v2878_v18 = vadd.f32 %v6576_v21, %v2682_v42  ;;  %v2879_v38 = vadd.f32 %v2838_v26, %v2683_v13  ;;  %v2880_v43 = vadd.f32 %v2842_v20, %v2684_v33 }
 0x2dd   : > { %v2881_v49 = vadd.f32 %v6589_v63, %v2685_v31  ;;  %v2882_v14 = vadd.f32 %v6594_v61, %v2686_v8  ;;  %v2891_v58 = vmax.f32 %v2875_v27, 0.0  ;;  %v2892_v15 = vmax.f32 %v2876_v19, 0.0 }
 0x2de   : > { %v2893_v40 = vmax.f32 %v2877_v30, 0.0  ;;  %v2894_v59 = vmax.f32 %v2878_v18, 0.0  ;;  %v2895_v50 = vmax.f32 %v2879_v38, 0.0  ;;  %v2896_v25 = vmax.f32 %v2880_v43, 0.0 }
 0x2df   : > { %v2897_v35 = vmax.f32 %v2881_v49, 0.0  ;;  %v2898_v21 = vmax.f32 %v2882_v14, 0.0  ;;  %v6730_v2 = vmul.f32 %v2891_v58, %v8005_v7  ;;  %v6733_v39 = vmul.f32 %v2892_v15, %v8005_v7 }
 0x2e0   : > { %v6736_v55 = vmul.f32 %v2893_v40, %v8005_v7  ;;  %v6739_v26 = vmul.f32 %v2894_v59, %v8005_v7  ;;  %v6742_v20 = vmul.f32 %v2895_v50, %v8005_v7  ;;  %v6745_v63 = vmul.f32 %v2896_v25, %v8005_v7 }
 0x2e1   : > { %v6748_v61 = vmul.f32 %v2897_v35, %v8005_v7  ;;  %v6751_v44 = vmul.f32 %v2898_v21, %v8005_v7  ;;  %v6758_v52 = vrot.slane %v3398_v45, %v8004_v28  ;;  %v6761_v32 = vrot.slane %v3414_v48, %v8004_v28 }
 0x2e2   : > { %v3534_v22 = vcombine.low %v6730_v2, %v6736_v55  ;;  %v3550_v54 = vcombine.low %v6733_v39, %v6739_v26  ;;  %v3430_v1 = vcombine.low %v6688_v5, %v6694_v23  ;;  %v3446_v41 = vcombine.low %v6691_v10, %v6697_v47 }
 0x2e3   : > { %v3566_v0 = vcombine.low %v6742_v20, %v6748_v61  ;;  %v3582_v46 = vcombine.low %v6745_v63, %v6751_v44  ;;  %v3462_v11 = vcombine.low %v6758_v52, %v6761_v32  ;;  %v3535_v36 = vcombine.high %v6730_v2, %v6736_v55 }
 0x2e4   : > { %v6772_v37 = vrot.slane %v3534_v22, %v8004_v28  ;;  %v6775_v60 = vrot.slane %v3550_v54, %v8004_v28  ;;  %v6788_v56 = vrot.slane %v3430_v1, %v8004_v28  ;;  %v6791_v4 = vrot.slane %v3446_v41, %v8004_v28 }
 0x2e5   : > { %v6782_v29 = vrot.slane %v3566_v0, %v8004_v28  ;;  %v6785_v6 = vrot.slane %v3582_v46, %v8004_v28  ;;  %v3470_v9 = vrot.slane %v3462_v11, %v6083_v51  ;;  %v6797_v16 = vrot.slane %v3535_v36, %v8004_v28  ;;  %v6849_v36 = vld [vmem:[#allocation8] sm:$0xff] }
 0x2e6   : > { %v3598_v3 = vcombine.low %v6772_v37, %v6775_v60  ;;  %v3551_v42 = vcombine.high %v6733_v39, %v6739_v26  ;;  %v3494_v48 = vcombine.low %v6788_v56, %v6791_v4  ;;  %v3567_v13 = vcombine.high %v6742_v20, %v6748_v61 }
 0x2e7   : > { %v3630_v45 = vcombine.low %v6782_v29, %v6785_v6  ;;  %v3583_v33 = vcombine.high %v6745_v63, %v6751_v44  ;;  %v3399_v27 = vcombine.high %v6676_v53, %v6682_v62  ;;  %v3415_v19 = vcombine.high %v6679_v17, %v6685_v24 }
 0x2e8   : > { %v3606_v31 = vrot.slane %v3598_v3, %v6083_v51  ;;  %v6811_v8 = vrot.slane %v3551_v42, %v8004_v28  ;;  %v3502_v18 = vrot.slane %v3494_v48, %v6083_v51  ;;  %v6820_v38 = vrot.slane %v3567_v13, %v8004_v28 }
 0x2e9   : > { %v3638_v30 = vrot.slane %v3630_v45, %v6083_v51  ;;  %v6823_v43 = vrot.slane %v3583_v33, %v8004_v28  ;;  %v6828_v14 = vrot.slane %v3399_v27, %v8004_v28  ;;  %v6831_v58 = vrot.slane %v3415_v19, %v8004_v28 }
 0x2ea   : > { %v3614_v49 = vcombine.low %v6797_v16, %v6811_v8  ;;  %v3431_v15 = vcombine.high %v6688_v5, %v6694_v23  ;;  %v3527_v50 = vcombine.high %v3470_v9, %v3502_v18  ;;  %v3526_v25 = vcombine.low %v3470_v9, %v3502_v18 }
 0x2eb   : > { %v3663_v40 = vcombine.high %v3606_v31, %v3638_v30  ;;  %v3662_v59 = vcombine.low %v3606_v31, %v3638_v30  ;;  %v3646_v21 = vcombine.low %v6820_v38, %v6823_v43  ;;  %v3447_v54 = vcombine.high %v6691_v10, %v6697_v47 }
 0x2ec   : > { %v3622_v35 = vrot.slane %v3614_v49, %v6083_v51  ;;  %v6839_v22 = vrot.slane %v3431_v15, %v8004_v28  ;;  %v3478_v0 = vcombine.low %v6828_v14, %v6831_v58  ;;  %v2939_v46 = vrot.slane %v6730_v2, 1 }
 0x2ed   : > { %3704 = vmatprep.subr.mxu0 %v3663_v40  ;;  %v2940_v1 = vrot.slane %v6733_v39, 1  ;;  %v2941_v41 = vrot.slane %v6736_v55, 1  ;;  %v3654_v11 = vrot.slane %v3646_v21, %v6083_v51  ;;  %v6852_v3 = vrot.slane %v3447_v54, %v8004_v28 }
 0x2ee   : > { %8006 = vst [vmem:[#allocation30_spill] sm:$0xff] %v6839_v22  ;;  %3705 = vmatpush1.msra.mxu0 %v3662_v59  ;;  %v2942_v9 = vrot.slane %v6739_v26, 1  ;;  %v2943_v42 = vrot.slane %v6742_v20, 1  ;;  %v2944_v45 = vrot.slane %v6745_v63, 1  ;;  %v2945_v48 = vrot.slane %v6748_v61, 1 }
 0x2ef   : > { %3706 = vmatprep.subr.mxu0 %v3527_v50  ;;  %v2946_v13 = vrot.slane %v6751_v44, 1  ;;  %v3667_v33 = vcombine.high %v3622_v35, %v3654_v11  ;;  %v3666_v31 = vcombine.low %v3622_v35, %v3654_v11  ;;  %v3486_v27 = vrot.slane %v3478_v0, %v6083_v51  ;;  %v6872_v35 = vld [vmem:[#allocation8 + $0x8] sm:$0xff] }
 0x2f0   : > { %3707 = vmatpush1.msra.mxu0 %v3526_v25  ;;  %v3510_v19 = vcombine.low %v6839_v22, %v6852_v3  ;;  %v2971_v30 = vmax.f32 %v6730_v2, %v2939_v46  ;;  %v2972_v18 = vmax.f32 %v6733_v39, %v2940_v1  ;;  %v2973_v49 = vmax.f32 %v6736_v55, %v2941_v41 }
 0x2f1   : > { %5317 = vmatmul.mubr.msk.f32.vlgmr.msra.gmra.mxu0 %vm1745_vm13, %v6849_v36  ;;  %v2974_v15 = vmax.f32 %v6739_v26, %v2942_v9  ;;  %3858 = vmatprep.subr.mxu0 %v3667_v33  ;;  %v2975_v59 = vmax.f32 %v6742_v20, %v2943_v42  ;;  %v2976_v50 = vmax.f32 %v6745_v63, %v2944_v45  ;;  %v2987_v54 = vrot.slane %v6730_v2, 2 }
 0x2f2   : > { %v3518_v40 = vrot.slane %v3510_v19, %v6083_v51  ;;  %v2977_v25 = vmax.f32 %v6748_v61, %v2945_v48  ;;  %8007 = vst [vmem:[#allocation31_spill] sm:$0xff] %v6872_v35  ;;  %3859 = vmatpush1.msra.mxu0 %v3666_v31  ;;  %v2978_v21 = vmax.f32 %v6751_v44, %v2946_v13  ;;  %v2988_v0 = vrot.slane %v6733_v39, 2 }
 0x2f3   : > { %v2989_v46 = vrot.slane %v6736_v55, 2  ;;  %3746 = vmatprep.mubr.f32.mxu0 %v7999_v34  ;;  %v2990_v41 = vrot.slane %v6739_v26, 2  ;;  %v2991_v11 = vrot.slane %v6742_v20, 2  ;;  %v2992_v9 = vrot.slane %v6745_v63, 2 }
 0x2f4   : > { %v3531_v1 = vcombine.high %v3486_v27, %v3518_v40  ;;  %v3530_v42 = vcombine.low %v3486_v27, %v3518_v40  ;;  %v2993_v45 = vrot.slane %v6748_v61, 2  ;;  %v2994_v48 = vrot.slane %v6751_v44, 2 }
 0x2f5   : > { %v3020_v13 = vmax.f32 %v2972_v18, %v2988_v0  ;;  %5318 = vmatmul.mubr.msk.f32.gmra.mxu0 %vm1745_vm13, %v6872_v35  ;;  %v3021_v33 = vmax.f32 %v2973_v49, %v2989_v46  ;;  %v3022_v31 = vmax.f32 %v2974_v15, %v2990_v41  ;;  %v3023_v19 = vmax.f32 %v2975_v59, %v2991_v11 }
 0x2f6   : > { %3860 = vmatprep.subr.mxu0 %v3531_v1  ;;  %v3024_v7 = vmax.f32 %v2976_v50, %v2992_v9  ;;  %v3019_v28 = vmax.f32 %v2971_v30, %v2987_v54  ;;  %v3025_v12 = vmax.f32 %v2977_v25, %v2993_v45  ;;  %v3026_v57 = vmax.f32 %v2978_v21, %v2994_v48 }
 0x2f7   : > { %3861 = vmatpush1.msra.mxu0 %v3530_v42  ;;  %v3036_v22 = vrot.slane %v6733_v39, 3  ;;  %3894 = vmatprep.mubr.f32.mxu0 %v7999_v34  ;;  %v3037_v27 = vrot.slane %v6736_v55, 3  ;;  %v3038_v18 = vrot.slane %v6739_v26, 3  ;;  %v3039_v40 = vrot.slane %v6742_v20, 3 }
 0x2f8   : > { %v3040_v0 = vrot.slane %v6745_v63, 3  ;;  %5362 = vmatprep.subr.mxu0 %v7999_v34  ;;  %v3035_v49 = vrot.slane %v6730_v2, 3  ;;  %v3041_v30 = vrot.slane %v6748_v61, 3  ;;  %v3042_v15 = vrot.slane %v6751_v44, 3 }
 0x2f9   : > { %v3068_v59 = vmax.f32 %v3020_v13, %v3036_v22  ;;  %5321 = vmatmul.mubr.msk.f32.vlgmr.msra.gmra.mxu0 %vm1745_vm13, %v6849_v36  ;;  %v3069_v50 = vmax.f32 %v3021_v33, %v3037_v27  ;;  %v3070_v25 = vmax.f32 %v3022_v31, %v3038_v18  ;;  %v3071_v21 = vmax.f32 %v3023_v19, %v3039_v40 }
 0x2fa   : > { %v3072_v54 = vmax.f32 %v3024_v7, %v3040_v0  ;;  %3900 = vmatprep.mubr.f32.mxu0 %v7999_v34  ;;  %v3067_v46 = vmax.f32 %v3019_v28, %v3035_v49  ;;  %v3073_v1 = vmax.f32 %v3025_v12, %v3041_v30  ;;  %v3074_v41 = vmax.f32 %v3026_v57, %v3042_v15 }
 0x2fb   : > { %v3084_v11 = vrot.slane %v6733_v39, 4  ;;  %v3085_v9 = vrot.slane %v6736_v55, 4  ;;  %v3086_v42 = vrot.slane %v6739_v26, 4  ;;  %v3087_v22 = vrot.slane %v6742_v20, 4 }
 0x2fc   : > { %v3088_v45 = vrot.slane %v6745_v63, 4  ;;  %v3083_v48 = vrot.slane %v6730_v2, 4  ;;  %v3089_v13 = vrot.slane %v6748_v61, 4  ;;  %v3090_v7 = vrot.slane %v6751_v44, 4 }
 0x2fd   : > { %v3116_v33 = vmax.f32 %v3068_v59, %v3084_v11  ;;  %5322 = vmatmul.mubr.msk.f32.gmra.mxu0 %vm1745_vm13, %v6872_v35  ;;  %v3117_v12 = vmax.f32 %v3069_v50, %v3085_v9  ;;  %v3118_v57 = vmax.f32 %v3070_v25, %v3086_v42  ;;  %v3119_v28 = vmax.f32 %v3071_v21, %v3087_v22 }
 0x2fe   : > { %v3120_v31 = vmax.f32 %v3072_v54, %v3088_v45  ;;  %v3115_v19 = vmax.f32 %v3067_v46, %v3083_v48  ;;  %v3121_v27 = vmax.f32 %v3073_v1, %v3089_v13  ;;  %v3122_v18 = vmax.f32 %v3074_v41, %v3090_v7  ;;  %5378 = vmatprep.mubr.msk.f32.mxu0 %vm5771_vm5, %v7999_v34 }
 0x2ff   : > { %v3132_v40 = vrot.slane %v6733_v39, 5  ;;  %v3133_v0 = vrot.slane %v6736_v55, 5  ;;  %v3134_v49 = vrot.slane %v6739_v26, 5  ;;  %v3135_v30 = vrot.slane %v6742_v20, 5 }
 0x300   : > { %v3136_v15 = vrot.slane %v6745_v63, 5  ;;  %v3131_v59 = vrot.slane %v6730_v2, 5  ;;  %v3137_v50 = vrot.slane %v6748_v61, 5  ;;  %v3138_v25 = vrot.slane %v6751_v44, 5 }
 0x301   : > { %v3164_v21 = vmax.f32 %v3116_v33, %v3132_v40  ;;  %v3165_v54 = vmax.f32 %v3117_v12, %v3133_v0  ;;  %v3166_v46 = vmax.f32 %v3118_v57, %v3134_v49  ;;  %v3167_v1 = vmax.f32 %v3119_v28, %v3135_v30 }
 0x302   : > { %v3168_v41 = vmax.f32 %v3120_v31, %v3136_v15  ;;  %v3163_v11 = vmax.f32 %v3115_v19, %v3131_v59  ;;  %v3169_v9 = vmax.f32 %v3121_v27, %v3137_v50  ;;  %v3170_v42 = vmax.f32 %v3122_v18, %v3138_v25 }
 0x303   : > { %v3180_v22 = vrot.slane %v6733_v39, 6  ;;  %v3181_v45 = vrot.slane %v6736_v55, 6  ;;  %v3182_v48 = vrot.slane %v6739_v26, 6  ;;  %v3183_v13 = vrot.slane %v6742_v20, 6 }
 0x304   : > { %v3184_v7 = vrot.slane %v6745_v63, 6  ;;  %v3179_v35 = vrot.slane %v6730_v2, 6  ;;  %v3185_v33 = vrot.slane %v6748_v61, 6  ;;  %v3186_v12 = vrot.slane %v6751_v44, 6 }
 0x305   : > { %v3212_v57 = vmax.f32 %v3164_v21, %v3180_v22  ;;  %v3213_v28 = vmax.f32 %v3165_v54, %v3181_v45  ;;  %v3214_v31 = vmax.f32 %v3166_v46, %v3182_v48  ;;  %v3215_v19 = vmax.f32 %v3167_v1, %v3183_v13 }
 0x306   : > { %v3216_v27 = vmax.f32 %v3168_v41, %v3184_v7  ;;  %v3211_v18 = vmax.f32 %v3163_v11, %v3179_v35  ;;  %v3217_v40 = vmax.f32 %v3169_v9, %v3185_v33  ;;  %v3218_v0 = vmax.f32 %v3170_v42, %v3186_v12 }
 0x307   : > { %v3228_v49 = vrot.slane %v6733_v39, 7  ;;  %v3229_v30 = vrot.slane %v6736_v55, 7  ;;  %v3230_v15 = vrot.slane %v6739_v26, 7  ;;  %v3231_v59 = vrot.slane %v6742_v20, 7 }
 0x308   : > { %v3232_v50 = vrot.slane %v6745_v63, 7  ;;  %v3227_v25 = vrot.slane %v6730_v2, 7  ;;  %v3233_v21 = vrot.slane %v6748_v61, 7  ;;  %v3234_v54 = vrot.slane %v6751_v44, 7 }
 0x309   : > { %v3260_v46 = vmax.f32 %v3212_v57, %v3228_v49  ;;  %v3261_v35 = vmax.f32 %v3213_v28, %v3229_v30  ;;  %v3262_v1 = vmax.f32 %v3214_v31, %v3230_v15  ;;  %v3263_v41 = vmax.f32 %v3215_v19, %v3231_v59 }
 0x30a   : > { %v3264_v11 = vmax.f32 %v3216_v27, %v3232_v50  ;;  %v3259_v39 = vmax.f32 %v3211_v18, %v3227_v25  ;;  %v3265_v9 = vmax.f32 %v3217_v40, %v3233_v21  ;;  %v3266_v42 = vmax.f32 %v3218_v0, %v3234_v54 }
 0x30b   : > { %v3299_v55 = vrot.slane %v3260_v46, 7  ;;  %v3301_v26 = vrot.slane %v3261_v35, 6  ;;  %v3303_v22 = vrot.slane %v3262_v1, 5  ;;  %v2931_v20 = vrot.slane %v6676_v53, 1 }
 0x30c   : > { %v3305_v2 = vrot.slane %v3263_v41, 4  ;;  %v3307_v45 = vrot.slane %v3264_v11, 3  ;;  %v2932_v61 = vrot.slane %v6679_v17, 1  ;;  %v2933_v48 = vrot.slane %v6682_v62, 1 }
 0x30d   : > { %v3300_v63 = vsel %vm1709_vm14, %v3299_v55, %v3259_v39  ;;  %v2934_v13 = vrot.slane %v6685_v24, 1  ;;  %v2935_v7 = vrot.slane %v6688_v5, 1  ;;  %v3309_v12 = vrot.slane %v3265_v9, 2 }
 0x30e   : > { %v3302_v44 = vsel %vm1712_vm15, %v3301_v26, %v3300_v63  ;;  %v2936_v57 = vrot.slane %v6691_v10, 1  ;;  %v2937_v28 = vrot.slane %v6694_v23, 1  ;;  %v3311_v19 = vrot.slane %v3266_v42, 1 }
 0x30f   : > { %v3304_v33 = vsel %vm1715_vm0, %v3303_v22, %v3302_v44  ;;  %v2938_v27 = vrot.slane %v6697_v47, 1  ;;  %v2963_v18 = vmax.f32 %v6676_v53, %v2931_v20  ;;  %v2964_v0 = vmax.f32 %v6679_v17, %v2932_v61 }
 0x310   : > { %v3306_v31 = vsel %vm1718_vm1, %v3305_v2, %v3304_v33  ;;  %v2965_v49 = vmax.f32 %v6682_v62, %v2933_v48  ;;  %v2966_v30 = vmax.f32 %v6685_v24, %v2934_v13  ;;  %v2967_v59 = vmax.f32 %v6688_v5, %v2935_v7 }
 0x311   : > { %v3308_v40 = vsel %vm1721_vm2, %v3307_v45, %v3306_v31  ;;  %v2968_v50 = vmax.f32 %v6691_v10, %v2936_v57  ;;  %v2969_v25 = vmax.f32 %v6694_v23, %v2937_v28  ;;  %v2980_v54 = vrot.slane %v6679_v17, 2 }
 0x312   : > { %v3310_v15 = vsel %vm1724_vm3, %v3309_v12, %v3308_v40  ;;  %v2981_v46 = vrot.slane %v6682_v62, 2  ;;  %v2982_v35 = vrot.slane %v6685_v24, 2  ;;  %v2970_v1 = vmax.f32 %v6697_v47, %v2938_v27 }
 0x313   : > { %v3312_v21 = vsel %vm1727_vm4, %v3311_v19, %v3310_v15  ;;  %v2979_v41 = vrot.slane %v6676_v53, 2  ;;  %v2983_v11 = vrot.slane %v6688_v5, 2  ;;  %v2984_v39 = vrot.slane %v6691_v10, 2 }
 0x314   : > { %5355 = vmatprep.subr.mxu1 %v3312_v21  ;;  %v2985_v9 = vrot.slane %v6694_v23, 2  ;;  %v3012_v55 = vmax.f32 %v2964_v0, %v2980_v54  ;;  %v3013_v42 = vmax.f32 %v2965_v49, %v2981_v46  ;;  %v3014_v26 = vmax.f32 %v2966_v30, %v2982_v35 }
 0x315   : > { %5356 = vmatpush3.msra.mxu1 %v3312_v21  ;;  %v2986_v22 = vrot.slane %v6697_v47, 2  ;;  %v3011_v20 = vmax.f32 %v2963_v18, %v2979_v41  ;;  %v3015_v63 = vmax.f32 %v2967_v59, %v2983_v11  ;;  %v3016_v2 = vmax.f32 %v2968_v50, %v2984_v39 }
 0x316   : > { %v3017_v45 = vmax.f32 %v2969_v25, %v2985_v9  ;;  %v3028_v61 = vrot.slane %v6679_v17, 3  ;;  %v3029_v44 = vrot.slane %v6682_v62, 3  ;;  %v3030_v48 = vrot.slane %v6685_v24, 3 }
 0x317   : > { %v3018_v13 = vmax.f32 %v2970_v1, %v2986_v22  ;;  %v3027_v7 = vrot.slane %v6676_v53, 3  ;;  %v3031_v33 = vrot.slane %v6688_v5, 3  ;;  %v3032_v12 = vrot.slane %v6691_v10, 3 }
 0x318   : > { %v3033_v57 = vrot.slane %v6694_v23, 3  ;;  %v3060_v28 = vmax.f32 %v3012_v55, %v3028_v61  ;;  %v3061_v31 = vmax.f32 %v3013_v42, %v3029_v44  ;;  %v3062_v19 = vmax.f32 %v3014_v26, %v3030_v48 }
 0x319   : > { %v3034_v27 = vrot.slane %v6697_v47, 3  ;;  %v3059_v18 = vmax.f32 %v3011_v20, %v3027_v7  ;;  %v3063_v40 = vmax.f32 %v3015_v63, %v3031_v33  ;;  %v3064_v0 = vmax.f32 %v3016_v2, %v3032_v12 }
 0x31a   : > { %v3065_v49 = vmax.f32 %v3017_v45, %v3033_v57  ;;  %v3076_v30 = vrot.slane %v6679_v17, 4  ;;  %v3077_v15 = vrot.slane %v6682_v62, 4  ;;  %v3078_v59 = vrot.slane %v6685_v24, 4 }
 0x31b   : > { %v3066_v50 = vmax.f32 %v3018_v13, %v3034_v27  ;;  %v3075_v25 = vrot.slane %v6676_v53, 4  ;;  %v3079_v21 = vrot.slane %v6688_v5, 4  ;;  %v3080_v54 = vrot.slane %v6691_v10, 4 }
 0x31c   : > { %v3081_v46 = vrot.slane %v6694_v23, 4  ;;  %v3108_v35 = vmax.f32 %v3060_v28, %v3076_v30  ;;  %v3109_v1 = vmax.f32 %v3061_v31, %v3077_v15  ;;  %v3110_v41 = vmax.f32 %v3062_v19, %v3078_v59 }
 0x31d   : > { %v3082_v11 = vrot.slane %v6697_v47, 4  ;;  %v3107_v39 = vmax.f32 %v3059_v18, %v3075_v25  ;;  %v3111_v9 = vmax.f32 %v3063_v40, %v3079_v21  ;;  %v3112_v55 = vmax.f32 %v3064_v0, %v3080_v54 }
 0x31e   : > { %v3113_v42 = vmax.f32 %v3065_v49, %v3081_v46  ;;  %v3124_v26 = vrot.slane %v6679_v17, 5  ;;  %v3125_v22 = vrot.slane %v6682_v62, 5  ;;  %v3126_v20 = vrot.slane %v6685_v24, 5 }
 0x31f   : > { %v3114_v63 = vmax.f32 %v3066_v50, %v3082_v11  ;;  %v3123_v2 = vrot.slane %v6676_v53, 5  ;;  %v3127_v45 = vrot.slane %v6688_v5, 5  ;;  %v3128_v61 = vrot.slane %v6691_v10, 5 }
 0x320   : > { %v3129_v44 = vrot.slane %v6694_v23, 5  ;;  %v3156_v48 = vmax.f32 %v3108_v35, %v3124_v26  ;;  %v3157_v13 = vmax.f32 %v3109_v1, %v3125_v22  ;;  %v3158_v7 = vmax.f32 %v3110_v41, %v3126_v20 }
 0x321   : > { %v3130_v33 = vrot.slane %v6697_v47, 5  ;;  %v3155_v12 = vmax.f32 %v3107_v39, %v3123_v2  ;;  %v3159_v57 = vmax.f32 %v3111_v9, %v3127_v45  ;;  %v3160_v28 = vmax.f32 %v3112_v55, %v3128_v61 }
 0x322   : > { %v3161_v31 = vmax.f32 %v3113_v42, %v3129_v44  ;;  %v3172_v19 = vrot.slane %v6679_v17, 6  ;;  %v3173_v27 = vrot.slane %v6682_v62, 6  ;;  %v3174_v18 = vrot.slane %v6685_v24, 6 }
 0x323   : > { %v3162_v40 = vmax.f32 %v3114_v63, %v3130_v33  ;;  %v3171_v0 = vrot.slane %v6676_v53, 6  ;;  %v3175_v49 = vrot.slane %v6688_v5, 6  ;;  %v3176_v30 = vrot.slane %v6691_v10, 6 }
 0x324   : > { %v3177_v15 = vrot.slane %v6694_v23, 6  ;;  %v3204_v59 = vmax.f32 %v3156_v48, %v3172_v19  ;;  %v3205_v50 = vmax.f32 %v3157_v13, %v3173_v27  ;;  %v3206_v25 = vmax.f32 %v3158_v7, %v3174_v18 }
 0x325   : > { %v3178_v21 = vrot.slane %v6697_v47, 6  ;;  %v3203_v54 = vmax.f32 %v3155_v12, %v3171_v0  ;;  %v3207_v46 = vmax.f32 %v3159_v57, %v3175_v49  ;;  %v3208_v35 = vmax.f32 %v3160_v28, %v3176_v30  ;;  %v3268_v0 = vld [vmem:[#allocation10 + $0x8] sm:$0xff] }
 0x326   : > { %v3209_v1 = vmax.f32 %v3161_v31, %v3177_v15  ;;  %v3220_v41 = vrot.slane %v6679_v17, 7  ;;  %v3221_v11 = vrot.slane %v6682_v62, 7  ;;  %v3222_v39 = vrot.slane %v6685_v24, 7 }
 0x327   : > { %v3210_v9 = vmax.f32 %v3162_v40, %v3178_v21  ;;  %v3219_v55 = vrot.slane %v6676_v53, 7  ;;  %v3223_v42 = vrot.slane %v6688_v5, 7  ;;  %v3224_v26 = vrot.slane %v6691_v10, 7 }
 0x328   : > { %v3225_v22 = vrot.slane %v6694_v23, 7  ;;  %v3252_v20 = vmax.f32 %v3204_v59, %v3220_v41  ;;  %v3253_v63 = vmax.f32 %v3205_v50, %v3221_v11  ;;  %v3254_v2 = vmax.f32 %v3206_v25, %v3222_v39  ;;  %v4487_v11 = vld [vmem:[%s6022_s28 + $0x18] sm:$0xff] }
 0x329   : > { %v3226_v45 = vrot.slane %v6697_v47, 7  ;;  %v3251_v61 = vmax.f32 %v3203_v54, %v3219_v55  ;;  %v3255_v17 = vmax.f32 %v3207_v46, %v3223_v42  ;;  %v3256_v44 = vmax.f32 %v3208_v35, %v3224_v26  ;;  %v8009_v54 = vld [vmem:[#allocation31_spill] sm:$0xff]  ;;  %v8010_v35 = vld [vmem:[#allocation25_spill] sm:$0xff] }
 0x32a   : > { %v3257_v62 = vmax.f32 %v3209_v1, %v3225_v22  ;;  %v3285_v48 = vrot.slane %v3252_v20, 7  ;;  %v3287_v24 = vrot.slane %v3253_v63, 6  ;;  %v3599_v53 = vcombine.high %v6772_v37, %v6775_v60  ;;  %v4486_v26 = vld [vmem:[%s6022_s28 + $0x10] sm:$0xff] }
 0x32b   : > { %v3258_v13 = vmax.f32 %v3210_v9, %v3226_v45  ;;  %v3289_v10 = vrot.slane %v3254_v2, 5  ;;  %v3631_v23 = vcombine.high %v6782_v29, %v6785_v6  ;;  %v3291_v33 = vrot.slane %v3255_v17, 4  ;;  %v8015_v20 = vld [vmem:[#allocation27_spill] sm:$0xff] }
 0x32c   : > { %v3286_v5 = vsel %vm1709_vm14, %v3285_v48, %v3251_v61  ;;  %v3463_v47 = vcombine.high %v6758_v52, %v6761_v32  ;;  %v3495_v12 = vcombine.high %v6788_v56, %v6791_v4  ;;  %v3293_v28 = vrot.slane %v3256_v44, 3  ;;  %v7097_v48 = vld [vmem:[%s6022_s28 + $0x8] sm:$0xff] }
 0x32d   : > { %v3288_v7 = vsel %vm1712_vm15, %v3287_v24, %v3286_v5  ;;  %v3295_v37 = vrot.slane %v3257_v62, 2  ;;  %v3613_v60 = vrot.slane %v3599_v53, %v6083_v51  ;;  %v3645_v19 = vrot.slane %v3631_v23, %v6083_v51 }
 0x32e   : > { %v3290_v57 = vsel %vm1715_vm0, %v3289_v10, %v3288_v7  ;;  %v3615_v29 = vcombine.high %v6797_v16, %v6811_v8  ;;  %v3647_v6 = vcombine.high %v6820_v38, %v6823_v43  ;;  %v3297_v32 = vrot.slane %v3258_v13, 1  ;;  %v8008_v16 = vld [vmem:[#allocation30_spill] sm:$0xff] }
 0x32f   : > { %v3292_v31 = vsel %vm1718_vm1, %v3291_v33, %v3290_v57  ;;  %v3477_v4 = vrot.slane %v3463_v47, %v6083_v51  ;;  %v3509_v27 = vrot.slane %v3495_v12, %v6083_v51  ;;  %v3479_v18 = vcombine.high %v6828_v14, %v6831_v58  ;;  %v8017_v7 = vld [vmem:[#allocation26_spill] sm:$0xff] }
 0x330   : > { %v3294_v52 = vsel %vm1721_vm2, %v3293_v28, %v3292_v31  ;;  %v3511_v8 = vcombine.high %v8008_v16, %v6852_v3  ;;  %v3665_v38 = vcombine.high %v3613_v60, %v3645_v19  ;;  %v3629_v43 = vrot.slane %v3615_v29, %v6083_v51 }
 0x331   : > { %v3296_v56 = vsel %vm1724_vm3, %v3295_v37, %v3294_v52  ;;  %v3661_v49 = vrot.slane %v3647_v6, %v6083_v51  ;;  %v3664_v30 = vcombine.low %v3613_v60, %v3645_v19  ;;  %v3529_v15 = vcombine.high %v3477_v4, %v3509_v27 }
 0x332   : > { %v3298_v40 = vsel %vm1727_vm4, %v3297_v32, %v3296_v56  ;;  %v3493_v14 = vrot.slane %v3479_v18, %v6083_v51  ;;  %v3525_v58 = vrot.slane %v3511_v8, %v6083_v51  ;;  %v3528_v59 = vcombine.low %v3477_v4, %v3509_v27 }
 0x333   : > { %5357 = vmatprep.subr.mxu1 %v3298_v40  ;;  %v3669_v3 = vcombine.high %v3629_v43, %v3661_v49  ;;  %v3668_v50 = vcombine.low %v3629_v43, %v3661_v49  ;;  %v7051_v1 = vsub.s32 1, %v8010_v35  ;;  %v7054_v41 = vsub.s32 2, %v8010_v35 }
 0x334   : > { %5358 = vmatpush3.msra.mxu1 %v3298_v40  ;;  %v3533_v25 = vcombine.high %v3493_v14, %v3525_v58  ;;  %v3532_v21 = vcombine.low %v3493_v14, %v3525_v58  ;;  %v7058_v39 = vsub.s32 3, %v8010_v35  ;;  %v7064_v9 = vsub.s32 5, %v8010_v35 }
 0x335   : > { %5360 = vmatmul.mubr.msk.f32.vlgmr.msra.gmra.mxu1 %vm1745_vm13, %v3268_v0  ;;  %3781 = vmatprep.subr.mxu1 %v3665_v38  ;;  %8011 = vst [vmem:[#allocation30_spill] sm:$0xff] %v7054_v41  ;;  %v7067_v55 = vsub.s32 6, %v8010_v35  ;;  %v7070_v42 = vsub.s32 7, %v8010_v35  ;;  %v7076_v63 = vrot.slane %v4487_v11, %v8015_v20  ;;  %v7079_v2 = vrot.slane %v4487_v11, %v7051_v1 }
 0x336   : > { %3782 = vmatpush1.msra.mxu1 %v3664_v30  ;;  %3817 = vmatprep.mubr.f32.mxu1 %v7999_v34  ;;  %8012 = vst [vmem:[#allocation31_spill] sm:$0xff] %v7058_v39  ;;  %8014 = vst [vmem:[#allocation32_spill] sm:$0xff] %v7064_v9  ;;  %v7082_v45 = vrot.slane %v4487_v11, %v7054_v41  ;;  %v7085_v61 = vrot.slane %v4487_v11, %v7058_v39 }
 0x337   : > { %3783 = vmatprep.subr.mxu1 %v3529_v15  ;;  %v7091_v44 = vrot.slane %v4487_v11, %v7064_v9  ;;  %v7094_v62 = vrot.slane %v4487_v11, %v7067_v55  ;;  %v7100_v53 = vrot.slane %v4487_v11, %v7070_v42  ;;  %v7103_v13 = vrot.slane %v4486_v26, %v8015_v20 }
 0x338   : > { %3784 = vmatpush1.msra.mxu1 %v3528_v59  ;;  %v7106_v5 = vrot.slane %v4486_v26, %v7051_v1  ;;  %v7109_v10 = vrot.slane %v4486_v26, %v7054_v41  ;;  %v7113_v47 = vrot.slane %v4486_v26, %v7058_v39  ;;  %v7121_v37 = vrot.slane %v4486_v26, %v7064_v9 }
 0x339   : > { %5319 = vmatmul.mubr.msk.f32.vlgmr.msra.gmra.mxu1 %vm1745_vm13, %v6849_v36  ;;  %3935 = vmatprep.subr.mxu1 %v3669_v3  ;;  %v7124_v60 = vrot.slane %v4486_v26, %v7067_v55  ;;  %v7127_v31 = vrot.slane %v4486_v26, %v7070_v42  ;;  %v7131_v19 = vrot.slane %v7097_v48, %v8015_v20 }
 0x33a   : > { %3936 = vmatpush1.msra.mxu1 %v3668_v50  ;;  %3823 = vmatprep.mubr.f32.mxu1 %v7999_v34  ;;  %8016 = vst [vmem:[#allocation27_spill] sm:$0xff] %v7109_v10  ;;  %8018 = vst [vmem:[#allocation26_spill] sm:$0xff] %v7113_v47  ;;  %v7140_v27 = vrot.slane %v7097_v48, %v7051_v1  ;;  %v7144_v18 = vrot.slane %v7097_v48, %v7054_v41 }
 0x33b   : > { %3937 = vmatprep.subr.mxu1 %v3533_v25  ;;  %8020 = vst [vmem:[#allocation34_spill] sm:$0xff] %v7121_v37  ;;  %8021 = vst [vmem:[#allocation35_spill] sm:$0xff] %v7124_v60  ;;  %v7148_v40 = vrot.slane %v7097_v48, %v7058_v39  ;;  %v7175_v25 = vrot.slane %v7097_v48, %v7064_v9 }
 0x33c   : > { %3938 = vmatpush1.msra.mxu1 %v3532_v21  ;;  %8022 = vst [vmem:[#allocation36_spill] sm:$0xff] %v7127_v31  ;;  %8023 = vst [vmem:[#allocation37_spill] sm:$0xff] %v7131_v19 }
 0x33d   : > { %5320 = vmatmul.mubr.msk.f32.gmra.mxu1 %vm1745_vm13, %v8009_v54  ;;  %8024 = vst [vmem:[#allocation38_spill] sm:$0xff] %v7140_v27  ;;  %8025 = vst [vmem:[#allocation39_spill] sm:$0xff] %v7144_v18  ;;  %v8029_v18 = vld [vmem:[#allocation28_spill] sm:$0xff] }
 0x33e   : > { %3971 = vmatprep.mubr.f32.mxu1 %v7999_v34  ;;  %8026 = vst [vmem:[#allocation40_spill] sm:$0xff] %v7148_v40  ;;  %8028 = vst [vmem:[#allocation42_spill] sm:$0xff] %v7175_v25 }
 0x341   : > { %5323 = vmatmul.mubr.msk.f32.vlgmr.msra.gmra.mxu1 %vm1745_vm13, %v6849_v36  ;;  %v7061_v36 = vsub.s32 4, %v8010_v35 }
 0x342   : > { %3977 = vmatprep.mubr.f32.mxu1 %v7999_v34 }
 0x343   : > { %8013 = vst [vmem:[#allocation25_spill] sm:$0xff] %v7061_v36  ;;  %v7088_v17 = vrot.slane %v4487_v11, %v7061_v36  ;;  %v7116_v12 = vrot.slane %v4486_v26, %v7061_v36  ;;  %v7164_v58 = vrot.slane %v7097_v48, %v7061_v36 }
 0x345   : > { %5324 = vmatmul.mubr.msk.f32.gmra.mxu1 %vm1745_vm13, %v8009_v54  ;;  %8019 = vst [vmem:[#allocation33_spill] sm:$0xff] %v7116_v12  ;;  %8027 = vst [vmem:[#allocation41_spill] sm:$0xff] %v7164_v58 }
 0x3b1   : > { %v7048_v46 = vpop.f32.mrf.mxu0 }
 0x3b3   : > { %v7073_v22 = vpop.f32.mrf.mxu0 }
 0x3b5   : > { %v7118_v28 = vpop.f32.mrf.mxu0 }
 0x3b7   : > { %v3750_v14 = vpop.f32.mrf.mxu0 }
 0x3f5   : > { %v5361_v24 = vpop.f32.mrf.mxu1 }
 0x3f6   : > { %v4307_v23 = vcombine.high %v5361_v24, %v5361_v24  ;;  %v4314_v33 = vrot.slane %v5361_v24, %v8017_v7 }
 0x3f7   : > { %v3387_v57 = vpop.f32.mrf.mxu1 }
 0x3f8   : > { %v4321_v29 = vrot.slane %v4307_v23, %v8017_v7  ;;  %v4322_v6 = vcombine.high %v4314_v33, %v4314_v33  ;;  %v7135_v52 = vrot.slane %v4314_v33, %v8017_v7  ;;  %v4258_v32 = vcombine.high %v3387_v57, %v3387_v57 }
 0x3f9   : > { %v4265_v56 = vrot.slane %v3387_v57, %v8017_v7  ;;  %v3819_v4 = vpop.f32.mrf.mxu1 }
 0x3fa   : > { %v4323_v0 = vcombine.high %v4321_v29, %v4321_v29  ;;  %v7151_v16 = vrot.slane %v4321_v29, %v8017_v7  ;;  %v7154_v8 = vrot.slane %v4322_v6, %v8017_v7  ;;  %v4352_v38 = vcombine.high %v7135_v52, %v7135_v52 }
 0x3fb   : > { %v4272_v43 = vrot.slane %v4258_v32, %v8017_v7  ;;  %v4273_v49 = vcombine.high %v4265_v56, %v4265_v56  ;;  %v7160_v30 = vrot.slane %v4265_v56, %v8017_v7  ;;  %v3821_v15 = vpop.f32.mrf.mxu1  ;;  %v3985_v58 = vcombine.high %v7048_v46, %v3819_v4 }
 0x3fc   : > { %v7167_v59 = vrot.slane %v4323_v0, %v8017_v7  ;;  %v4353_v3 = vcombine.high %v7151_v16, %v7151_v16  ;;  %v4354_v50 = vcombine.high %v7154_v8, %v7154_v8  ;;  %v7187_v23 = vrot.slane %v4352_v38, %v8015_v20  ;;  %v3896_v38 = vpop.f32.mrf.mxu0 }
 0x3fd   : > { %v4274_v35 = vcombine.high %v4272_v43, %v4272_v43  ;;  %v7182_v11 = vrot.slane %v4272_v43, %v8017_v7  ;;  %v3825_v26 = vpop.f32.mrf.mxu1  ;;  %v7195_v29 = vrot.slane %v4273_v49, %v8017_v7  ;;  %v4303_v32 = vcombine.high %v7160_v30, %v7160_v30 }
 0x3fe   : > { %v4355_v24 = vcombine.high %v7167_v59, %v7167_v59  ;;  %v7190_v33 = vrot.slane %v4354_v50, %v8015_v20  ;;  %v7207_v50 = vrot.slane %v4353_v3, %v8015_v20  ;;  %v4000_v31 = vcombine.low %v7073_v22, %v3821_v15  ;;  %v3898_v60 = vpop.f32.mrf.mxu0 }
 0x3ff   : > { %v7198_v6 = vrot.slane %v4274_v35, %v8017_v7  ;;  %v4304_v56 = vcombine.high %v7182_v11, %v7182_v11  ;;  %v3827_v0 = vpop.f32.mrf.mxu1  ;;  %v3984_v7 = vcombine.low %v7048_v46, %v3819_v4  ;;  %v4305_v35 = vcombine.high %v7195_v29, %v7195_v29 }
 0x400   : > { %v7210_v49 = vrot.slane %v4355_v24, %v8015_v20  ;;  %v7224_v24 = vrot.slane %v4303_v32, %v8015_v20  ;;  %v4001_v43 = vcombine.high %v7073_v22, %v3821_v15  ;;  %v3999_v3 = vrot.slane %v3985_v58, %v8029_v18  ;;  %v3902_v39 = vpop.f32.mrf.mxu0 }
 0x401   : > { %v4306_v57 = vcombine.high %v7198_v6, %v7198_v6  ;;  %v3973_v21 = vpop.f32.mrf.mxu1  ;;  %v7230_v40 = vrot.slane %v4304_v56, %v8015_v20  ;;  %v3992_v54 = vrot.slane %v3984_v7, %v8029_v18  ;;  %v4120_v32 = vcombine.low %v7118_v28, %v3825_v26 }
 0x402   : > { %v4121_v27 = vcombine.high %v7118_v28, %v3825_v26  ;;  %v4136_v25 = vcombine.low %v3750_v14, %v3827_v0  ;;  %v4008_v46 = vrot.slane %v4000_v31, %v8029_v18  ;;  %v4015_v4 = vrot.slane %v4001_v43, %v8029_v18 }
 0x403   : > { %v3975_v37 = vpop.f32.mrf.mxu1  ;;  %v4137_v56 = vcombine.high %v3750_v14, %v3827_v0  ;;  %v4016_v9 = vcombine.low %v3896_v38, %v3973_v21  ;;  %v7241_v19 = vrot.slane %v4305_v35, %v8015_v20  ;;  %v4128_v22 = vrot.slane %v4120_v32, %v8029_v18 }
 0x404   : > { %v4135_v15 = vrot.slane %v4121_v27, %v8029_v18  ;;  %v4144_v58 = vrot.slane %v4136_v25, %v8029_v18  ;;  %v4048_v12 = vcombine.low %v3992_v54, %v4008_v46  ;;  %v4049_v36 = vcombine.high %v3992_v54, %v4008_v46 }
 0x405   : > { %v3979_v7 = vpop.f32.mrf.mxu1  ;;  %v4064_v28 = vcombine.low %v3999_v3, %v4015_v4  ;;  %v4065_v26 = vcombine.high %v3999_v3, %v4015_v4  ;;  %v4151_v31 = vrot.slane %v4137_v56, %v8029_v18  ;;  %v4017_v0 = vcombine.high %v3896_v38, %v3973_v21 }
 0x406   : > { %v4184_v43 = vcombine.low %v4128_v22, %v4144_v58  ;;  %v4185_v14 = vcombine.high %v4128_v22, %v4144_v58  ;;  %v4387_v47 = vrot.slane %v4306_v57, %v8015_v20  ;;  %v4056_v35 = vrot.slane %v4048_v12, %v6083_v51  ;;  %v3904_v57 = vpop.f32.mrf.mxu0 }
 0x407   : > { %v4063_v32 = vrot.slane %v4049_v36, %v6083_v51  ;;  %v4024_v27 = vrot.slane %v4016_v9, %v8029_v18  ;;  %v3981_v41 = vpop.f32.mrf.mxu1  ;;  %v4072_v25 = vrot.slane %v4064_v28, %v6083_v51  ;;  %v4079_v54 = vrot.slane %v4065_v26, %v6083_v51 }
 0x408   : > { %v4200_v3 = vcombine.low %v4135_v15, %v4151_v31  ;;  %v4201_v46 = vcombine.high %v4135_v15, %v4151_v31  ;;  %v7254_v4 = vrot.slane %v4184_v43, %v6083_v51  ;;  %v4032_v56 = vcombine.low %v3898_v60, %v3975_v37 }
 0x409   : > { %v4033_v21 = vcombine.high %v3898_v60, %v3975_v37  ;;  %v4152_v38 = vcombine.low %v3902_v39, %v3979_v7  ;;  %v7257_v12 = vrot.slane %v4185_v14, %v6083_v51  ;;  %v4031_v36 = vrot.slane %v4017_v0, %v8029_v18 }
 0x40a   : > { %v4153_v9 = vcombine.high %v3902_v39, %v3979_v7  ;;  %v4168_v22 = vcombine.low %v3904_v57, %v3981_v41  ;;  %v7261_v58 = vrot.slane %v4200_v3, %v6083_v51  ;;  %v4040_v28 = vrot.slane %v4032_v56, %v8029_v18 }
 0x40b   : > { %v4047_v15 = vrot.slane %v4033_v21, %v8029_v18  ;;  %v4169_v26 = vcombine.high %v3904_v57, %v3981_v41  ;;  %v7266_v31 = vrot.slane %v4201_v46, %v6083_v51  ;;  %v4160_v37 = vrot.slane %v4152_v38, %v8029_v18 }
 0x40c   : > { %v4176_v60 = vrot.slane %v4168_v22, %v8029_v18  ;;  %v4080_v43 = vcombine.low %v4024_v27, %v4040_v28  ;;  %v4081_v14 = vcombine.high %v4024_v27, %v4040_v28  ;;  %v4167_v7 = vrot.slane %v4153_v9, %v8029_v18 }
 0x40d   : > { %v4096_v0 = vcombine.low %v4031_v36, %v4047_v15  ;;  %v4097_v39 = vcombine.high %v4031_v36, %v4047_v15  ;;  %v4183_v3 = vrot.slane %v4169_v26, %v8029_v18 }
 0x40e   : > { %v4216_v56 = vcombine.low %v4160_v37, %v4176_v60  ;;  %v4217_v41 = vcombine.high %v4160_v37, %v4176_v60  ;;  %v4088_v46 = vrot.slane %v4080_v43, %v6083_v51  ;;  %v4095_v21 = vrot.slane %v4081_v14, %v6083_v51 }
 0x40f   : > { %v4104_v38 = vrot.slane %v4096_v0, %v6083_v51  ;;  %v4111_v57 = vrot.slane %v4097_v39, %v6083_v51  ;;  %v4232_v22 = vcombine.low %v4167_v7, %v4183_v3  ;;  %v4233_v28 = vcombine.high %v4167_v7, %v4183_v3 }
 0x410   : > { %v4224_v27 = vrot.slane %v4216_v56, %v6083_v51  ;;  %v4231_v36 = vrot.slane %v4217_v41, %v6083_v51  ;;  %v4112_v15 = vcombine.low %v4056_v35, %v4088_v46  ;;  %v4113_v9 = vcombine.high %v4056_v35, %v4088_v46 }
 0x411   : > { %v4114_v10 = vcombine.low %v4063_v32, %v4095_v21  ;;  %v4115_v18 = vcombine.high %v4063_v32, %v4095_v21  ;;  %v4116_v26 = vcombine.low %v4072_v25, %v4104_v38  ;;  %v4117_v37 = vcombine.high %v4072_v25, %v4104_v38 }
 0x412   : > { %v4118_v60 = vcombine.low %v4079_v54, %v4111_v57  ;;  %v4119_v43 = vcombine.high %v4079_v54, %v4111_v57  ;;  %v8030_v14 = vrot.slane %v7160_v30, %v8015_v20  ;;  %v8031_v39 = vrot.slane %v7195_v29, %v8015_v20 }
 0x413   : > { %v4438_v41 = vadd.f32 %v7224_v24, %v4114_v10  ;;  %v4439_v7 = vadd.f32 %v7241_v19, %v4115_v18  ;;  %v8032_v35 = vrot.slane %v7182_v11, %v8015_v20  ;;  %v8033_v25 = vrot.slane %v7198_v6, %v8015_v20  ;;  %v8034_v19 = vld [vmem:[#allocation29_spill] sm:$0xff] }
 0x414   : > { %v4436_v0 = vadd.f32 %v8030_v14, %v4112_v15  ;;  %v4437_v56 = vadd.f32 %v8031_v39, %v4113_v9  ;;  %v4442_v3 = vadd.f32 %v7230_v40, %v4118_v60  ;;  %v4443_v30 = vadd.f32 %v4387_v47, %v4119_v43 }
 0x415   : > { %v4440_v32 = vadd.f32 %v8032_v35, %v4116_v26  ;;  %v4441_v54 = vadd.f32 %v8033_v25, %v4117_v37  ;;  %v4454_v38 = vmax.f32 %v4438_v41, 0.0  ;;  %v4455_v29 = vmax.f32 %v4439_v7, 0.0 }
 0x416   : > { %v4452_v46 = vmax.f32 %v4436_v0, 0.0  ;;  %v4453_v21 = vmax.f32 %v4437_v56, 0.0  ;;  %v4458_v10 = vmax.f32 %v4442_v3, 0.0  ;;  %v4459_v24 = vmax.f32 %v4443_v30, 0.0 }
 0x417   : > { %v4456_v57 = vmax.f32 %v4440_v32, 0.0  ;;  %v4457_v15 = vmax.f32 %v4441_v54, 0.0  ;;  %v7301_v6 = vmul.f32 %v4454_v38, %v8034_v19  ;;  %v7304_v40 = vmul.f32 %v4455_v29, %v8034_v19 }
 0x418   : > { %v7295_v9 = vmul.f32 %v4452_v46, %v8034_v19  ;;  %v7298_v11 = vmul.f32 %v4453_v21, %v8034_v19  ;;  %v7313_v26 = vmul.f32 %v4458_v10, %v8034_v19  ;;  %v7316_v37 = vmul.f32 %v4459_v24, %v8034_v19 }
 0x419   : > { %v7307_v47 = vmul.f32 %v4456_v57, %v8034_v19  ;;  %v7310_v18 = vmul.f32 %v4457_v15, %v8034_v19  ;;  %v4240_v60 = vrot.slane %v4232_v22, %v6083_v51  ;;  %v4247_v43 = vrot.slane %v4233_v28, %v6083_v51 }
 0x41a   : > { %v4248_v14 = vcombine.low %v7254_v4, %v4224_v27  ;;  %v4249_v0 = vcombine.high %v7254_v4, %v4224_v27  ;;  %v4250_v39 = vcombine.low %v7257_v12, %v4231_v36  ;;  %v4251_v56 = vcombine.high %v7257_v12, %v4231_v36 }
 0x41b   : > { %v4520_v41 = vrot.slane %v7298_v11, 7  ;;  %v4522_v7 = vrot.slane %v7301_v6, 6  ;;  %v4252_v35 = vcombine.low %v7261_v58, %v4240_v60  ;;  %v4253_v32 = vcombine.high %v7261_v58, %v4240_v60 }
 0x41c   : > { %v4254_v22 = vcombine.low %v7266_v31, %v4247_v43  ;;  %v4255_v51 = vcombine.high %v7266_v31, %v4247_v43  ;;  %v8035_v28 = vrot.slane %v7135_v52, %v8015_v20  ;;  %v8036_v27 = vrot.slane %v7154_v8, %v8015_v20 }
 0x41d   : > { %v4446_v36 = vadd.f32 %v7187_v23, %v4250_v39  ;;  %v4447_v25 = vadd.f32 %v7190_v33, %v4251_v56  ;;  %v8037_v54 = vrot.slane %v7151_v16, %v8015_v20  ;;  %v8038_v3 = vrot.slane %v7167_v59, %v8015_v20 }
 0x41e   : > { %v4444_v4 = vadd.f32 %v8035_v28, %v4248_v14  ;;  %v4445_v12 = vadd.f32 %v8036_v27, %v4249_v0  ;;  %v4450_v30 = vadd.f32 %v7207_v50, %v4254_v22  ;;  %v4451_v52 = vadd.f32 %v7210_v49, %v4255_v51 }
 0x41f   : > { %v4448_v58 = vadd.f32 %v8037_v54, %v4252_v35  ;;  %v4449_v31 = vadd.f32 %v8038_v3, %v4253_v32  ;;  %v4462_v8 = vmax.f32 %v4446_v36, 0.0  ;;  %v4463_v38 = vmax.f32 %v4447_v25, 0.0 }
 0x420   : > { %v4460_v46 = vmax.f32 %v4444_v4, 0.0  ;;  %v4461_v21 = vmax.f32 %v4445_v12, 0.0  ;;  %v4466_v57 = vmax.f32 %v4450_v30, 0.0  ;;  %v4467_v33 = vmax.f32 %v4451_v52, 0.0 }
 0x421   : > { %v4464_v29 = vmax.f32 %v4448_v58, 0.0  ;;  %v4465_v23 = vmax.f32 %v4449_v31, 0.0  ;;  %v7353_v59 = vmul.f32 %v4462_v8, %v8034_v19  ;;  %v7356_v50 = vmul.f32 %v4463_v38, %v8034_v19 }
 0x422   : > { %v7347_v15 = vmul.f32 %v4460_v46, %v8034_v19  ;;  %v7350_v16 = vmul.f32 %v4461_v21, %v8034_v19  ;;  %v7365_v24 = vmul.f32 %v4466_v57, %v8034_v19  ;;  %v7368_v60 = vmul.f32 %v4467_v33, %v8034_v19 }
 0x423   : > { %v7359_v49 = vmul.f32 %v4464_v29, %v8034_v19  ;;  %v7362_v10 = vmul.f32 %v4465_v23, %v8034_v19  ;;  %v4536_v14 = vrot.slane %v7353_v59, 6  ;;  %v4538_v0 = vrot.slane %v7356_v50, 5 }
 0x424   : > { %v4534_v43 = vrot.slane %v7350_v16, 7  ;;  %v4588_v39 = vrot.slane %v7347_v15, 1  ;;  %v4544_v32 = vrot.slane %v7365_v24, 2  ;;  %v4546_v22 = vrot.slane %v7368_v60, 1 }
 0x425   : > { %v4540_v56 = vrot.slane %v7359_v49, 4  ;;  %v4542_v35 = vrot.slane %v7362_v10, 3  ;;  %v4590_v28 = vrot.slane %v7353_v59, 7  ;;  %v4592_v4 = vrot.slane %v7356_v50, 6 }
 0x426   : > { %v4535_v19 = vsel %vm1709_vm14, %v4534_v43, %v7347_v15  ;;  %v4589_v51 = vsel %vm1709_vm14, %v7350_v16, %v4588_v39  ;;  %v4594_v12 = vrot.slane %v7359_v49, 5  ;;  %v4596_v36 = vrot.slane %v7362_v10, 4 }
 0x427   : > { %v4537_v27 = vsel %vm1712_vm15, %v4536_v14, %v4535_v19  ;;  %v4598_v25 = vrot.slane %v7365_v24, 3  ;;  %v4591_v58 = vsel %vm1712_vm15, %v4590_v28, %v4589_v51  ;;  %v4600_v3 = vrot.slane %v7368_v60, 2 }
 0x428   : > { %v4539_v54 = vsel %vm1715_vm0, %v4538_v0, %v4537_v27  ;;  %v4650_v31 = vrot.slane %v7347_v15, 2  ;;  %v4593_v52 = vsel %vm1715_vm0, %v4592_v4, %v4591_v58  ;;  %v4651_v46 = vrot.slane %v7350_v16, 1 }
 0x429   : > { %v4541_v30 = vsel %vm1718_vm1, %v4540_v56, %v4539_v54  ;;  %v4654_v21 = vrot.slane %v7356_v50, 7  ;;  %v4595_v38 = vsel %vm1718_vm1, %v4594_v12, %v4593_v52  ;;  %v4656_v29 = vrot.slane %v7359_v49, 6 }
 0x42a   : > { %v4543_v8 = vsel %vm1721_vm2, %v4542_v35, %v4541_v30  ;;  %v4658_v23 = vrot.slane %v7362_v10, 5  ;;  %v4597_v33 = vsel %vm1721_vm2, %v4596_v36, %v4595_v38  ;;  %v4652_v43 = vsel %vm1709_vm14, %v4651_v46, %v4650_v31 }
 0x42b   : > { %v4545_v57 = vsel %vm1724_vm3, %v4544_v32, %v4543_v8  ;;  %v4660_v14 = vrot.slane %v7365_v24, 4  ;;  %v4599_v39 = vsel %vm1724_vm3, %v4598_v25, %v4597_v33  ;;  %v4653_v56 = vsel %vm1712_vm15, %v7353_v59, %v4652_v43 }
 0x42c   : > { %v7405_v0 = vsel %vm1727_vm4, %v4546_v22, %v4545_v57  ;;  %v4662_v35 = vrot.slane %v7368_v60, 3  ;;  %v7414_v32 = vsel %vm1727_vm4, %v4600_v3, %v4599_v39  ;;  %v4655_v51 = vsel %vm1715_vm0, %v4654_v21, %v4653_v56 }
 0x42d   : > { %v4557_v19 = vmul.f32 %v7405_v0, %v7076_v63  ;;  %v4712_v28 = vrot.slane %v7347_v15, 3  ;;  %v4611_v22 = vmul.f32 %v7414_v32, %v7079_v2  ;;  %v4657_v4 = vsel %vm1718_vm1, %v4656_v29, %v4655_v51 }
 0x42e   : > { %v4713_v27 = vrot.slane %v7350_v16, 2  ;;  %v4715_v12 = vrot.slane %v7353_v59, 1  ;;  %v4659_v36 = vsel %vm1721_vm2, %v4658_v23, %v4657_v4  ;;  %v4718_v25 = vrot.slane %v7359_v49, 7 }
 0x42f   : > { %v4720_v54 = vrot.slane %v7362_v10, 6  ;;  %v4722_v58 = vrot.slane %v7365_v24, 5  ;;  %v4619_v3 = vadd.f32 %v4611_v22, %v4557_v19  ;;  %v4661_v31 = vsel %vm1724_vm3, %v4660_v14, %v4659_v36 }
 0x430   : > { %v4714_v30 = vsel %vm1709_vm14, %v4713_v27, %v4712_v28  ;;  %v4724_v52 = vrot.slane %v7368_v60, 4  ;;  %v7431_v46 = vsel %vm1727_vm4, %v4662_v35, %v4661_v31  ;;  %v4774_v8 = vrot.slane %v7347_v15, 4 }
 0x431   : > { %v4716_v21 = vsel %vm1712_vm15, %v4715_v12, %v4714_v30  ;;  %v4775_v38 = vrot.slane %v7350_v16, 3  ;;  %v4673_v29 = vmul.f32 %v7431_v46, %v7082_v45  ;;  %v4777_v57 = vrot.slane %v7353_v59, 2 }
 0x432   : > { %v4717_v23 = vsel %vm1715_vm0, %v7356_v50, %v4716_v21  ;;  %v4779_v33 = vrot.slane %v7356_v50, 1  ;;  %v4782_v39 = vrot.slane %v7362_v10, 7  ;;  %v4784_v56 = vrot.slane %v7365_v24, 6 }
 0x433   : > { %v4719_v43 = vsel %vm1718_vm1, %v4718_v25, %v4717_v23  ;;  %v4776_v14 = vsel %vm1709_vm14, %v4775_v38, %v4774_v8  ;;  %v4681_v35 = vadd.f32 %v4673_v29, %v4619_v3  ;;  %v4786_v28 = vrot.slane %v7368_v60, 5 }
 0x434   : > { %v4721_v19 = vsel %vm1721_vm2, %v4720_v54, %v4719_v43  ;;  %v4778_v51 = vsel %vm1712_vm15, %v4777_v57, %v4776_v14  ;;  %v4836_v27 = vrot.slane %v7347_v15, 5  ;;  %v4837_v12 = vrot.slane %v7350_v16, 4 }
 0x435   : > { %v4723_v22 = vsel %vm1724_vm3, %v4722_v58, %v4721_v19  ;;  %v4780_v4 = vsel %vm1715_vm0, %v4779_v33, %v4778_v51  ;;  %v4839_v54 = vrot.slane %v7353_v59, 3  ;;  %v4841_v3 = vrot.slane %v7356_v50, 2 }
 0x436   : > { %v7454_v36 = vsel %vm1727_vm4, %v4724_v52, %v4723_v22  ;;  %v4781_v25 = vsel %vm1718_vm1, %v7359_v49, %v4780_v4  ;;  %v4838_v30 = vsel %vm1709_vm14, %v4837_v12, %v4836_v27  ;;  %v4843_v21 = vrot.slane %v7359_v49, 1 }
 0x437   : > { %v4735_v31 = vmul.f32 %v7454_v36, %v7085_v61  ;;  %v4783_v58 = vsel %vm1721_vm2, %v4782_v39, %v4781_v25  ;;  %v4840_v52 = vsel %vm1712_vm15, %v4839_v54, %v4838_v30  ;;  %v4846_v38 = vrot.slane %v7365_v24, 7 }
 0x438   : > { %v4785_v8 = vsel %vm1724_vm3, %v4784_v56, %v4783_v58  ;;  %v4848_v29 = vrot.slane %v7368_v60, 6  ;;  %v4842_v33 = vsel %vm1715_vm0, %v4841_v3, %v4840_v52  ;;  %v4898_v43 = vrot.slane %v7347_v15, 6 }
 0x439   : > { %v4743_v23 = vadd.f32 %v4735_v31, %v4681_v35  ;;  %v7470_v57 = vsel %vm1727_vm4, %v4786_v28, %v4785_v8  ;;  %v4844_v39 = vsel %vm1718_vm1, %v4843_v21, %v4842_v33  ;;  %v4899_v56 = vrot.slane %v7350_v16, 5 }
 0x43a   : > { %v4797_v14 = vmul.f32 %v7470_v57, %v7088_v17  ;;  %v4901_v19 = vrot.slane %v7353_v59, 4  ;;  %v4845_v51 = vsel %vm1721_vm2, %v7362_v10, %v4844_v39  ;;  %v4903_v35 = vrot.slane %v7356_v50, 3 }
 0x43b   : > { %v4905_v28 = vrot.slane %v7359_v49, 2  ;;  %v4907_v22 = vrot.slane %v7362_v10, 1  ;;  %v4847_v27 = vsel %vm1724_vm3, %v4846_v38, %v4845_v51  ;;  %v4900_v12 = vsel %vm1709_vm14, %v4899_v56, %v4898_v43 }
 0x43c   : > { %v4805_v4 = vadd.f32 %v4797_v14, %v4743_v23  ;;  %v4910_v25 = vrot.slane %v7368_v60, 7  ;;  %v7488_v54 = vsel %vm1727_vm4, %v4848_v29, %v4847_v27  ;;  %v4902_v3 = vsel %vm1712_vm15, %v4901_v19, %v4900_v12 }
 0x43d   : > { %v4960_v31 = vrot.slane %v7347_v15, 7  ;;  %v4961_v58 = vrot.slane %v7350_v16, 6  ;;  %v4859_v30 = vmul.f32 %v7488_v54, %v7091_v44  ;;  %v4904_v21 = vsel %vm1715_vm0, %v4903_v35, %v4902_v3 }
 0x43e   : > { %v4963_v8 = vrot.slane %v7353_v59, 5  ;;  %v4965_v52 = vrot.slane %v7356_v50, 4  ;;  %v4906_v38 = vsel %vm1718_vm1, %v4905_v28, %v4904_v21  ;;  %v4967_v23 = vrot.slane %v7359_v49, 3 }
 0x43f   : > { %v4962_v29 = vsel %vm1709_vm14, %v4961_v58, %v4960_v31  ;;  %v4969_v33 = vrot.slane %v7362_v10, 2  ;;  %v4867_v15 = vadd.f32 %v4859_v30, %v4805_v4  ;;  %v4908_v16 = vsel %vm1721_vm2, %v4907_v22, %v4906_v38 }
 0x440   : > { %v4964_v43 = vsel %vm1712_vm15, %v4963_v8, %v4962_v29  ;;  %v4971_v14 = vrot.slane %v7365_v24, 1  ;;  %v4909_v59 = vsel %vm1724_vm3, %v7365_v24, %v4908_v16  ;;  %v4521_v39 = vsel %vm1709_vm14, %v4520_v41, %v7295_v9 }
 0x441   : > { %v4966_v50 = vsel %vm1715_vm0, %v4965_v52, %v4964_v43  ;;  %v4524_v49 = vrot.slane %v7304_v40, 5  ;;  %v7514_v10 = vsel %vm1727_vm4, %v4910_v25, %v4909_v59  ;;  %v4523_v19 = vsel %vm1712_vm15, %v4522_v7, %v4521_v39 }
 0x442   : > { %v4968_v56 = vsel %vm1718_vm1, %v4967_v23, %v4966_v50  ;;  %v4526_v24 = vrot.slane %v7307_v47, 4  ;;  %v4921_v51 = vmul.f32 %v7514_v10, %v7094_v62  ;;  %v4528_v28 = vrot.slane %v7310_v18, 3 }
 0x443   : > { %v4970_v35 = vsel %vm1721_vm2, %v4969_v33, %v4968_v56  ;;  %v4525_v41 = vsel %vm1715_vm0, %v4524_v49, %v4523_v19  ;;  %v4530_v27 = vrot.slane %v7313_v26, 2  ;;  %v4532_v12 = vrot.slane %v7316_v37, 1 }
 0x444   : > { %v4972_v22 = vsel %vm1724_vm3, %v4971_v14, %v4970_v35  ;;  %v4527_v4 = vsel %vm1718_vm1, %v4526_v24, %v4525_v41  ;;  %v4929_v7 = vadd.f32 %v4921_v51, %v4867_v15  ;;  %v4574_v31 = vrot.slane %v7295_v9, 1 }
 0x445   : > { %v7532_v25 = vsel %vm1727_vm4, %v7368_v60, %v4972_v22  ;;  %v4529_v3 = vsel %vm1721_vm2, %v4528_v28, %v4527_v4  ;;  %v4576_v21 = vrot.slane %v7301_v6, 7  ;;  %v7542_v8 = vrot.slane %v7097_v48, %v7067_v55 }
 0x446   : > { %v4983_v58 = vmul.f32 %v7532_v25, %v7100_v53  ;;  %v4531_v30 = vsel %vm1724_vm3, %v4530_v27, %v4529_v3  ;;  %v4575_v60 = vsel %vm1709_vm14, %v7298_v11, %v4574_v31  ;;  %v4578_v38 = vrot.slane %v7304_v40, 6 }
 0x447   : > { %v7545_v52 = vsel %vm1727_vm4, %v4532_v12, %v4531_v30  ;;  %v4580_v29 = vrot.slane %v7307_v47, 5  ;;  %v4577_v15 = vsel %vm1712_vm15, %v4576_v21, %v4575_v60  ;;  %v4582_v16 = vrot.slane %v7310_v18, 4 }
 0x448   : > { %v4991_v23 = vadd.f32 %v4983_v58, %v4929_v7  ;;  %v4556_v33 = vmul.f32 %v7545_v52, %v7076_v63  ;;  %v4579_v43 = vsel %vm1715_vm0, %v4578_v38, %v4577_v15  ;;  %v4584_v14 = vrot.slane %v7313_v26, 3 }
 0x449   : > { %v4636_v59 = vrot.slane %v7295_v9, 2  ;;  %v4637_v50 = vrot.slane %v7298_v11, 1  ;;  %v4581_v39 = vsel %vm1718_vm1, %v4580_v29, %v4579_v43  ;;  %v4586_v49 = vrot.slane %v7316_v37, 2 }
 0x44a   : > { %5363 = vmatpush3.msra.mxu0 %v4991_v23  ;;  %v4640_v56 = vrot.slane %v7304_v40, 7  ;;  %v4642_v63 = vrot.slane %v7307_v47, 6  ;;  %v4583_v19 = vsel %vm1721_vm2, %v4582_v16, %v4581_v39  ;;  %v4644_v51 = vrot.slane %v7310_v18, 5 }
 0x44b   : > { %5364 = vmatprep.subr.mxu0 %v7999_v34  ;;  %v4638_v24 = vsel %vm1709_vm14, %v4637_v50, %v4636_v59  ;;  %v4646_v35 = vrot.slane %v7313_v26, 4  ;;  %v4585_v41 = vsel %vm1724_vm3, %v4584_v14, %v4583_v19  ;;  %v4698_v22 = vrot.slane %v7295_v9, 3 }
 0x44c   : > { %v4639_v28 = vsel %vm1712_vm15, %v7301_v6, %v4638_v24  ;;  %v4699_v4 = vrot.slane %v7298_v11, 2  ;;  %v7574_v27 = vsel %vm1727_vm4, %v4586_v49, %v4585_v41  ;;  %v4648_v7 = vrot.slane %v7316_v37, 3 }
 0x44d   : > { %v4641_v12 = vsel %vm1715_vm0, %v4640_v56, %v4639_v28  ;;  %v4701_v3 = vrot.slane %v7301_v6, 1  ;;  %v4610_v31 = vmul.f32 %v7574_v27, %v7079_v2  ;;  %v4704_v21 = vrot.slane %v7307_v47, 7 }
 0x44e   : > { %v4643_v58 = vsel %vm1718_vm1, %v4642_v63, %v4641_v12  ;;  %v4700_v30 = vsel %vm1709_vm14, %v4699_v4, %v4698_v22  ;;  %v4706_v29 = vrot.slane %v7310_v18, 6  ;;  %v4708_v23 = vrot.slane %v7313_v26, 5 }
 0x44f   : > { %v4645_v60 = vsel %vm1721_vm2, %v4644_v51, %v4643_v58  ;;  %v4702_v38 = vsel %vm1712_vm15, %v4701_v3, %v4700_v30  ;;  %v4618_v15 = vadd.f32 %v4610_v31, %v4556_v33  ;;  %v4760_v43 = vrot.slane %v7295_v9, 4 }
 0x450   : > { %v4647_v16 = vsel %vm1724_vm3, %v4646_v35, %v4645_v60  ;;  %v4703_v2 = vsel %vm1715_vm0, %v7304_v40, %v4702_v38  ;;  %v4761_v50 = vrot.slane %v7298_v11, 3  ;;  %v4763_v39 = vrot.slane %v7301_v6, 2 }
 0x451   : > { %v7593_v14 = vsel %vm1727_vm4, %v4648_v7, %v4647_v16  ;;  %v4705_v59 = vsel %vm1718_vm1, %v4704_v21, %v4703_v2  ;;  %v4710_v56 = vrot.slane %v7316_v37, 4  ;;  %v4765_v63 = vrot.slane %v7304_v40, 1 }
 0x452   : > { %v4672_v49 = vmul.f32 %v7593_v14, %v7082_v45  ;;  %v4707_v33 = vsel %vm1721_vm2, %v4706_v29, %v4705_v59  ;;  %v4762_v24 = vsel %vm1709_vm14, %v4761_v50, %v4760_v43  ;;  %v4768_v51 = vrot.slane %v7310_v18, 7 }
 0x453   : > { %v4709_v19 = vsel %vm1724_vm3, %v4708_v23, %v4707_v33  ;;  %v4770_v35 = vrot.slane %v7313_v26, 6  ;;  %v4764_v45 = vsel %vm1712_vm15, %v4763_v39, %v4762_v24  ;;  %v4822_v22 = vrot.slane %v7295_v9, 5 }
 0x454   : > { %v4680_v41 = vadd.f32 %v4672_v49, %v4618_v15  ;;  %v7608_v28 = vsel %vm1727_vm4, %v4710_v56, %v4709_v19  ;;  %v4766_v12 = vsel %vm1715_vm0, %v4765_v63, %v4764_v45  ;;  %v4823_v7 = vrot.slane %v7298_v11, 4 }
 0x455   : > { %v4734_v4 = vmul.f32 %v7608_v28, %v7085_v61  ;;  %v4825_v3 = vrot.slane %v7301_v6, 3  ;;  %v4767_v31 = vsel %vm1718_vm1, %v7307_v47, %v4766_v12  ;;  %v4772_v58 = vrot.slane %v7316_v37, 5 }
 0x456   : > { %v4827_v30 = vrot.slane %v7304_v40, 2  ;;  %v4829_v21 = vrot.slane %v7307_v47, 1  ;;  %v4769_v38 = vsel %vm1721_vm2, %v4768_v51, %v4767_v31  ;;  %v4824_v61 = vsel %vm1709_vm14, %v4823_v7, %v4822_v22 }
 0x457   : > { %v4742_v60 = vadd.f32 %v4734_v4, %v4680_v41  ;;  %v4832_v29 = vrot.slane %v7313_v26, 7  ;;  %v4771_v23 = vsel %vm1724_vm3, %v4770_v35, %v4769_v38  ;;  %v4826_v15 = vsel %vm1712_vm15, %v4825_v3, %v4824_v61 }
 0x458   : > { %v4884_v16 = vrot.slane %v7295_v9, 6  ;;  %v4885_v2 = vrot.slane %v7298_v11, 5  ;;  %v7630_v43 = vsel %vm1727_vm4, %v4772_v58, %v4771_v23  ;;  %v4828_v59 = vsel %vm1715_vm0, %v4827_v30, %v4826_v15 }
 0x459   : > { %v4834_v50 = vrot.slane %v7316_v37, 6  ;;  %v4887_v39 = vrot.slane %v7301_v6, 4  ;;  %v4796_v49 = vmul.f32 %v7630_v43, %v7088_v17  ;;  %v4830_v33 = vsel %vm1718_vm1, %v4829_v21, %v4828_v59 }
 0x45a   : > { %v4886_v56 = vsel %vm1709_vm14, %v4885_v2, %v4884_v16  ;;  %v4889_v63 = vrot.slane %v7304_v40, 3  ;;  %v4831_v19 = vsel %vm1721_vm2, %v7310_v18, %v4830_v33  ;;  %v4891_v51 = vrot.slane %v7307_v47, 2 }
 0x45b   : > { %v4888_v24 = vsel %vm1712_vm15, %v4887_v39, %v4886_v56  ;;  %v4893_v35 = vrot.slane %v7310_v18, 1  ;;  %v4804_v41 = vadd.f32 %v4796_v49, %v4742_v60  ;;  %v4833_v45 = vsel %vm1724_vm3, %v4832_v29, %v4831_v19  ;;  %v8039_v49 = vld [vmem:[#allocation27_spill] sm:$0xff]  ;;  %v8040_v56 = vld [vmem:[#allocation30_spill] sm:$0xff] }
 0x45c   : > { %v4890_v17 = vsel %vm1715_vm0, %v4889_v63, %v4888_v24  ;;  %v4946_v22 = vrot.slane %v7295_v9, 7  ;;  %v7649_v4 = vsel %vm1727_vm4, %v4834_v50, %v4833_v45  ;;  %v4947_v7 = vrot.slane %v7298_v11, 6  ;;  %v7663_v9 = vld [vmem:[%s6022_s28] sm:$0xff]  ;;  %v8042_v45 = vld [vmem:[#allocation31_spill] sm:$0xff] }
 0x45d   : > { %v4892_v12 = vsel %vm1718_vm1, %v4891_v51, %v4890_v17  ;;  %v4949_v3 = vrot.slane %v7301_v6, 5  ;;  %v4858_v31 = vmul.f32 %v7649_v4, %v7091_v44  ;;  %v4896_v30 = vrot.slane %v7316_v37, 7 }
 0x45e   : > { %v4894_v58 = vsel %vm1721_vm2, %v4893_v35, %v4892_v12  ;;  %v7660_v21 = vrot.slane %v7097_v48, %v7070_v42  ;;  %v4948_v11 = vsel %vm1709_vm14, %v4947_v7, %v4946_v22  ;;  %v4951_v6 = vrot.slane %v7304_v40, 4  ;;  %v8041_v35 = vld [vmem:[#allocation26_spill] sm:$0xff] }
 0x45f   : > { %v4895_v60 = vsel %vm1724_vm3, %v7313_v26, %v4894_v58  ;;  %v4953_v38 = vrot.slane %v7307_v47, 3  ;;  %v4866_v44 = vadd.f32 %v4858_v31, %v4804_v41  ;;  %v4950_v29 = vsel %vm1712_vm15, %v4949_v3, %v4948_v11  ;;  %v8044_v3 = vld [vmem:[#allocation33_spill] sm:$0xff] }
 0x460   : > { %v7671_v61 = vsel %vm1727_vm4, %v4896_v30, %v4895_v60  ;;  %v4555_v48 = vmul.f32 %v7405_v0, %v7103_v13  ;;  %v4952_v23 = vsel %vm1715_vm0, %v4951_v6, %v4950_v29  ;;  %v4955_v15 = vrot.slane %v7310_v18, 2  ;;  %v8045_v58 = vld [vmem:[#allocation37_spill] sm:$0xff]  ;;  %v8046_v60 = vld [vmem:[#allocation32_spill] sm:$0xff] }
 0x461   : > { %v4609_v16 = vmul.f32 %v7414_v32, %v7106_v5  ;;  %v7682_v40 = vrot.slane %v7663_v9, %v8015_v20  ;;  %v4920_v47 = vmul.f32 %v7671_v61, %v7094_v62  ;;  %v4954_v2 = vsel %vm1718_vm1, %v4953_v38, %v4952_v23  ;;  %v8048_v23 = vld [vmem:[#allocation34_spill] sm:$0xff] }
 0x462   : > { %v4957_v59 = vrot.slane %v7313_v26, 1  ;;  %v7690_v50 = vrot.slane %v7663_v9, %v7051_v1  ;;  %v4956_v18 = vsel %vm1721_vm2, %v4955_v15, %v4954_v2  ;;  %v4671_v33 = vmul.f32 %v7431_v46, %v8039_v49  ;;  %v8050_v2 = vld [vmem:[#allocation36_spill] sm:$0xff] }
 0x463   : > { %v4617_v39 = vadd.f32 %v4609_v16, %v4555_v48  ;;  %v7697_v63 = vrot.slane %v7663_v9, %v8040_v56  ;;  %v4928_v19 = vadd.f32 %v4920_v47, %v4866_v44  ;;  %v4554_v26 = vmul.f32 %v7545_v52, %v7103_v13  ;;  %v8047_v44 = vld [vmem:[#allocation38_spill] sm:$0xff]  ;;  %v8049_v16 = vld [vmem:[#allocation35_spill] sm:$0xff] }
 0x464   : > { %v4958_v62 = vsel %vm1724_vm3, %v4957_v59, %v4956_v18  ;;  %v4608_v1 = vmul.f32 %v7574_v27, %v7106_v5  ;;  %v4733_v41 = vmul.f32 %v7454_v36, %v8041_v35  ;;  %v7712_v17 = vrot.slane %v7663_v9, %v8042_v45  ;;  %v8043_v5 = vld [vmem:[#allocation25_spill] sm:$0xff]  ;;  %v8052_v45 = vld [vmem:[#allocation40_spill] sm:$0xff] }
 0x465   : > { %v7706_v24 = vsel %vm1727_vm4, %v7316_v37, %v4958_v62  ;;  %v4679_v51 = vadd.f32 %v4671_v33, %v4617_v39  ;;  %v4670_v13 = vmul.f32 %v7593_v14, %v8039_v49  ;;  %v7720_v7 = vrot.slane %v7663_v9, %v8043_v5  ;;  %v8051_v33 = vld [vmem:[#allocation39_spill] sm:$0xff] }
 0x466   : > { %v4982_v22 = vmul.f32 %v7706_v24, %v7100_v53  ;;  %v4616_v12 = vadd.f32 %v4608_v1, %v4554_v26  ;;  %v4795_v31 = vmul.f32 %v7470_v57, %v8044_v3  ;;  %v4553_v30 = vmul.f32 %v7405_v0, %v8045_v58 }
 0x467   : > { %v4741_v37 = vadd.f32 %v4733_v41, %v4679_v51  ;;  %v7728_v11 = vrot.slane %v7663_v9, %v8046_v60  ;;  %v4732_v38 = vmul.f32 %v7608_v28, %v8041_v35  ;;  %v4607_v29 = vmul.f32 %v7414_v32, %v8047_v44 }
 0x468   : > { %v4990_v53 = vadd.f32 %v4982_v22, %v4928_v19  ;;  %v4678_v6 = vadd.f32 %v4670_v13, %v4616_v12  ;;  %v4857_v15 = vmul.f32 %v7488_v54, %v8048_v23  ;;  %v4919_v47 = vmul.f32 %v7514_v10, %v8049_v16 }
 0x469   : > { %v4803_v48 = vadd.f32 %v4795_v31, %v4741_v37  ;;  %v4981_v59 = vmul.f32 %v7532_v25, %v8050_v2  ;;  %v4794_v39 = vmul.f32 %v7630_v43, %v8044_v3  ;;  %v4615_v49 = vadd.f32 %v4607_v29, %v4553_v30 }
 0x46a   : > { %5365 = vmatpush3.msra.mxu0 %v4990_v53  ;;  %v4740_v18 = vadd.f32 %v4732_v38, %v4678_v6  ;;  %v4669_v56 = vmul.f32 %v7431_v46, %v8051_v33  ;;  %v4856_v62 = vmul.f32 %v7649_v4, %v8048_v23  ;;  %v4552_v26 = vmul.f32 %v7545_v52, %v8045_v58  ;;  %v8053_v58 = vld [vmem:[#allocation41_spill] sm:$0xff]  ;;  %v8054_v23 = vld [vmem:[#allocation42_spill] sm:$0xff] }
 0x46b   : > { %5366 = vmatprep.subr.mxu0 %v7999_v34  ;;  %v4865_v19 = vadd.f32 %v4857_v15, %v4803_v48  ;;  %v4606_v1 = vmul.f32 %v7574_v27, %v8047_v44  ;;  %v4918_v35 = vmul.f32 %v7671_v61, %v8049_v16  ;;  %v4731_v22 = vmul.f32 %v7454_v36, %v8052_v45 }
 0x46c   : > { %v4802_v51 = vadd.f32 %v4794_v39, %v4740_v18  ;;  %v4677_v41 = vadd.f32 %v4669_v56, %v4615_v49  ;;  %v4980_v13 = vmul.f32 %v7706_v24, %v8050_v2  ;;  %v4668_v37 = vmul.f32 %v7593_v14, %v8051_v33 }
 0x46d   : > { %v4927_v12 = vadd.f32 %v4919_v47, %v4865_v19  ;;  %v4614_v5 = vadd.f32 %v4606_v1, %v4552_v26  ;;  %v4793_v30 = vmul.f32 %v7470_v57, %v8053_v58  ;;  %v4551_v60 = vmul.f32 %v7405_v0, %v7682_v40 }
 0x46e   : > { %v4864_v3 = vadd.f32 %v4856_v62, %v4802_v51  ;;  %v4739_v31 = vadd.f32 %v4731_v22, %v4677_v41  ;;  %v4730_v38 = vmul.f32 %v7608_v28, %v8052_v45  ;;  %v4605_v44 = vmul.f32 %v7414_v32, %v7690_v50 }
 0x46f   : > { %v4989_v53 = vadd.f32 %v4981_v59, %v4927_v12  ;;  %v4676_v6 = vadd.f32 %v4668_v37, %v4614_v5  ;;  %v4855_v15 = vmul.f32 %v7488_v54, %v8054_v23  ;;  %v4917_v16 = vmul.f32 %v7514_v10, %v7542_v8 }
 0x470   : > { %v4926_v29 = vadd.f32 %v4918_v35, %v4864_v3  ;;  %v4801_v48 = vadd.f32 %v4793_v30, %v4739_v31  ;;  %v4792_v0 = vmul.f32 %v7630_v43, %v8053_v58  ;;  %v4613_v2 = vadd.f32 %v4605_v44, %v4551_v60 }
 0x471   : > { %5367 = vmatpush3.msra.mxu0 %v4989_v53  ;;  %v4738_v47 = vadd.f32 %v4730_v38, %v4676_v6  ;;  %v4667_v59 = vmul.f32 %v7431_v46, %v7697_v63  ;;  %v4854_v39 = vmul.f32 %v7649_v4, %v8054_v23  ;;  %v4550_v49 = vmul.f32 %v7545_v52, %v7682_v40 }
 0x472   : > { %5368 = vmatprep.subr.mxu0 %v7999_v34  ;;  %v4988_v32 = vadd.f32 %v4980_v13, %v4926_v29  ;;  %v4863_v18 = vadd.f32 %v4855_v15, %v4801_v48  ;;  %v4729_v19 = vmul.f32 %v7454_v36, %v7712_v17  ;;  %v4604_v62 = vmul.f32 %v7574_v27, %v7690_v50 }
 0x473   : > { %v4800_v33 = vadd.f32 %v4792_v0, %v4738_v47  ;;  %v4675_v56 = vadd.f32 %v4667_v59, %v4613_v2  ;;  %v4979_v26 = vmul.f32 %v7532_v25, %v7660_v21  ;;  %v4916_v1 = vmul.f32 %v7671_v61, %v7542_v8 }
 0x474   : > { %5369 = vmatpush3.msra.mxu0 %v4988_v32  ;;  %v4925_v46 = vadd.f32 %v4917_v16, %v4863_v18  ;;  %v4791_v51 = vmul.f32 %v7470_v57, %v7720_v7  ;;  %v4612_v35 = vadd.f32 %v4604_v62, %v4550_v49  ;;  %v4666_v36 = vmul.f32 %v7593_v14, %v7697_v63 }
 0x475   : > { %5370 = vmatprep.subr.mxu0 %v7999_v34  ;;  %v4862_v52 = vadd.f32 %v4854_v39, %v4800_v33  ;;  %v4737_v40 = vadd.f32 %v4729_v19, %v4675_v56  ;;  %v4978_v50 = vmul.f32 %v7706_v24, %v7660_v21  ;;  %v4853_v41 = vmul.f32 %v7488_v54, %v7728_v11 }
 0x476   : > { %v4987_v27 = vadd.f32 %v4979_v26, %v4925_v46  ;;  %v4871_v8 = vrot.slane %v7663_v9, %v7067_v55  ;;  %v4674_v22 = vadd.f32 %v4666_v36, %v4612_v35  ;;  %v4728_v12 = vmul.f32 %v7608_v28, %v7712_v17 }
 0x477   : > { %v4924_v45 = vadd.f32 %v4916_v1, %v4862_v52  ;;  %v4799_v57 = vadd.f32 %v4791_v51, %v4737_v40  ;;  %v4933_v14 = vrot.slane %v7663_v9, %v7070_v42  ;;  %v4790_v55 = vmul.f32 %v7630_v43, %v7720_v7  ;;  %v5512_v7 = vld [vmem:[%s6050_s9] sm:$0x7]  ;;  %s7825_s9 = scalar_lea.hbm %s8057_s16, %s5328_s5 }
 0x478   : > { %5371 = vmatpush3.msra.mxu0 %v4987_v27  ;;  %v4915_v13 = vmul.f32 %v7514_v10, %v4871_v8  ;;  %v4736_v54 = vadd.f32 %v4728_v12, %v4674_v22  ;;  %v4852_v10 = vmul.f32 %v7649_v4, %v7728_v11  ;;  %v4914_v17 = vmul.f32 %v7671_v61, %v4871_v8  ;;  %v4992_v4 = vld [vmem:[%s8055_s10] sm:$0xff] }
 0x479   : > { %5372 = vmatprep.subr.mxu0 %v7999_v34  ;;  %v4986_v21 = vadd.f32 %v4978_v50, %v4924_v45  ;;  %v4861_v63 = vadd.f32 %v4853_v41, %v4799_v57  ;;  %v4977_v37 = vmul.f32 %v7532_v25, %v4933_v14  ;;  %v4976_v43 = vmul.f32 %v7706_v24, %v4933_v14 }
 0x47a   : > { %v4798_v28 = vadd.f32 %v4790_v55, %v4736_v54  ;;  %v5067_v11 = vand.u32 2147483647, %v5512_v7  ;;  %v5772_v61 = vmov 0  }
 0x47b   : > { %5373 = vmatpush3.msra.mxu0 %v4986_v21  ;;  %v4923_v5 = vadd.f32 %v4915_v13, %v4861_v63 }
 0x47c   : > { %5374 = vmatprep.subr.mxu0 %v7999_v34  ;;  %v4860_v9 = vadd.f32 %v4852_v10, %v4798_v28  ;;  %vm5068_vm7 = vcmp.eq.f32.partialorder %v5067_v11, inf }
 0x47d   : > { %v4985_v42 = vadd.f32 %v4977_v37, %v4923_v5  ;;  %v5069_v31 = vsel %vm5068_vm7, 1, %v5772_v61 }
 0x47e   : > { %v4922_v3 = vadd.f32 %v4914_v17, %v4860_v9  ;;  %v5073_v24 = vrot.slane %v5069_v31, %v8015_v20 }
 0x47f   : > { %5375 = vmatpush3.msra.mxu0 %v4985_v42 }
 0x480   : > { %5376 = vmatprep.subr.mxu0 %v7999_v34  ;;  %v4984_v25 = vadd.f32 %v4976_v43, %v4922_v3  ;;  %vm5074_vm8 = vcmp.eq.s32.totalorder %v5073_v24, 1 }
 0x482   : > { %5377 = vmatpush3.msra.mxu0 %v4984_v25 }
 0x483   : > { %5379 = vmatmul.mubr.msk.f32.vlgmr.msra.gmra.mxu0 %vm4993_vm6, %v4992_v4 }
 0x543   : > { %v5063_v34 = vpop.f32.mrf.mxu0 }
 0x544   : > { %v5075_v58 = vsel %vm5074_vm8, inf, %v5063_v34 }
 0x545   : > { %5076 = vst [vmem:[%s526_s6] sm:$0xff] %v5075_v58  ;;  %v5380_v30 = vpop.f32.mrf.mxu0 }
 0x546   : > { %5661 = shalt.err (!%p5658_p3)
}
 0x547   : > { %s5662_s27 = scalar_lea.hbm %s7825_s9, 128  ;;  %s5666_s29 = scalar_lea.hbm %s8058_s23, 512 }
 0x548   : > { %p5663_p12 = scmp.ne.s32.totalorder %s7825_s9, %s5662_s27  ;;  %p5667_p8 = scmp.lt.s32.totalorder %s7825_s9, %s8058_s23 }
 0x549   : > { %p5668_p9 = scmp.lt.s32.totalorder %s5666_s29, %s5662_s27 }
 0x54a   : > { %p5664_p2 = pnand %p5663_p12, %p8059_p4 }
 0x54b   : > { %p5669_p0 = por %p5668_p9, %p5667_p8 }
 0x54c   : > { %p5665_p10 = pneg %p5664_p2 }
 0x54e   : > { %p5670_p7 = pnand %p5669_p0, %p5665_p10 }
 0x550   : > { %5673 = shalt.err (!%p5670_p7)
}
 0x551   : > { %5400 = dma.vmem_to_hbm [thread:$0]  (%p8059_p4), %s7827_s1, 128, %s7825_s9, %s5078_s13  }
 0x552 PF: > { %s8060_s30 = sld [smem:[#allocation17_spill]]  ;;  %p5430_p6 = scmp.ge.s32.totalorder %s5756_s20, 2 }
 0x553   : > { %s8061_s4 = sld [smem:[#allocation22_spill]] }
 0x558   : > { %s5105_s5 = sand.u32 1, %s8060_s30  }
 0x559   : > { %p8062_p1 = scmp.ne.s32.totalorder %s8061_s4, 0  ;;  %s5106_s6 = scalar_lea.sflag [#allocation4], %s5105_s5 }
 0x55b   : > { %p5420_p11 = pnand %p5430_p6, %p8062_p1 }
 0x55d   : > { %p5421_p13 = pneg %p5420_p11 }
 0x55f   : > { %5723 = dma.done.wait (%p5421_p13), %s5106_s6, 128  }
 0x560   : > { %5725 = vsyncadd (%p5421_p13), %s5106_s6, 4294967168  ;;  %s30_s20 = sadd.s32 1, %s5756_s20   ;;  %s8063_s11 = sld [smem:[#allocation23_spill]] }
 0x561   : > { %p27_p5 = scmp.ge.s32.totalorder %s30_s20, 6   ;;  %s8064_s1 = sld [smem:[#allocation24_spill]] }
 0x562   : > { %s8065_s13 = smov %s5732_s14  ;;  %s8066_s14 = smov %s5736_s15 }
 0x563   : > { %s8067_s15 = smov %s5990_s22  ;;  %s8068_s16 = smov %s5748_s18 }
 0x564   : > { %s8069_s17 = smov %s5752_s19  ;;  %29 = sbr.rel (!%p27_p5) target bundleno = 21 (0x15), region = 136 }
 0x566   : > { %s8070_s18 = smov %s8063_s11 }
 0x567   : > { %s8071_s19 = smov %s8064_s1 }
 0x569   :  { %5111 = vsyncpa [#allocation3], 1 }
 0x56a   :  { %5113 = vsyncpa [#allocation3 + $0x1], 1 }
 0x56b   :  { %5114 = vsyncpa [#allocation6], 1 }
 0x56c   :  { %5116 = vsyncpa [#allocation6 + $0x1], 1 }
 0x56d   :  { %5117 = vsyncpa [#allocation9], 1 }
 0x56e   :  { %5118 = vsyncpa [#allocation4], 1 }
 0x56f   :  { %5120 = vsyncpa [#allocation4 + $0x1], 1 }

</bundles_post_ra>
